<compile_context>
chip_gen: v6e
topology: v6e:2x2x1
jax: 0.10.0
libtpu: 0.0.40
codegen_flags: <defaults>
</compile_context>

<pallas_src>
from functools import partial

import numpy as np

import jax
import jax.numpy as jnp
from jax.experimental import pallas as pl
from jax.experimental.pallas import tpu as pltpu


def _dot(a, b):
    # Default precision (single-pass bf16 MXU) per the perf review.
    return jnp.dot(a, b, preferred_element_type=jnp.float32)


def _roll(x, shift, axis):
    """jnp.roll semantics (result[i] = x[i - shift]) via the XLU rotate."""
    n = x.shape[axis]
    return pltpu.roll(x, shift % n, axis=axis)


# ----------------------------------------------------------------------------
# Fused autoencoder kernel.  One grid step processes TB images stacked along
# the row axis: every activation slab has TB*H rows.
# ----------------------------------------------------------------------------
def _autoencoder_kernel(x_ref, v1_ref, b1_ref, v2_ref, b2_ref,
                        u1_ref, c1_ref, u2_ref, c2_ref, mask_ref, o_ref):
    TBH, W = x_ref.shape
    WC1 = b1_ref.shape[1]
    C1 = WC1 // W                      # 16
    W2 = W // 2
    C2 = b2_ref.shape[1] // W2         # 4
    W2C3 = c1_ref.shape[1]             # W2 * 16

    def m(k):                          # (TBH, 1) host-precomputed row masks
        return mask_ref[:, k:k + 1]

    x = x_ref[...]                                            # (TBH, W)

    # ---- Conv2d(1, 16, 3, pad=1) + ReLU: K-stacked taps, one matmul --------
    xs = jnp.concatenate(
        [m(0) * _roll(x, 1, 0),        # tap kh=0 : x[r-1], zero at image top
         x,                            # tap kh=1 : x[r]
         m(1) * _roll(x, -1, 0)],      # tap kh=2 : x[r+1], zero at image bottom
        axis=1)                                               # (TBH, 3W)
    a1 = jnp.maximum(_dot(xs, v1_ref[...]) + b1_ref[...], 0.0)  # (TBH, W*C1)

    # ---- MaxPool2d(2, 2) #1: XLU rolls + VPU max ---------------------------
    # Result valid at even rows / even column groups; wrapped data lands only
    # on odd positions never read downstream.
    mr = jnp.maximum(a1, _roll(a1, -1, 0))
    m1 = jnp.maximum(mr, _roll(mr, -C1, 1))

    # ---- Conv2d(16, 4, 3, pad=1) + ReLU on the stride-2 row grid -----------
    s2 = jnp.concatenate(
        [m(2) * _roll(m1, 2, 0),       # tap kh=0 : pooled row i-1
         m1,                           # tap kh=1
         m(3) * _roll(m1, -2, 0)],     # tap kh=2 : pooled row i+1
        axis=1)                                               # (TBH, 3*W*C1)
    a2 = jnp.maximum(_dot(s2, v2_ref[...]) + b2_ref[...], 0.0)  # (TBH, W2*C2)

    # ---- MaxPool2d(2, 2) #2 -------------------------------------------------
    mr2 = jnp.maximum(a2, _roll(a2, -2, 0))
    m2 = jnp.maximum(mr2, _roll(mr2, -C2, 1))                 # valid rows %4==0

    # ---- ConvTranspose2d(4, 16, 2, stride=2) + ReLU -------------------------
    # One matmul for both dh taps (weights stacked along N), then the pixel
    # shuffle along rows is a roll + masked combine.
    t = _dot(m2, u1_ref[...])                                 # (TBH, 2*W2*C3)
    y = m(4) * t[:, :W2C3] + m(5) * _roll(t[:, W2C3:], 2, 0)
    y = jnp.maximum(y + c1_ref[...], 0.0)                     # (TBH, W2*C3)

    # ---- ConvTranspose2d(16, 1, 2, stride=2) + Sigmoid ----------------------
    s = _dot(y, u2_ref[...])                                  # (TBH, 2*W)
    o = m(6) * s[:, :W] + m(7) * _roll(s[:, W:], 1, 0)
    o_ref[...] = jax.nn.sigmoid(o + c2_ref[...])


# ----------------------------------------------------------------------------
# Host-side operand preparation: fold column shifts / zero padding / pooled
# column selection / deconv pixel shuffle into small matmul weights, and
# precompute the per-row boundary / combine masks (no iota inside the kernel).
# ----------------------------------------------------------------------------
def _prep_operands(params, H, W, TBH):
    f32 = jnp.float32
    W1 = jnp.asarray(params["enc_w1"], f32)   # (16, 1, 3, 3)
    b1 = jnp.asarray(params["enc_b1"], f32)   # (16,)
    W2p = jnp.asarray(params["enc_w2"], f32)  # (4, 16, 3, 3)
    b2 = jnp.asarray(params["enc_b2"], f32)   # (4,)
    D1 = jnp.asarray(params["dec_w1"], f32)   # (4, 16, 2, 2)
    c1 = jnp.asarray(params["dec_b1"], f32)   # (16,)
    D2 = jnp.asarray(params["dec_w2"], f32)   # (16, 1, 2, 2)
    c2 = jnp.asarray(params["dec_b2"], f32)   # (1,)

    C1, C2, C3 = W1.shape[0], W2p.shape[0], D1.shape[1]       # 16, 4, 16
    Wh = W // 2

    wi = np.arange(W)
    wh = np.arange(Wh)

    # conv1: V1s[kh*W + wj, w*C1 + co] = sum_kw [wj == w+kw-1] * W1[co,0,kh,kw]
    v1 = []
    for kh in range(3):
        acc = jnp.zeros((W, W, C1), f32)
        for kw in range(3):
            sel = jnp.asarray((wi[:, None] == wi[None, :] + (kw - 1))
                              .astype(np.float32))
            acc = acc + sel[:, :, None] * W1[:, 0, kh, kw][None, None, :]
        v1.append(acc.reshape(W, W * C1))
    V1s = jnp.concatenate(v1, axis=0)                          # (3W, W*C1)

    # conv2 (reads un-compacted pooled slab -> only even column groups):
    # V2s[kh*W*C1 + wj*C1 + ci, w2*C2 + co] =
    #     sum_kw [wj == 2*(w2+kw-1)] * W2[co, ci, kh, kw]
    v2 = []
    for kh in range(3):
        acc = jnp.zeros((W, C1, Wh, C2), f32)
        for kw in range(3):
            sel = jnp.asarray((wi[:, None] == 2 * (wh[None, :] + (kw - 1)))
                              .astype(np.float32))
            acc = acc + sel[:, None, :, None] * W2p[:, :, kh, kw].T[None, :, None, :]
        v2.append(acc.reshape(W * C1, Wh * C2))
    V2s = jnp.concatenate(v2, axis=0)                          # (3*W*C1, Wh*C2)

    # deconv1 (both dh taps stacked along N):
    # U1[dh][q2*C2 + ci, (q2+dw)*C3 + co] = [q2 even] * D1[ci, co, dh, dw]
    u1 = []
    for dh in range(2):
        acc = jnp.zeros((Wh, C2, Wh, C3), f32)
        for dw in range(2):
            sel = jnp.asarray(((wh[:, None] % 2 == 0) &
                               (wh[None, :] == wh[:, None] + dw))
                              .astype(np.float32))
            acc = acc + sel[:, None, :, None] * D1[:, :, dh, dw][None, :, None, :]
        u1.append(acc.reshape(Wh * C2, Wh * C3))
    U1cat = jnp.concatenate(u1, axis=1)                        # (Wh*C2, 2*Wh*C3)

    # deconv2: U2[dh][w'*C3 + ci, 2w'+dw] = D2[ci, 0, dh, dw]
    u2 = []
    for dh in range(2):
        acc = jnp.zeros((Wh, C3, W), f32)
        for dw in range(2):
            sel = jnp.asarray((wi[None, :] == 2 * wh[:, None] + dw)
                              .astype(np.float32))
            acc = acc + sel[:, None, :] * D2[:, 0, dh, dw][None, :, None]
        u2.append(acc.reshape(Wh * C3, W))
    U2cat = jnp.concatenate(u2, axis=1)                        # (Wh*C3, 2*W)

    b1row = jnp.tile(b1, W)[None, :]                           # (1, W*C1)
    b2row = jnp.tile(b2, Wh)[None, :]                          # (1, Wh*C2)
    c1row = jnp.tile(c1, Wh)[None, :]                          # (1, Wh*C3)
    c2s = c2.reshape(1, 1)                                     # (1, 1)

    # Per-row masks (constants, depend only on H / TBH):
    r = np.arange(TBH)
    lr = r % H
    masks = np.stack([
        (lr != 0),          # 0: conv1 kh=0 tap valid (zero-pad image top)
        (lr != H - 1),      # 1: conv1 kh=2 tap valid (zero-pad image bottom)
        (lr >= 2),          # 2: conv2 kh=0 tap valid
        (lr <= H - 3),      # 3: conv2 kh=2 tap valid
        (r % 4 == 0),       # 4: deconv1 dh=0 output rows
        (r % 4 == 2),       # 5: deconv1 dh=1 output rows
        (r % 2 == 0),       # 6: deconv2 dh=0 output rows
        (r % 2 == 1),       # 7: deconv2 dh=1 output rows
    ], axis=1).astype(np.float32)
    masks = jnp.asarray(masks)                                 # (TBH, 8)

    return V1s, b1row, V2s, b2row, U1cat, c1row, U2cat, c2s, masks


# ----------------------------------------------------------------------------
# Full forward pass (PyTorch Network.forward semantics), NCHW in / NCHW out.
# ----------------------------------------------------------------------------
@partial(jax.jit, static_argnames=("tb",))
def autoencoder_forward(x_nchw, params, tb=8):
    N, C, H, W = x_nchw.shape
    assert C == 1, "first conv expects a single input channel"
    assert H % 4 == 0 and W % 4 == 0, "two 2x2 max-pools need H, W divisible by 4"
    TBH = tb * H

    (V1s, b1row, V2s, b2row, U1cat, c1row, U2cat, c2s,
     masks) = _prep_operands(params, H, W, TBH)

    # Stack images along the row axis: (N, 1, H, W) -> (N*H, W)  (free reshape).
    x = x_nchw.astype(jnp.float32).reshape(N * H, W)
    n_pad = (-N) % tb
    if n_pad:
        x = jnp.concatenate([x, jnp.zeros((n_pad * H, W), jnp.float32)], axis=0)
    n_tot = N + n_pad
    grid = (n_tot // tb,)

    full = lambda arr: pl.BlockSpec(arr.shape, lambda b: (0,) * arr.ndim)

    out = pl.pallas_call(
        _autoencoder_kernel,
        out_shape=jax.ShapeDtypeStruct((n_tot * H, W), jnp.float32),
        grid=grid,
        in_specs=[
            pl.BlockSpec((TBH, W), lambda b: (b, 0)),   # TB images per step
            full(V1s), full(b1row), full(V2s), full(b2row),
            full(U1cat), full(c1row), full(U2cat), full(c2s), full(masks),
        ],
        out_specs=pl.BlockSpec((TBH, W), lambda b: (b, 0)),
        compiler_params=pltpu.CompilerParams(
            dimension_semantics=("parallel",),
            vmem_limit_bytes=32 * 1024 * 1024,
        ),
    )(x, V1s, b1row, V2s, b2row, U1cat, c1row, U2cat, c2s, masks)

    return out[: N * H].reshape(N, 1, H, W)


# ----------------------------------------------------------------------------
# Parameter init (PyTorch-like uniform) and a NumPy f64 reference.
# ----------------------------------------------------------------------------
def init_params(key):
    ks = jax.random.split(key, 8)

    def u(k, shape, fan_in):
        bound = 1.0 / np.sqrt(fan_in)
        return jax.random.uniform(k, shape, jnp.float32, -bound, bound)

    return {
        "enc_w1": u(ks[0], (16, 1, 3, 3), 1 * 9),
        "enc_b1": u(ks[1], (16,), 1 * 9),
        "enc_w2": u(ks[2], (4, 16, 3, 3), 16 * 9),
        "enc_b2": u(ks[3], (4,), 16 * 9),
        "dec_w1": u(ks[4], (4, 16, 2, 2), 4 * 4),
        "dec_b1": u(ks[5], (16,), 4 * 4),
        "dec_w2": u(ks[6], (16, 1, 2, 2), 16 * 4),
        "dec_b2": u(ks[7], (1,), 16 * 4),
    }


def _reference_forward(x, params):
    """Pure NumPy (float64) re-implementation of the PyTorch module."""
    x = np.asarray(x, np.float64)

    def conv3x3(a, w, b):
        n, ci, h, ww = a.shape
        w = np.asarray(w, np.float64)
        co = w.shape[0]
        ap = np.zeros((n, ci, h + 2, ww + 2), np.float64)
        ap[:, :, 1:-1, 1:-1] = a
        out = np.zeros((n, co, h, ww), np.float64)
        for kh in range(3):
            for kw in range(3):
                out += np.einsum("nchw,oc->nohw",
                                 ap[:, :, kh:kh + h, kw:kw + ww], w[:, :, kh, kw])
        return out + np.asarray(b, np.float64).reshape(1, co, 1, 1)

    def maxpool2(a):
        n, c, h, ww = a.shape
        return a.reshape(n, c, h // 2, 2, ww // 2, 2).max(axis=(3, 5))

    def deconv2(a, w, b):
        n, ci, h, ww = a.shape
        w = np.asarray(w, np.float64)
        co = w.shape[1]
        out = np.zeros((n, co, 2 * h, 2 * ww), np.float64)
        for dh in range(2):
            for dw in range(2):
                out[:, :, dh::2, dw::2] = np.einsum("nchw,co->nohw", a, w[:, :, dh, dw])
        return out + np.asarray(b, np.float64).reshape(1, co, 1, 1)

    relu = lambda v: np.maximum(v, 0.0)
    sigmoid = lambda v: 1.0 / (1.0 + np.exp(-v))

    h = maxpool2(relu(conv3x3(x, params["enc_w1"], params["enc_b1"])))
    h = maxpool2(relu(conv3x3(h, params["enc_w2"], params["enc_b2"])))
    h = relu(deconv2(h, params["dec_w1"], params["dec_b1"]))
    return sigmoid(deconv2(h, params["dec_w2"], params["dec_b2"]))


if __name__ == "__main__":
    key = jax.random.PRNGKey(0)
    k_params, k_x, k_x2 = jax.random.split(key, 3)

    params = init_params(k_params)

    # Batch of 16 -> 2 grid steps of 8 row-stacked images each.
    x = jax.random.uniform(k_x, (16, 1, 16, 16), jnp.float32)
    out = jax.block_until_ready(autoencoder_forward(x, params))
    assert out.shape == (16, 1, 16, 16), out.shape
    assert out.dtype == jnp.float32
    assert bool(jnp.all(out > 0.0)) and bool(jnp.all(out < 1.0))  # sigmoid range
    ref = _reference_forward(np.asarray(x), params)
    np.testing.assert_allclose(np.asarray(out), ref, atol=5e-3, rtol=5e-3)

    # Non-multiple-of-TB batch exercises the padding path.
    x2 = jax.random.uniform(k_x2, (3, 1, 16, 16), jnp.float32)
    out2 = jax.block_until_ready(autoencoder_forward(x2, params))
    ref2 = _reference_forward(np.asarray(x2), params)
    np.testing.assert_allclose(np.asarray(out2), ref2, atol=5e-3, rtol=5e-3)

    print("KERNEL_OK")
</pallas_src>

<mosaic_0001>
module attributes {stable_mosaic.version = 11 : i64} {
  func.func @_autoencoder_kernel(%arg0: i32, %arg1: memref<128x16xf32, #tpu.memory_space<vmem>>, %arg2: memref<48x256xf32, #tpu.memory_space<vmem>>, %arg3: memref<1x256xf32, #tpu.memory_space<vmem>>, %arg4: memref<768x32xf32, #tpu.memory_space<vmem>>, %arg5: memref<1x32xf32, #tpu.memory_space<vmem>>, %arg6: memref<32x256xf32, #tpu.memory_space<vmem>>, %arg7: memref<1x128xf32, #tpu.memory_space<vmem>>, %arg8: memref<128x32xf32, #tpu.memory_space<vmem>>, %arg9: memref<1x1xf32, #tpu.memory_space<vmem>>, %arg10: memref<128x8xf32, #tpu.memory_space<vmem>>, %arg11: memref<128x16xf32, #tpu.memory_space<vmem>>) attributes {dimension_semantics = [#tpu.dimension_semantics<parallel>], iteration_bounds = array<i64: 2>, scalar_prefetch = 0 : i64, scratch_operands = 0 : i64, tpu.core_type = #tpu.core_type<tc>, window_params = [{transform_indices = @transform_0, window_bounds = array<i64: 128, 16>}, {pipeline_mode = #tpu.pipeline_mode<synchronous>, transform_indices = @transform_1, window_bounds = array<i64: 48, 256>}, {pipeline_mode = #tpu.pipeline_mode<synchronous>, transform_indices = @transform_2, window_bounds = array<i64: 1, 256>}, {pipeline_mode = #tpu.pipeline_mode<synchronous>, transform_indices = @transform_3, window_bounds = array<i64: 768, 32>}, {pipeline_mode = #tpu.pipeline_mode<synchronous>, transform_indices = @transform_4, window_bounds = array<i64: 1, 32>}, {pipeline_mode = #tpu.pipeline_mode<synchronous>, transform_indices = @transform_5, window_bounds = array<i64: 32, 256>}, {pipeline_mode = #tpu.pipeline_mode<synchronous>, transform_indices = @transform_6, window_bounds = array<i64: 1, 128>}, {pipeline_mode = #tpu.pipeline_mode<synchronous>, transform_indices = @transform_7, window_bounds = array<i64: 128, 32>}, {pipeline_mode = #tpu.pipeline_mode<synchronous>, transform_indices = @transform_8, window_bounds = array<i64: 1, 1>}, {pipeline_mode = #tpu.pipeline_mode<synchronous>, transform_indices = @transform_9, window_bounds = array<i64: 128, 8>}, {transform_indices = @transform_10, window_bounds = array<i64: 128, 16>}]} {
    %c0 = arith.constant 0 : index
    %c0_0 = arith.constant 0 : index
    %0 = vector.load %arg1[%c0, %c0_0] : memref<128x16xf32, #tpu.memory_space<vmem>>, vector<128x16xf32>
    %c0_1 = arith.constant 0 : index
    %c0_2 = arith.constant 0 : index
    %1 = vector.load %arg10[%c0_1, %c0_2] : memref<128x8xf32, #tpu.memory_space<vmem>>, vector<128x1xf32>
    %c1_i32 = arith.constant 1 : i32
    %2 = tpu.dynamic_rotate %0 by %c1_i32 dim 0 : vector<128x16xf32>, i32 -> vector<128x16xf32>
    %3 = vector.broadcast %1 : vector<128x1xf32> to vector<128x16xf32>
    %4 = arith.mulf %3, %2 : vector<128x16xf32>
    %c0_3 = arith.constant 0 : index
    %c1 = arith.constant 1 : index
    %5 = vector.load %arg10[%c0_3, %c1] : memref<128x8xf32, #tpu.memory_space<vmem>>, vector<128x1xf32>
    %c127_i32 = arith.constant 127 : i32
    %6 = tpu.dynamic_rotate %0 by %c127_i32 dim 0 : vector<128x16xf32>, i32 -> vector<128x16xf32>
    %7 = vector.broadcast %5 : vector<128x1xf32> to vector<128x16xf32>
    %8 = arith.mulf %7, %6 : vector<128x16xf32>
    %9 = tpu.concatenate %4, %0, %8 in 1 : vector<128x16xf32>, vector<128x16xf32>, vector<128x16xf32> -> vector<128x48xf32>
    %c0_4 = arith.constant 0 : index
    %c0_5 = arith.constant 0 : index
    %10 = vector.load %arg2[%c0_4, %c0_5] : memref<48x256xf32, #tpu.memory_space<vmem>>, vector<48x256xf32>
    %cst = arith.constant dense<0.000000e+00> : vector<128x256xf32>
    %11 = tpu.matmul %9, %10, %cst {dimension_numbers = #tpu.dot_dimension_numbers<[1], [0], [0], [1], [0, 0, 1, 1], [], []>} : vector<128x48xf32>, vector<48x256xf32>, vector<128x256xf32> -> vector<128x256xf32>
    %c0_6 = arith.constant 0 : index
    %c0_7 = arith.constant 0 : index
    %12 = vector.load %arg3[%c0_6, %c0_7] : memref<1x256xf32, #tpu.memory_space<vmem>>, vector<1x256xf32>
    %13 = vector.broadcast %12 : vector<1x256xf32> to vector<128x256xf32>
    %14 = arith.addf %11, %13 : vector<128x256xf32>
    %cst_8 = arith.constant 0.000000e+00 : f32
    %15 = vector.broadcast %cst_8 : f32 to vector<128x256xf32>
    %16 = arith.maximumf %14, %15 : vector<128x256xf32>
    %c127_i32_9 = arith.constant 127 : i32
    %17 = tpu.dynamic_rotate %16 by %c127_i32_9 dim 0 : vector<128x256xf32>, i32 -> vector<128x256xf32>
    %18 = arith.maximumf %16, %17 : vector<128x256xf32>
    %c240_i32 = arith.constant 240 : i32
    %19 = tpu.dynamic_rotate %18 by %c240_i32 dim 1 : vector<128x256xf32>, i32 -> vector<128x256xf32>
    %20 = arith.maximumf %18, %19 : vector<128x256xf32>
    %c0_10 = arith.constant 0 : index
    %c2 = arith.constant 2 : index
    %21 = vector.load %arg10[%c0_10, %c2] : memref<128x8xf32, #tpu.memory_space<vmem>>, vector<128x1xf32>
    %c2_i32 = arith.constant 2 : i32
    %22 = tpu.dynamic_rotate %20 by %c2_i32 dim 0 : vector<128x256xf32>, i32 -> vector<128x256xf32>
    %23 = vector.broadcast %21 : vector<128x1xf32> to vector<128x256xf32>
    %24 = arith.mulf %23, %22 : vector<128x256xf32>
    %c0_11 = arith.constant 0 : index
    %c3 = arith.constant 3 : index
    %25 = vector.load %arg10[%c0_11, %c3] : memref<128x8xf32, #tpu.memory_space<vmem>>, vector<128x1xf32>
    %c126_i32 = arith.constant 126 : i32
    %26 = tpu.dynamic_rotate %20 by %c126_i32 dim 0 : vector<128x256xf32>, i32 -> vector<128x256xf32>
    %27 = vector.broadcast %25 : vector<128x1xf32> to vector<128x256xf32>
    %28 = arith.mulf %27, %26 : vector<128x256xf32>
    %29 = tpu.concatenate %24, %20, %28 in 1 : vector<128x256xf32>, vector<128x256xf32>, vector<128x256xf32> -> vector<128x768xf32>
    %c0_12 = arith.constant 0 : index
    %c0_13 = arith.constant 0 : index
    %30 = vector.load %arg4[%c0_12, %c0_13] : memref<768x32xf32, #tpu.memory_space<vmem>>, vector<768x32xf32>
    %cst_14 = arith.constant dense<0.000000e+00> : vector<128x32xf32>
    %31 = tpu.matmul %29, %30, %cst_14 {dimension_numbers = #tpu.dot_dimension_numbers<[1], [0], [0], [1], [0, 0, 1, 1], [], []>} : vector<128x768xf32>, vector<768x32xf32>, vector<128x32xf32> -> vector<128x32xf32>
    %c0_15 = arith.constant 0 : index
    %c0_16 = arith.constant 0 : index
    %32 = vector.load %arg5[%c0_15, %c0_16] : memref<1x32xf32, #tpu.memory_space<vmem>>, vector<1x32xf32>
    %33 = vector.broadcast %32 : vector<1x32xf32> to vector<128x32xf32>
    %34 = arith.addf %31, %33 : vector<128x32xf32>
    %cst_17 = arith.constant 0.000000e+00 : f32
    %35 = vector.broadcast %cst_17 : f32 to vector<128x32xf32>
    %36 = arith.maximumf %34, %35 : vector<128x32xf32>
    %c126_i32_18 = arith.constant 126 : i32
    %37 = tpu.dynamic_rotate %36 by %c126_i32_18 dim 0 : vector<128x32xf32>, i32 -> vector<128x32xf32>
    %38 = arith.maximumf %36, %37 : vector<128x32xf32>
    %c28_i32 = arith.constant 28 : i32
    %39 = tpu.dynamic_rotate %38 by %c28_i32 dim 1 : vector<128x32xf32>, i32 -> vector<128x32xf32>
    %40 = arith.maximumf %38, %39 : vector<128x32xf32>
    %c0_19 = arith.constant 0 : index
    %c0_20 = arith.constant 0 : index
    %41 = vector.load %arg6[%c0_19, %c0_20] : memref<32x256xf32, #tpu.memory_space<vmem>>, vector<32x256xf32>
    %cst_21 = arith.constant dense<0.000000e+00> : vector<128x256xf32>
    %42 = tpu.matmul %40, %41, %cst_21 {dimension_numbers = #tpu.dot_dimension_numbers<[1], [0], [0], [1], [0, 0, 1, 1], [], []>} : vector<128x32xf32>, vector<32x256xf32>, vector<128x256xf32> -> vector<128x256xf32>
    %c0_22 = arith.constant 0 : index
    %c4 = arith.constant 4 : index
    %43 = vector.load %arg10[%c0_22, %c4] : memref<128x8xf32, #tpu.memory_space<vmem>>, vector<128x1xf32>
    %44 = vector.extract_strided_slice %42 {offsets = [0, 0], sizes = [128, 128], strides = [1, 1]} : vector<128x256xf32> to vector<128x128xf32>
    %45 = vector.broadcast %43 : vector<128x1xf32> to vector<128x128xf32>
    %46 = arith.mulf %45, %44 : vector<128x128xf32>
    %c0_23 = arith.constant 0 : index
    %c5 = arith.constant 5 : index
    %47 = vector.load %arg10[%c0_23, %c5] : memref<128x8xf32, #tpu.memory_space<vmem>>, vector<128x1xf32>
    %48 = vector.extract_strided_slice %42 {offsets = [0, 128], sizes = [128, 128], strides = [1, 1]} : vector<128x256xf32> to vector<128x128xf32>
    %c2_i32_24 = arith.constant 2 : i32
    %49 = tpu.dynamic_rotate %48 by %c2_i32_24 dim 0 : vector<128x128xf32>, i32 -> vector<128x128xf32>
    %50 = vector.broadcast %47 : vector<128x1xf32> to vector<128x128xf32>
    %51 = arith.mulf %50, %49 : vector<128x128xf32>
    %52 = arith.addf %46, %51 : vector<128x128xf32>
    %c0_25 = arith.constant 0 : index
    %c0_26 = arith.constant 0 : index
    %53 = vector.load %arg7[%c0_25, %c0_26] : memref<1x128xf32, #tpu.memory_space<vmem>>, vector<1x128xf32>
    %54 = vector.broadcast %53 : vector<1x128xf32> to vector<128x128xf32>
    %55 = arith.addf %52, %54 : vector<128x128xf32>
    %cst_27 = arith.constant 0.000000e+00 : f32
    %56 = vector.broadcast %cst_27 : f32 to vector<128x128xf32>
    %57 = arith.maximumf %55, %56 : vector<128x128xf32>
    %c0_28 = arith.constant 0 : index
    %c0_29 = arith.constant 0 : index
    %58 = vector.load %arg8[%c0_28, %c0_29] : memref<128x32xf32, #tpu.memory_space<vmem>>, vector<128x32xf32>
    %cst_30 = arith.constant dense<0.000000e+00> : vector<128x32xf32>
    %59 = tpu.matmul %57, %58, %cst_30 {dimension_numbers = #tpu.dot_dimension_numbers<[1], [0], [0], [1], [0, 0, 1, 1], [], []>} : vector<128x128xf32>, vector<128x32xf32>, vector<128x32xf32> -> vector<128x32xf32>
    %c0_31 = arith.constant 0 : index
    %c6 = arith.constant 6 : index
    %60 = vector.load %arg10[%c0_31, %c6] : memref<128x8xf32, #tpu.memory_space<vmem>>, vector<128x1xf32>
    %61 = vector.extract_strided_slice %59 {offsets = [0, 0], sizes = [128, 16], strides = [1, 1]} : vector<128x32xf32> to vector<128x16xf32>
    %62 = vector.broadcast %60 : vector<128x1xf32> to vector<128x16xf32>
    %63 = arith.mulf %62, %61 : vector<128x16xf32>
    %c0_32 = arith.constant 0 : index
    %c7 = arith.constant 7 : index
    %64 = vector.load %arg10[%c0_32, %c7] : memref<128x8xf32, #tpu.memory_space<vmem>>, vector<128x1xf32>
    %65 = vector.extract_strided_slice %59 {offsets = [0, 16], sizes = [128, 16], strides = [1, 1]} : vector<128x32xf32> to vector<128x16xf32>
    %c1_i32_33 = arith.constant 1 : i32
    %66 = tpu.dynamic_rotate %65 by %c1_i32_33 dim 0 : vector<128x16xf32>, i32 -> vector<128x16xf32>
    %67 = vector.broadcast %64 : vector<128x1xf32> to vector<128x16xf32>
    %68 = arith.mulf %67, %66 : vector<128x16xf32>
    %69 = arith.addf %63, %68 : vector<128x16xf32>
    %c0_34 = arith.constant 0 : index
    %c0_35 = arith.constant 0 : index
    %70 = vector.load %arg9[%c0_34, %c0_35] : memref<1x1xf32, #tpu.memory_space<vmem>>, vector<1x1xf32>
    %71 = vector.broadcast %70 : vector<1x1xf32> to vector<128x16xf32>
    %72 = arith.addf %69, %71 : vector<128x16xf32>
    %73 = arith.negf %72 : vector<128x16xf32>
    %74 = math.exp %73 : vector<128x16xf32>
    %cst_36 = arith.constant 1.000000e+00 : f32
    %75 = vector.broadcast %cst_36 : f32 to vector<128x16xf32>
    %76 = arith.addf %75, %74 : vector<128x16xf32>
    %77 = arith.divf %75, %76 : vector<128x16xf32>
    %c0_37 = arith.constant 0 : index
    %c0_38 = arith.constant 0 : index
    %78 = vector.load %arg11[%c0_37, %c0_38] : memref<128x16xf32, #tpu.memory_space<vmem>>, vector<128x16xf32>
    tpu.vector_store %arg11[%c0_37, %c0_38], %77 {strides = array<i32>} : memref<128x16xf32, #tpu.memory_space<vmem>>, vector<128x16xf32>,
    return
  }
  func.func @transform_0(%arg0: i32) -> (i32, i32) {
    %c0_i32 = arith.constant 0 : i32
    %c0_i32_0 = arith.constant 0 : i32
    return %arg0, %c0_i32 : i32, i32
  }
  func.func @transform_1(%arg0: i32) -> (i32, i32) {
    %c0_i32 = arith.constant 0 : i32
    %c0_i32_0 = arith.constant 0 : i32
    %c0_i32_1 = arith.constant 0 : i32
    return %c0_i32, %c0_i32_0 : i32, i32
  }
  func.func @transform_2(%arg0: i32) -> (i32, i32) {
    %c0_i32 = arith.constant 0 : i32
    %c0_i32_0 = arith.constant 0 : i32
    %c0_i32_1 = arith.constant 0 : i32
    return %c0_i32, %c0_i32_0 : i32, i32
  }
  func.func @transform_3(%arg0: i32) -> (i32, i32) {
    %c0_i32 = arith.constant 0 : i32
    %c0_i32_0 = arith.constant 0 : i32
    %c0_i32_1 = arith.constant 0 : i32
    return %c0_i32, %c0_i32_0 : i32, i32
  }
  func.func @transform_4(%arg0: i32) -> (i32, i32) {
    %c0_i32 = arith.constant 0 : i32
    %c0_i32_0 = arith.constant 0 : i32
    %c0_i32_1 = arith.constant 0 : i32
    return %c0_i32, %c0_i32_0 : i32, i32
  }
  func.func @transform_5(%arg0: i32) -> (i32, i32) {
    %c0_i32 = arith.constant 0 : i32
    %c0_i32_0 = arith.constant 0 : i32
    %c0_i32_1 = arith.constant 0 : i32
    return %c0_i32, %c0_i32_0 : i32, i32
  }
  func.func @transform_6(%arg0: i32) -> (i32, i32) {
    %c0_i32 = arith.constant 0 : i32
    %c0_i32_0 = arith.constant 0 : i32
    %c0_i32_1 = arith.constant 0 : i32
    return %c0_i32, %c0_i32_0 : i32, i32
  }
  func.func @transform_7(%arg0: i32) -> (i32, i32) {
    %c0_i32 = arith.constant 0 : i32
    %c0_i32_0 = arith.constant 0 : i32
    %c0_i32_1 = arith.constant 0 : i32
    return %c0_i32, %c0_i32_0 : i32, i32
  }
  func.func @transform_8(%arg0: i32) -> (i32, i32) {
    %c0_i32 = arith.constant 0 : i32
    %c0_i32_0 = arith.constant 0 : i32
    %c0_i32_1 = arith.constant 0 : i32
    return %c0_i32, %c0_i32_0 : i32, i32
  }
  func.func @transform_9(%arg0: i32) -> (i32, i32) {
    %c0_i32 = arith.constant 0 : i32
    %c0_i32_0 = arith.constant 0 : i32
    %c0_i32_1 = arith.constant 0 : i32
    return %c0_i32, %c0_i32_0 : i32, i32
  }
  func.func @transform_10(%arg0: i32) -> (i32, i32) {
    %c0_i32 = arith.constant 0 : i32
    %c0_i32_0 = arith.constant 0 : i32
    return %arg0, %c0_i32 : i32, i32
  }
}

</mosaic_0001>

<bundles_post_ra>
// kernel: tile.19
= control target key start
LH: loop header
LB: loop body
LE: loop exit
PB: predicated region body
PF: predicated region fallthrough
CT: control target
= control target key end

     0   :  { %s7_s6 = smov 3  ;;  %s21_s9 = smov 3  ;;  %vm4_vm0 = vcmask 130048   ;;  %vm11_vm1 = vcmask 1048448   ;;  %vm18_vm2 = vcmask 917248   ;;  %vm25_vm3 = vcmask 786048   ;;  %s131_s0 = inlined_call_operand.vmem [shape: f32[16,16], index: 0, kind: input, shape index: {}]   ;;  %s132_s1 = inlined_call_operand.vmem [shape: f32[1,256], index: 1, kind: output, shape index: {}]  }
   0x1   :  { %v69_v0 = vld [vmem:[%s131_s0 + $0x7] ss:$8 sm:%s7_s6]   ;;  %s84_s10 = smov 112   ;;  %v71_v1 = vld [vmem:[%s131_s0 + $0x5] ss:$8 sm:%s21_s9]   ;;  %s14_s13 = smov 3 }
   0x2   :  { %9 = vrot.lane.b32.xlu0 %v69_v0, %s84_s10  ;;  %s85_s14 = smov 80   ;;  %v70_v2 = vld [vmem:[%s131_s0 + $0x6] ss:$8 sm:%s14_s13]   ;;  %s28_s17 = smov 3  ;;  %vm32_vm4 = vcmask 654848   ;;  %vm39_vm5 = vcmask 523648  }
   0x3   :  { %23 = vrot.lane.b32.xlu1 %v71_v1, %s85_s14  ;;  %v72_v3 = vld [vmem:[%s131_s0 + $0x4] ss:$8 sm:%s28_s17]   ;;  %s35_s20 = smov 3  ;;  %s42_s21 = smov 3  ;;  %vm46_vm6 = vcmask 392448   ;;  %vm53_vm7 = vcmask 261248  }
   0x4   :  { %s86_s22 = smov 96   ;;  %s87_s23 = smov 64   ;;  %v73_v4 = vld [vmem:[%s131_s0 + $0x3] ss:$8 sm:%s35_s20]   ;;  %v74_v5 = vld [vmem:[%s131_s0 + $0x2] ss:$8 sm:%s42_s21]  }
   0x5   :  { %s2_s26 = smov 3  ;;  %s49_s29 = smov 3 }
   0x6   :  { %16 = vrot.lane.b32.xlu0 %v70_v2, %s86_s22  ;;  %v3_v6 = vld [vmem:[%s131_s0] ss:$8 sm:%s2_s26]   ;;  %s88_s3 = smov 48   ;;  %s89_s4 = smov 32  }
   0x7   :  { %30 = vrot.lane.b32.xlu1 %v72_v3, %s87_s23  ;;  %5 = vst.msk [vmem:[#allocation0] ss:$8 sm:$0x3] %vm4_vm0, %v3_v6   ;;  %v75_v7 = vld [vmem:[%s131_s0 + $0x1] ss:$8 sm:%s49_s29]   ;;  %s90_s0 = smov 16  }
   0xa   :  { %37 = vrot.lane.b32.xlu0 %v73_v4, %s88_s3 }
   0xb   :  { %44 = vrot.lane.b32.xlu1 %v74_v5, %s89_s4 }
   0xe   :  { %51 = vrot.lane.b32.xlu0 %v75_v7, %s90_s0 }
  0x74   :  { %v10_v8 = vpop.permute.xlu0 %9  }
  0x75   :  { %12 = vst.msk [vmem:[#allocation0] ss:$8 sm:$0x3] %vm11_vm1, %v10_v8   ;;  %v24_v9 = vpop.permute.xlu1 %23  }
  0x78   :  { %v17_v10 = vpop.permute.xlu0 %16  }
  0x79   :  { %19 = vst.msk [vmem:[#allocation0] ss:$8 sm:$0x3] %vm18_vm2, %v17_v10   ;;  %v31_v11 = vpop.permute.xlu1 %30  }
  0x7a   :  { %26 = vst.msk [vmem:[#allocation0] ss:$8 sm:$0x3] %vm25_vm3, %v24_v9  }
  0x7b   :  { %33 = vst.msk [vmem:[#allocation0] ss:$8 sm:$0x3] %vm32_vm4, %v31_v11  }
  0x7c   :  { %v38_v12 = vpop.permute.xlu0 %37  }
  0x7d   :  { %40 = vst.msk [vmem:[#allocation0] ss:$8 sm:$0x3] %vm39_vm5, %v38_v12   ;;  %v45_v13 = vpop.permute.xlu1 %44  }
  0x7e   :  { %47 = vst.msk [vmem:[#allocation0] ss:$8 sm:$0x3] %vm46_vm6, %v45_v13  }
  0x80   :  { %v52_v14 = vpop.permute.xlu0 %51  }
  0x81   :  { %54 = vst.msk [vmem:[#allocation0] ss:$8 sm:$0x3] %vm53_vm7, %v52_v14  }
  0x88   :  { %v59_v15 = vld [vmem:[#allocation0] sm:$0x1]  ;;  %v64_v16 = vld [vmem:[#allocation0 + $0x8] sm:$0x1] }
  0x89   :  { %62 = vst [vmem:[%s132_s1] sm:$0x1] %v59_v15  ;;  %76 = vst [vmem:[%s132_s1 + $0x1] sm:$0x1] %v64_v16 }

// kernel: tile.23
= control target key start
LH: loop header
LB: loop body
LE: loop exit
PB: predicated region body
PF: predicated region fallthrough
CT: control target
= control target key end

     0   :  { %s22_s0 = inlined_call_operand.vmem [shape: f32[4], index: 0, kind: input, shape index: {}]   ;;  %s23_s1 = inlined_call_operand.vmem [shape: f32[8,4], index: 1, kind: output, shape index: {}]  }
   0x1   :  { %v4_v0 = vld [vmem:[%s22_s0] ss:$0 sm:$0xff] }
   0x2   :  { %5 = vst [vmem:[%s23_s1] sm:$0xff] %v4_v0 }

// kernel: tile.29
= control target key start
LH: loop header
LB: loop body
LE: loop exit
PB: predicated region body
PF: predicated region fallthrough
CT: control target
= control target key end

     0   :  { %s69_s10 = smov 112   ;;  %s70_s11 = smov 80   ;;  %vm3_vm0 = vcmask 130048   ;;  %vm9_vm1 = vcmask 1048448   ;;  %vm15_vm2 = vcmask 917248   ;;  %vm21_vm3 = vcmask 786048   ;;  %s113_s0 = inlined_call_operand.vmem [shape: f32[8,16], index: 0, kind: input, shape index: {}]   ;;  %s114_s1 = inlined_call_operand.vmem [shape: f32[1,128], index: 1, kind: output, shape index: {}]  }
   0x1   :  { %v55_v0 = vld [vmem:[%s113_s0 + $0x7] sm:$0x1]   ;;  %v57_v1 = vld [vmem:[%s113_s0 + $0x5] sm:$0x1]   ;;  %v56_v2 = vld [vmem:[%s113_s0 + $0x6] sm:$0x1]  }
   0x2   :  { %7 = vrot.lane.b32.xlu0 %v55_v0, %s69_s10  ;;  %19 = vrot.lane.b32.xlu1 %v57_v1, %s70_s11  ;;  %v58_v3 = vld [vmem:[%s113_s0 + $0x4] sm:$0x1]   ;;  %v2_v4 = vld [vmem:[%s113_s0] sm:$0x1]   ;;  %s71_s18 = smov 96   ;;  %s72_s19 = smov 64  }
   0x3   :  { %4 = vst.msk [vmem:[#allocation0] sm:$0x1] %vm3_vm0, %v2_v4   ;;  %v59_v5 = vld [vmem:[%s113_s0 + $0x3] sm:$0x1]   ;;  %v60_v6 = vld [vmem:[%s113_s0 + $0x2] sm:$0x1]  }
   0x4   :  { %s73_s24 = smov 48   ;;  %s74_s25 = smov 32   ;;  %v61_v7 = vld [vmem:[%s113_s0 + $0x1] sm:$0x1]   ;;  %vm27_vm4 = vcmask 654848   ;;  %vm33_vm5 = vcmask 523648  }
   0x5   :  { %s75_s0 = smov 16   ;;  %vm39_vm6 = vcmask 392448   ;;  %vm45_vm7 = vcmask 261248  }
   0x6   :  { %13 = vrot.lane.b32.xlu0 %v56_v2, %s71_s18  ;;  %25 = vrot.lane.b32.xlu1 %v58_v3, %s72_s19 }
   0xa   :  { %31 = vrot.lane.b32.xlu0 %v59_v5, %s73_s24  ;;  %37 = vrot.lane.b32.xlu1 %v60_v6, %s74_s25 }
   0xe   :  { %43 = vrot.lane.b32.xlu0 %v61_v7, %s75_s0 }
  0x74   :  { %v8_v8 = vpop.permute.xlu0 %7   ;;  %v20_v9 = vpop.permute.xlu1 %19  }
  0x75   :  { %10 = vst.msk [vmem:[#allocation0] sm:$0x1] %vm9_vm1, %v8_v8  }
  0x78   :  { %v14_v10 = vpop.permute.xlu0 %13   ;;  %v26_v11 = vpop.permute.xlu1 %25  }
  0x79   :  { %16 = vst.msk [vmem:[#allocation0] sm:$0x1] %vm15_vm2, %v14_v10  }
  0x7a   :  { %22 = vst.msk [vmem:[#allocation0] sm:$0x1] %vm21_vm3, %v20_v9  }
  0x7b   :  { %28 = vst.msk [vmem:[#allocation0] sm:$0x1] %vm27_vm4, %v26_v11  }
  0x7c   :  { %v32_v12 = vpop.permute.xlu0 %31   ;;  %v38_v13 = vpop.permute.xlu1 %37  }
  0x7d   :  { %34 = vst.msk [vmem:[#allocation0] sm:$0x1] %vm33_vm5, %v32_v12  }
  0x7e   :  { %40 = vst.msk [vmem:[#allocation0] sm:$0x1] %vm39_vm6, %v38_v13  }
  0x80   :  { %v44_v14 = vpop.permute.xlu0 %43  }
  0x81   :  { %46 = vst.msk [vmem:[#allocation0] sm:$0x1] %vm45_vm7, %v44_v14  }
  0x88   :  { %v51_v15 = vld [vmem:[#allocation0] sm:$0x1] }
  0x89   :  { %54 = vst [vmem:[%s114_s1] sm:$0x1] %v51_v15 }

// kernel: tile.24
= control target key start
LH: loop header
LB: loop body
LE: loop exit
PB: predicated region body
PF: predicated region fallthrough
CT: control target
= control target key end

     0   :  { %s69_s10 = smov 28   ;;  %s70_s11 = smov 20   ;;  %vm3_vm0 = vcmask 31744   ;;  %vm9_vm1 = vcmask 261344   ;;  %vm15_vm2 = vcmask 228544   ;;  %vm21_vm3 = vcmask 195744   ;;  %s113_s0 = inlined_call_operand.vmem [shape: f32[8,4], index: 0, kind: input, shape index: {}]   ;;  %s114_s1 = inlined_call_operand.vmem [shape: f32[1,32], index: 1, kind: output, shape index: {}]  }
   0x1   :  { %v55_v0 = vld [vmem:[%s113_s0 + $0x7] sm:$0x1]   ;;  %v57_v1 = vld [vmem:[%s113_s0 + $0x5] sm:$0x1]   ;;  %v56_v2 = vld [vmem:[%s113_s0 + $0x6] sm:$0x1]  }
   0x2   :  { %7 = vrot.lane.b32.xlu0 %v55_v0, %s69_s10  ;;  %19 = vrot.lane.b32.xlu1 %v57_v1, %s70_s11  ;;  %v58_v3 = vld [vmem:[%s113_s0 + $0x4] sm:$0x1]   ;;  %v2_v4 = vld [vmem:[%s113_s0] sm:$0x1]   ;;  %s71_s18 = smov 24   ;;  %s72_s19 = smov 16  }
   0x3   :  { %4 = vst.msk [vmem:[#allocation0] sm:$0x1] %vm3_vm0, %v2_v4   ;;  %v59_v5 = vld [vmem:[%s113_s0 + $0x3] sm:$0x1]   ;;  %v60_v6 = vld [vmem:[%s113_s0 + $0x2] sm:$0x1]  }
   0x4   :  { %s73_s24 = smov 12   ;;  %s74_s25 = smov 8   ;;  %v61_v7 = vld [vmem:[%s113_s0 + $0x1] sm:$0x1]   ;;  %vm27_vm4 = vcmask 162944   ;;  %vm33_vm5 = vcmask 130144  }
   0x5   :  { %s75_s0 = smov 4   ;;  %vm39_vm6 = vcmask 97344   ;;  %vm45_vm7 = vcmask 64544  }
   0x6   :  { %13 = vrot.lane.b32.xlu0 %v56_v2, %s71_s18  ;;  %25 = vrot.lane.b32.xlu1 %v58_v3, %s72_s19 }
   0xa   :  { %31 = vrot.lane.b32.xlu0 %v59_v5, %s73_s24  ;;  %37 = vrot.lane.b32.xlu1 %v60_v6, %s74_s25 }
   0xe   :  { %43 = vrot.lane.b32.xlu0 %v61_v7, %s75_s0 }
  0x74   :  { %v8_v8 = vpop.permute.xlu0 %7   ;;  %v20_v9 = vpop.permute.xlu1 %19  }
  0x75   :  { %10 = vst.msk [vmem:[#allocation0] sm:$0x1] %vm9_vm1, %v8_v8  }
  0x78   :  { %v14_v10 = vpop.permute.xlu0 %13   ;;  %v26_v11 = vpop.permute.xlu1 %25  }
  0x79   :  { %16 = vst.msk [vmem:[#allocation0] sm:$0x1] %vm15_vm2, %v14_v10  }
  0x7a   :  { %22 = vst.msk [vmem:[#allocation0] sm:$0x1] %vm21_vm3, %v20_v9  }
  0x7b   :  { %28 = vst.msk [vmem:[#allocation0] sm:$0x1] %vm27_vm4, %v26_v11  }
  0x7c   :  { %v32_v12 = vpop.permute.xlu0 %31   ;;  %v38_v13 = vpop.permute.xlu1 %37  }
  0x7d   :  { %34 = vst.msk [vmem:[#allocation0] sm:$0x1] %vm33_vm5, %v32_v12  }
  0x7e   :  { %40 = vst.msk [vmem:[#allocation0] sm:$0x1] %vm39_vm6, %v38_v13  }
  0x80   :  { %v44_v14 = vpop.permute.xlu0 %43  }
  0x81   :  { %46 = vst.msk [vmem:[#allocation0] sm:$0x1] %vm45_vm7, %v44_v14  }
  0x88   :  { %v51_v15 = vld [vmem:[#allocation0] sm:$0x1] }
  0x89   :  { %54 = vst [vmem:[%s114_s1] sm:$0x1] %v51_v15 }

// kernel: autoencoder_forward.1
= control target key start
LH: loop header
LB: loop body
LE: loop exit
PB: predicated region body
PF: predicated region fallthrough
CT: control target
= control target key end

     0   :  { %s7145_s0 = inlined_call_operand.vmem [shape: f32[256,16], index: 0, kind: input, shape index: {}]   ;;  %s7146_s1 = inlined_call_operand.vmem [shape: f32[48,256], index: 1, kind: input, shape index: {}]   ;;  %s7147_s2 = inlined_call_operand.vmem [shape: f32[1,256], index: 2, kind: input, shape index: {}]   ;;  %s7148_s3 = inlined_call_operand.vmem [shape: f32[768,32], index: 3, kind: input, shape index: {}]   ;;  %s7149_s4 = inlined_call_operand.vmem [shape: f32[1,32], index: 4, kind: input, shape index: {}]   ;;  %s7150_s5 = inlined_call_operand.vmem [shape: f32[32,256], index: 5, kind: input, shape index: {}]   ;;  %s7151_s6 = inlined_call_operand.vmem [shape: f32[1,128], index: 6, kind: input, shape index: {}]   ;;  %s7152_s7 = inlined_call_operand.vmem [shape: f32[128,32], index: 7, kind: input, shape index: {}]   ;;  %s7153_s8 = inlined_call_operand.<no memory space> [shape: f32[1,1], index: 8, kind: input, shape index: {}]   ;;  %s7154_s9 = inlined_call_operand.vmem [shape: f32[128,8], index: 9, kind: input, shape index: {}]   ;;  %s7155_s10 = inlined_call_operand.hbm [shape: f32[256,16], index: 10, kind: output, shape index: {}]  }
   0x1   :  { %v15_v0 = vstv %s7153_s8 }
   0x2   :  { %16 = vst [vmem:[#allocation2] sm:$0x1] %v15_v0 }
   0x3   :  { %17 = vsyncpa [#allocation4], 0 }
   0x4   :  { %19 = vsyncpa [#allocation4 + $0x1], 0  ;;  %s4212_s15 = smov 0   ;;  %s4214_s16 = smov 0  }
   0x5   :  { %s4216_s17 = smov 0   ;;  %s4218_s18 = smov 0  }
   0x6 LB: > { %s4233_s8 = sadd.s32 4294967295, %s4136_s18   ;;  %s3506_s19 = sadd.s32 4294967294, %s4136_s18   ;;  %s4136_s18 = sphi %s4218_s18, %s7229_s18   ;;  %s4132_s17 = sphi %s4216_s17, %s7228_s17   ;;  %s4128_s16 = sphi %s4214_s16, %s7227_s16   ;;  %s4124_s15 = sphi %s4212_s15, %s7226_s15  }
   0x7   : > { %s4237_s20 = sadd.s32 1, %s4136_s18   ;;  %s247_s21 = sadd.s32 1, %s4132_s17 }
   0x8   : > { %s244_s22 = ssub.s32 %s4136_s18, %s4237_s20  ;;  %p257_p0 = scmp.ne.s32.totalorder %s4132_s17, %s4128_s16 }
   0x9   : > { %p245_p1 = scmp.eq.s32.totalorder %s244_s22, 0  ;;  %p258_p2 = scmp.eq.s32.totalorder %s4233_s8, 1 }
   0xa   : > { %p263_p3 = scmp.ne.s32.totalorder %s4128_s16, %s4124_s15  ;;  %p264_p4 = scmp.eq.s32.totalorder %s3506_s19, 1 }
   0xb   : > { %s4248_s23 = scalar_select %p245_p1, %s4132_s17, %s247_s21  }
   0xc   : > { %p4250_p5 = por %p258_p2, %p257_p0  ;;  %p4254_p6 = por %p264_p4, %p263_p3 }
   0xd   : > { %p3509_p7 = scmp.ge.s32.totalorder %s4136_s18, 1  ;;  %p318_p8 = scmp.lt.s32.totalorder %s4136_s18, 3 }
   0xf   : > { %p319_p9 = pnand %p3509_p7, %p318_p8 }
  0x11   : > { %322 = sbr.rel (%p319_p9) target bundleno = 1979 (0x7bb), region = 60 }
  0x16   : > { %v4263_v1 = vld [vmem:[%s7154_s9 + $0x10] sm:$0xff]  ;;  %v4268_v2 = vld [vmem:[%s7154_s9] sm:$0xff]  ;;  %s3511_s30 = sshll.u32 %s4233_s8, 4  ;;  %v4138_v3 = vmov 1   ;;  %v7159_v4 = vlaneseq  ;;  %v4276_v5 = vld [vmem:[%s7154_s9 + $0x18] sm:$0xff]  ;;  %v7156_v45 = vmov 0  }
  0x17   : > { %3953 = vset.pattern.permute.xlu1 %v4138_v3  ;;  %3952 = vset.pattern.permute.xlu0 %v4138_v3  ;;  %p357_p10 = scmp.lt.s32.totalorder %s3511_s30, 31  ;;  %v4281_v6 = vld [vmem:[%s7154_s9 + $0x8] sm:$0xff]  ;;  %v4301_v9 = vld [vmem:[%s7154_s9 + $0x20] sm:$0xff]  ;;  %v386_v24 = vld [vmem:[%s7154_s9 + $0x38] sm:$0xff]  ;;  %s4140_s29 = smov 16   ;;  %vm767_vm2 = vcmask 130048  }
  0x18   : > { %568 = vperm.xlu1 %3953, %v4263_v1   ;;  %560 = vperm.xlu0 %3952, %v4268_v2   ;;  %v4284_v7 = vshrl.u32 %v7159_v4, 7  ;;  %v4291_v8 = vld [vmem:[%s7154_s9 + $0x28] sm:$0xff]  ;;  %v385_v25 = vld [vmem:[%s7154_s9 + $0x30] sm:$0xff]  ;;  %v387_v36 = vld [vmem:[%s7154_s9 + $0x40] sm:$0xff]  ;;  %s4142_s14 = smov 32   ;;  %vm784_vm3 = vcmask 261120  }
  0x19   : > { %s7231_s30 = smov (!%p357_p10, %s3511_s30), 31  ;;  %v4377_v35 = vld [vmem:[%s7154_s9 + $0x48] sm:$0xff]  ;;  %v4386_v37 = vld [vmem:[%s7154_s9 + $0x58] sm:$0xff]  ;;  %v4391_v38 = vld [vmem:[%s7154_s9 + $0x50] sm:$0xff]  ;;  %vm825_vm4 = vcmask 392192   ;;  %vm2218_vm8 = vcmask 1047808  }
  0x1a   : > { %s3512_s19 = sshll.u32 %s7231_s30, 3  ;;  %vm542_vm0 = vcmp.lt.s32.totalorder %v4284_v7, 7  ;;  %v4398_v39 = vld [vmem:[%s7154_s9 + $0x68] sm:$0xff]  ;;  %v4403_v40 = vld [vmem:[%s7154_s9 + $0x60] sm:$0xff]  ;;  %v4413_v42 = vld [vmem:[%s7154_s9 + $0x70] sm:$0xff]  ;;  %vm413_vm1 = vcmp.lt.s32.totalorder %v4284_v7, 1 }
  0x1b   : > { %s4296_s28 = scalar_lea.vmem %s7145_s0, %s3512_s19  ;;  %v4427_v46 = vld [vmem:[%s7154_s9 + $0x78] sm:$0xff]  ;;  %v811_v63 = vld [vmem:[%s7146_s1 + $0x50] sm:$0xff]  ;;  %v810_v0 = vld [vmem:[%s7146_s1 + $0x48] sm:$0xff]  ;;  %vm1326_vm6 = vcmp.lt.s32.totalorder %v4284_v7, 2  ;;  %vm1487_vm7 = vcmp.lt.s32.totalorder %v4284_v7, 6  ;;  %s4146_s12 = smov 124  }
  0x1c   : > { %572 = vperm.xlu1 %3953, %v4276_v5   ;;  %564 = vperm.xlu0 %3952, %v4281_v6   ;;  %v4304_v10 = vld [vmem:[%s4296_s28] sm:$0xff]  ;;  %v4307_v11 = vld [vmem:[%s4296_s28 + $0x8] sm:$0xff]  ;;  %v4312_v14 = vld [vmem:[%s4296_s28 + $0x10] sm:$0xff]  ;;  %s4151_s11 = smov [#allocation3]  }
  0x1d   : > { %v526_v12 = vrot.slane %v4304_v10, 1  ;;  %v527_v13 = vrot.slane %v4307_v11, 1  ;;  %v4315_v15 = vld [vmem:[%s4296_s28 + $0x18] sm:$0xff]  ;;  %v528_v16 = vrot.slane %v4312_v14, 1  ;;  %v4320_v18 = vld [vmem:[%s4296_s28 + $0x20] sm:$0xff]  ;;  %v4323_v19 = vld [vmem:[%s4296_s28 + $0x28] sm:$0xff] }
  0x1e   : > { %v529_v17 = vrot.slane %v4315_v15, 1  ;;  %v530_v20 = vrot.slane %v4320_v18, 1  ;;  %v531_v21 = vrot.slane %v4323_v19, 1  ;;  %v4331_v22 = vld [vmem:[%s4296_s28 + $0x30] sm:$0xff]  ;;  %v4334_v23 = vld [vmem:[%s4296_s28 + $0x38] sm:$0xff]  ;;  %v396_v47 = vrot.slane %v4307_v11, 7 }
  0x1f   : > { %v532_v26 = vrot.slane %v4331_v22, 1  ;;  %v533_v27 = vrot.slane %v4334_v23, 1  ;;  %v4350_v29 = vsel %vm542_vm0, %v526_v12, %v527_v13  ;;  %v4358_v31 = vsel %vm542_vm0, %v527_v13, %v528_v16  ;;  %v4406_v41 = vld [vmem:[%s4296_s28 + $0x78] sm:$0xff]  ;;  %v809_v3 = vld [vmem:[%s7146_s1 + $0x40] sm:$0xff]  ;;  %s4080_s30 = sshll.u32 %s4151_s11, 4  ;;  %s4081_s30 = int_to_ptr.vmem [resolvable:$false] %s4080_s30 }
  0x20   : > { %580 = vperm.xlu1 %3953, %v4291_v8   ;;  %576 = vperm.xlu0 %3952, %v4301_v9   ;;  %v4346_v28 = vsel %vm542_vm0, %v528_v16, %v529_v17  ;;  %v4354_v30 = vsel %vm542_vm0, %v529_v17, %v530_v20  ;;  %v4366_v33 = vsel %vm542_vm0, %v530_v20, %v531_v21  ;;  %v541_v43 = vrot.slane %v4406_v41, 1  ;;  %v812_v62 = vld [vmem:[%s7146_s1 + $0x58] sm:$0xff]  ;;  %v805_v13 = vld [vmem:[%s7146_s1 + $0x20] sm:$0xff]  ;;  %v802_v16 = vld [vmem:[%s7146_s1 + $0x8] sm:$0xff] }
  0x21   : > { %v4362_v32 = vsel %vm542_vm0, %v531_v21, %v532_v26  ;;  %v4372_v34 = vsel %vm542_vm0, %v532_v26, %v533_v27  ;;  %v395_v48 = vrot.slane %v4304_v10, 7  ;;  %v397_v49 = vrot.slane %v4312_v14, 7  ;;  %894 = vmatprep.subr.mxu0 %v812_v62  ;;  %v801_v17 = vld [vmem:[%s7146_s1] sm:$0xff]  ;;  %v4569_v62 = vld [vmem:[%s4296_s28 + $0x58] sm:$0xff] }
  0x22   : > { %v4420_v44 = vsel %vm542_vm0, %v541_v43, %v526_v12  ;;  %v398_v50 = vrot.slane %v4315_v15, 7  ;;  %v399_v52 = vrot.slane %v4320_v18, 7  ;;  %v400_v53 = vrot.slane %v4323_v19, 7  ;;  %895 = vmatpush1.msra.mxu0 %v811_v63  ;;  %v806_v12 = vld [vmem:[%s7146_s1 + $0x28] sm:$0xff] }
  0x23   : > { %v4454_v51 = vsel %vm413_vm1, %v395_v48, %v396_v47  ;;  %v401_v54 = vrot.slane %v4331_v22, 7  ;;  %v402_v55 = vrot.slane %v4334_v23, 7  ;;  %v4464_v56 = vsel %vm413_vm1, %v396_v47, %v397_v49  ;;  %896 = vmatprep.subr.mxu0 %v810_v0  ;;  %v4579_v0 = vld [vmem:[%s4296_s28 + $0x60] sm:$0xff] }
  0x24   : > { %588 = vperm.xlu1 %3953, %v386_v24   ;;  %584 = vperm.xlu0 %3952, %v385_v25   ;;  %v4468_v57 = vsel %vm413_vm1, %v397_v49, %v398_v50  ;;  %v4474_v58 = vsel %vm413_vm1, %v398_v50, %v399_v52  ;;  %v4478_v59 = vsel %vm413_vm1, %v399_v52, %v400_v53  ;;  %v4557_v50 = vld [vmem:[%s4296_s28 + $0x50] sm:$0xff] }
  0x25   : > { %v4482_v60 = vsel %vm413_vm1, %v400_v53, %v401_v54  ;;  %v4488_v61 = vsel %vm413_vm1, %v401_v54, %v402_v55  ;;  %897 = vmatpush1.msra.mxu0 %v809_v3  ;;  %v536_v54 = vrot.slane %v4557_v50, 1 }
  0x28   : > { %596 = vperm.xlu1 %3953, %v4377_v35   ;;  %592 = vperm.xlu0 %3952, %v387_v36  }
  0x2c   : > { %604 = vperm.xlu1 %3953, %v4386_v37   ;;  %600 = vperm.xlu0 %3952, %v4391_v38  }
  0x30   : > { %612 = vperm.xlu1 %3953, %v4398_v39   ;;  %608 = vperm.xlu0 %3952, %v4403_v40  }
  0x34   : > { %616 = vperm.xlu0 %3952, %v4413_v42   ;;  %3954 = vset.pattern.permute.xlu1 %v7156_v45 }
  0x35   : > { %432 = vperm.xlu1 %3954, %v4268_v2  }
  0x38   : > { %620 = vperm.xlu0 %3952, %v4427_v46  }
  0x39   : > { %437 = vperm.xlu1 %3954, %v4281_v6  }
  0x3c   : > { %655 = vrot.lane.b32.xlu0 %v4304_v10, %s4140_s29 }
  0x3d   : > { %442 = vperm.xlu1 %3954, %v4263_v1   ;;  %3955 = vset.pattern.permute.xlu0 %v7156_v45 }
  0x40   : > { %447 = vperm.xlu0 %3955, %v4276_v5  }
  0x41   : > { %657 = vrot.lane.b32.xlu1 %v4307_v11, %s4140_s29  ;;  %v807_v11 = vld [vmem:[%s7146_s1 + $0x30] sm:$0xff] }
  0x44   : > { %452 = vperm.xlu0 %3955, %v4301_v9  }
  0x45   : > { %659 = vrot.lane.b32.xlu1 %v4312_v14, %s4140_s29  ;;  %v804_v14 = vld [vmem:[%s7146_s1 + $0x18] sm:$0xff] }
  0x48   : > { %661 = vrot.lane.b32.xlu0 %v4315_v15, %s4140_s29  ;;  %v803_v15 = vld [vmem:[%s7146_s1 + $0x10] sm:$0xff] }
  0x49   : > { %457 = vperm.xlu1 %3954, %v4291_v8   ;;  %v808_v8 = vld [vmem:[%s7146_s1 + $0x38] sm:$0xff] }
  0x4a   : > { %898 = vmatprep.subr.mxu0 %v808_v8 }
  0x4b   : > { %899 = vmatpush1.msra.mxu0 %v807_v11  ;;  %v537_v11 = vrot.slane %v4569_v62, 1 }
  0x4c   : > { %462 = vperm.xlu0 %3955, %v385_v25   ;;  %900 = vmatprep.subr.mxu0 %v806_v12  ;;  %v538_v12 = vrot.slane %v4579_v0, 1 }
  0x4d   : > { %663 = vrot.lane.b32.xlu1 %v4320_v18, %s4140_s29  ;;  %901 = vmatpush1.msra.mxu0 %v805_v13  ;;  %v7157_v18 = vmov 0.0  }
  0x4e   : > { %902 = vmatprep.subr.mxu0 %v804_v14  ;;  %938 = vmatprep.mubr.f32.mxu0 %v7157_v18 }
  0x4f   : > { %903 = vmatpush1.msra.mxu0 %v803_v15  ;;  %v546_v15 = vsel %vm542_vm0, %v537_v11, %v538_v12 }
  0x50   : > { %665 = vrot.lane.b32.xlu0 %v4323_v19, %s4140_s29  ;;  %904 = vmatprep.subr.mxu0 %v802_v16  ;;  %v547_v16 = vsel %vm542_vm0, %v536_v54, %v537_v11 }
  0x51   : > { %467 = vperm.xlu1 %3954, %v386_v24   ;;  %905 = vmatpush1.msra.mxu0 %v801_v17  ;;  %v4593_v17 = vld [vmem:[%s4296_s28 + $0x68] sm:$0xff] }
  0x54   : > { %472 = vperm.xlu0 %3955, %v387_v36  }
  0x55   : > { %667 = vrot.lane.b32.xlu1 %v4331_v22, %s4140_s29 }
  0x58   : > { %669 = vrot.lane.b32.xlu0 %v4334_v23, %s4140_s29  ;;  %v405_v23 = vrot.slane %v4557_v50, 7 }
  0x59   : > { %477 = vperm.xlu1 %3954, %v4377_v35   ;;  %v4539_v35 = vld [vmem:[%s4296_s28 + $0x48] sm:$0xff] }
  0x93   : > { %v561_v19 = vpop.permute.xlu0 %560  ;;  %v569_v21 = vpop.permute.xlu1 %568 }
  0x94   : > { %v623_v20 = vmul.f32 %v561_v19, %v4350_v29  ;;  %v625_v25 = vmul.f32 %v569_v21, %v4346_v28  ;;  %v4596_v19 = vld [vmem:[%s4296_s28 + $0x70] sm:$0xff] }
  0x96   : > { %719 = vrot.lane.b32.xlu0 %v623_v20, %s4142_s14 }
  0x97   : > { %v565_v22 = vpop.permute.xlu0 %564  ;;  %v573_v26 = vpop.permute.xlu1 %572 }
  0x98   : > { %v624_v24 = vmul.f32 %v565_v22, %v4358_v31  ;;  %v626_v29 = vmul.f32 %v573_v26, %v4354_v30  ;;  %v4546_v31 = vld [vmem:[%s4296_s28 + $0x40] sm:$0xff]  ;;  %v539_v22 = vrot.slane %v4593_v17, 1  ;;  %s4144_s28 = smov 112  }
  0x99   : > { %v534_v30 = vrot.slane %v4546_v31, 1 }
  0x9a   : > { %721 = vrot.lane.b32.xlu1 %v624_v24, %s4142_s14  ;;  %482 = vperm.xlu0 %3955, %v4391_v38   ;;  %v540_v24 = vrot.slane %v4596_v19, 1 }
  0x9b   : > { %v581_v36 = vpop.permute.xlu1 %580  ;;  %v577_v47 = vpop.permute.xlu0 %576 }
  0x9c   : > { %v628_v28 = vmul.f32 %v581_v36, %v4362_v32  ;;  %v627_v38 = vmul.f32 %v577_v47, %v4366_v33  ;;  %v535_v32 = vrot.slane %v4539_v35, 1  ;;  %v550_v33 = vsel %vm542_vm0, %v533_v27, %v534_v30 }
  0x9e   : > { %723 = vrot.lane.b32.xlu1 %v625_v25, %s4142_s14  ;;  %673 = vrot.lane.b32.xlu0 %v4539_v35, %s4140_s29  ;;  %v549_v27 = vsel %vm542_vm0, %v534_v30, %v535_v32 }
  0x9f   : > { %v585_v49 = vpop.permute.xlu0 %584  ;;  %v589_v52 = vpop.permute.xlu1 %588 }
  0xa0   : > { %v629_v53 = vmul.f32 %v585_v49, %v4372_v34  ;;  %v548_v34 = vsel %vm542_vm0, %v535_v32, %v536_v54 }
  0xa2   : > { %671 = vrot.lane.b32.xlu1 %v4546_v31, %s4140_s29  ;;  %725 = vrot.lane.b32.xlu0 %v626_v29, %s4142_s14  ;;  %v544_v29 = vsel %vm542_vm0, %v539_v22, %v540_v24 }
  0xa3   : > { %v593_v63 = vpop.permute.xlu0 %592 }
  0xa4   : > { %v631_v8 = vmul.f32 %v593_v63, %v549_v27 }
  0xa6   : > { %727 = vrot.lane.b32.xlu1 %v627_v38, %s4142_s14  ;;  %729 = vrot.lane.b32.xlu0 %v628_v28, %s4142_s14  ;;  %v543_v28 = vsel %vm542_vm0, %v540_v24, %v541_v43 }
  0xa7   : > { %v601_v13 = vpop.permute.xlu0 %600 }
  0xa8   : > { %v633_v21 = vmul.f32 %v601_v13, %v547_v16 }
  0xaa   : > { %487 = vperm.xlu1 %3954, %v4386_v37   ;;  %492 = vperm.xlu0 %3955, %v4403_v40   ;;  %v630_v37 = vmul.f32 %v589_v52, %v550_v33  ;;  %v597_v40 = vpop.permute.xlu1 %596  ;;  %v4143_v52 = vmov 2  }
  0xab   : > { %v632_v3 = vmul.f32 %v597_v40, %v548_v34  ;;  %v609_v25 = vpop.permute.xlu0 %608 }
  0xae   : > { %731 = vrot.lane.b32.xlu1 %v629_v53, %s4142_s14  ;;  %677 = vrot.lane.b32.xlu0 %v4569_v62, %s4140_s29  ;;  %v605_v14 = vpop.permute.xlu1 %604 }
  0xaf   : > { %v634_v20 = vmul.f32 %v605_v14, %v546_v15 }
  0xb2   : > { %675 = vrot.lane.b32.xlu1 %v4557_v50, %s4140_s29  ;;  %733 = vrot.lane.b32.xlu0 %v630_v37, %s4142_s14  ;;  %v613_v26 = vpop.permute.xlu1 %612 }
  0xb3   : > { %v636_v36 = vmul.f32 %v613_v26, %v544_v29 }
  0xb6   : > { %735 = vrot.lane.b32.xlu1 %v631_v8, %s4142_s14  ;;  %737 = vrot.lane.b32.xlu0 %v632_v3, %s4142_s14  ;;  %v433_v43 = vpop.permute.xlu1 %432 }
  0xba   : > { %497 = vperm.xlu1 %3954, %v4398_v39   ;;  %502 = vperm.xlu0 %3955, %v4413_v42   ;;  %v545_v39 = vsel %vm542_vm0, %v538_v12, %v539_v22  ;;  %v617_v42 = vpop.permute.xlu0 %616 }
  0xbb   : > { %v635_v47 = vmul.f32 %v609_v25, %v545_v39  ;;  %v637_v38 = vmul.f32 %v617_v42, %v543_v28 }
  0xbe   : > { %739 = vrot.lane.b32.xlu1 %v633_v21, %s4142_s14  ;;  %741 = vrot.lane.b32.xlu0 %v634_v20, %s4142_s14  ;;  %v621_v30 = vpop.permute.xlu0 %620 }
  0xbf   : > { %v638_v49 = vmul.f32 %v621_v30, %v4420_v44  ;;  %3957 = vset.pattern.permute.xlu0 %v4143_v52 }
  0xc2   : > { %679 = vrot.lane.b32.xlu1 %v4579_v0, %s4140_s29  ;;  %681 = vrot.lane.b32.xlu0 %v4593_v17, %s4140_s29  ;;  %v656_v44 = vpop.permute.xlu0 %655 }
  0xc6   : > { %743 = vrot.lane.b32.xlu1 %v635_v47, %s4142_s14  ;;  %745 = vrot.lane.b32.xlu0 %v636_v36, %s4142_s14  ;;  %v448_v32 = vpop.permute.xlu0 %447 }
  0xca   : > { %507 = vperm.xlu1 %3954, %v4427_v46   ;;  %747 = vrot.lane.b32.xlu0 %v637_v38, %s4142_s14  ;;  %v438_v46 = vpop.permute.xlu1 %437  ;;  %v453_v54 = vpop.permute.xlu0 %452 }
  0xcb   : > { %v511_v12 = vmul.f32 %v438_v46, %v4454_v51  ;;  %v514_v39 = vmul.f32 %v453_v54, %v4474_v58  ;;  %v403_v54 = vrot.slane %v4546_v31, 7 }
  0xce   : > { %749 = vrot.lane.b32.xlu0 %v638_v49, %s4142_s14  ;;  %683 = vrot.lane.b32.xlu1 %v4596_v19, %s4140_s29  ;;  %v443_v53 = vpop.permute.xlu1 %442  ;;  %v662_v40 = vpop.permute.xlu0 %661 }
  0xcf   : > { %3956 = vset.pattern.permute.xlu1 %v4143_v52 }
  0xd2   : > { %685 = vrot.lane.b32.xlu1 %v4406_v41, %s4140_s29  ;;  %1364 = vperm.xlu0 %3957, %v4281_v6   ;;  %v658_v33 = vpop.permute.xlu1 %657  ;;  %v463_v63 = vpop.permute.xlu0 %462  ;;  %s3569_s29 = sshll.u32 %s4233_s8, 11 }
  0xd3   : > { %v769_v16 = vsel %vm767_vm2, %v511_v12, %v658_v33  ;;  %v516_v58 = vmul.f32 %v463_v63, %v4482_v60  ;;  %s7093_s26 = scalar_lea.hbm %s7155_s10, %s3569_s29 }
  0xd6   : > { %1360 = vperm.xlu1 %3956, %v4268_v2   ;;  %1368 = vperm.xlu0 %3957, %v4263_v1   ;;  %v660_v37 = vpop.permute.xlu1 %659  ;;  %v666_v6 = vpop.permute.xlu0 %665  ;;  %v410_v2 = vrot.slane %v4406_v41, 7  ;;  %v1679_v41 = vld [vmem:[%s7148_s3 + $0x1f8] sm:$0xff] }
  0xd7   : > { %3650 = vmatprep.subr.mxu0 %v1679_v41 }
  0xda   : > { %1372 = vperm.xlu1 %3956, %v4276_v5   ;;  %1376 = vperm.xlu0 %3957, %v4301_v9   ;;  %v458_v34 = vpop.permute.xlu1 %457  ;;  %v4632_v1 = vpop.permute.xlu0 %472  ;;  %v429_v5 = vsel %vm413_vm1, %v410_v2, %v395_v48  ;;  %v512_v48 = vmul.f32 %v443_v53, %v4464_v56  ;;  %v513_v56 = vmul.f32 %v448_v32, %v4468_v57 }
  0xdb   : > { %v510_v8 = vmul.f32 %v433_v43, %v429_v5  ;;  %v515_v38 = vmul.f32 %v458_v34, %v4478_v59 }
  0xdc   : > { %v770_v51 = vsel %vm767_vm2, %v512_v48, %v660_v37  ;;  %v771_v42 = vsel %vm767_vm2, %v513_v56, %v662_v40  ;;  %v404_v37 = vrot.slane %v4539_v35, 7  ;;  %v421_v40 = vsel %vm413_vm1, %v402_v55, %v403_v54 }
  0xdd   : > { %v768_v13 = vsel %vm767_vm2, %v510_v8, %v656_v44  ;;  %v773_v52 = vsel %vm767_vm2, %v515_v38, %v666_v6  ;;  %v518_v31 = vmul.f32 %v4632_v1, %v421_v40  ;;  %v406_v8 = vrot.slane %v4569_v62, 7  ;;  %v1677_v40 = vld [vmem:[%s7148_s3 + $0x1e8] sm:$0xff] }
  0xde   : > { %v664_v27 = vpop.permute.xlu1 %663  ;;  %v670_v11 = vpop.permute.xlu0 %669  ;;  %v420_v35 = vsel %vm413_vm1, %v403_v54, %v404_v37  ;;  %v419_v1 = vsel %vm413_vm1, %v404_v37, %v405_v23  ;;  %v1662_v37 = vld [vmem:[%s7148_s3 + $0x170] sm:$0xff] }
  0xdf   : > { %v772_v30 = vsel %vm767_vm2, %v514_v39, %v664_v27  ;;  %v409_v39 = vrot.slane %v4596_v19, 7 }
  0xe2   : > { %v468_v3 = vpop.permute.xlu1 %467 }
  0xe3   : > { %v517_v59 = vmul.f32 %v468_v3, %v4488_v61 }
  0xe5   : > { %v775_v61 = vsel %vm767_vm2, %v517_v59, %v670_v11 }
  0xe6   : > { %v668_v9 = vpop.permute.xlu1 %667 }
  0xe7   : > { %v774_v53 = vsel %vm767_vm2, %v516_v58, %v668_v9 }
  0xea   : > { %v4642_v14 = vpop.permute.xlu1 %477 }
  0xeb   : > { %v519_v9 = vmul.f32 %v4642_v14, %v420_v35  ;;  %v418_v14 = vsel %vm413_vm1, %v405_v23, %v406_v8  ;;  %v1674_v35 = vld [vmem:[%s7148_s3 + $0x1d0] sm:$0xff] }
  0xec   : > { %v1658_v23 = vld [vmem:[%s7148_s3 + $0x150] sm:$0xff] }
 0x108   : > { %v720_v15 = vpop.permute.xlu0 %719 }
 0x109   : > { %v785_v10 = vsel %vm784_vm3, %v768_v13, %v720_v15 }
 0x10a   : > { %3513 = vmatmul.mubr.msk.f32.vlgmr.msra.gmra.mxu0 %vm825_vm4, %v785_v10  ;;  %v407_v10 = vrot.slane %v4579_v0, 7 }
 0x10b   : > { %944 = vmatprep.mubr.f32.mxu0 %v7157_v18 }
 0x10c   : > { %v722_v20 = vpop.permute.xlu1 %721 }
 0x10d   : > { %v786_v21 = vsel %vm784_vm3, %v769_v16, %v722_v20 }
 0x10e   : > { %3514 = vmatmul.mubr.msk.f32.gmra.mxu0 %vm825_vm4, %v786_v21 }
 0x10f   : > { %950 = vmatprep.mubr.f32.mxu0 %v7157_v18 }
 0x110   : > { %v724_v22 = vpop.permute.xlu1 %723 }
 0x111   : > { %v787_v24 = vsel %vm784_vm3, %v770_v51, %v724_v22  ;;  %v417_v51 = vsel %vm413_vm1, %v406_v8, %v407_v10  ;;  %v408_v22 = vrot.slane %v4593_v17, 7  ;;  %v1670_v8 = vld [vmem:[%s7148_s3 + $0x1b0] sm:$0xff] }
 0x112   : > { %3515 = vmatmul.mubr.msk.f32.gmra.mxu0 %vm825_vm4, %v787_v24 }
 0x113   : > { %956 = vmatprep.mubr.f32.mxu0 %v7157_v18  ;;  %v415_v38 = vsel %vm413_vm1, %v408_v22, %v409_v39 }
 0x114   : > { %v672_v26 = vpop.permute.xlu1 %671 }
 0x115   : > { %v483_v25 = vpop.permute.xlu0 %482  ;;  %v776_v55 = vsel %vm767_vm2, %v518_v31, %v672_v26  ;;  %v1659_v31 = vld [vmem:[%s7148_s3 + $0x158] sm:$0xff] }
 0x116   : > { %v520_v15 = vmul.f32 %v483_v25, %v419_v1  ;;  %v1655_v1 = vld [vmem:[%s7148_s3 + $0x138] sm:$0xff] }
 0x118   : > { %v728_v28 = vpop.permute.xlu1 %727 }
 0x119   : > { %v674_v29 = vpop.permute.xlu0 %673  ;;  %v789_v57 = vsel %vm784_vm3, %v772_v30, %v728_v28 }
 0x11a   : > { %v777_v50 = vsel %vm767_vm2, %v519_v9, %v674_v29  ;;  %v416_v29 = vsel %vm413_vm1, %v407_v10, %v408_v22  ;;  %v1671_v9 = vld [vmem:[%s7148_s3 + $0x1b8] sm:$0xff]  ;;  %v1668_v10 = vld [vmem:[%s7148_s3 + $0x1a0] sm:$0xff]  ;;  %v1666_v22 = vld [vmem:[%s7148_s3 + $0x190] sm:$0xff] }
 0x11d   : > { %v726_v36 = vpop.permute.xlu0 %725 }
 0x11e   : > { %v788_v47 = vsel %vm784_vm3, %v771_v42, %v726_v36 }
 0x11f   : > { %3516 = vmatmul.mubr.msk.f32.gmra.mxu0 %vm825_vm4, %v788_v47 }
 0x120   : > { %962 = vmatprep.mubr.f32.mxu0 %v7157_v18 }
 0x121   : > { %v730_v49 = vpop.permute.xlu0 %729 }
 0x122   : > { %v790_v44 = vsel %vm784_vm3, %v773_v52, %v730_v49  ;;  %v414_v52 = vsel %vm413_vm1, %v409_v39, %v410_v2  ;;  %v1663_v2 = vld [vmem:[%s7148_s3 + $0x178] sm:$0xff] }
 0x123   : > { %3517 = vmatmul.mubr.msk.f32.gmra.mxu0 %vm825_vm4, %v789_v57 }
 0x124   : > { %968 = vmatprep.mubr.f32.mxu0 %v7157_v18  ;;  %3651 = vmatpush3.msra.mxu0 %v1663_v2 }
 0x125   : > { %v488_v43 = vpop.permute.xlu1 %487  ;;  %v493_v46 = vpop.permute.xlu0 %492 }
 0x126   : > { %v521_v21 = vmul.f32 %v488_v43, %v418_v14  ;;  %v522_v26 = vmul.f32 %v493_v46, %v417_v51  ;;  %v1653_v14 = vld [vmem:[%s7148_s3 + $0x128] sm:$0xff]  ;;  %v1651_v51 = vld [vmem:[%s7148_s3 + $0x118] sm:$0xff] }
 0x127   : > { %3518 = vmatmul.mubr.msk.f32.gmra.mxu0 %vm825_vm4, %v790_v44 }
 0x128   : > { %974 = vmatprep.mubr.f32.mxu0 %v7157_v18 }
 0x129   : > { %v732_v32 = vpop.permute.xlu1 %731  ;;  %v678_v33 = vpop.permute.xlu0 %677 }
 0x12a   : > { %v791_v60 = vsel %vm784_vm3, %v774_v53, %v732_v32  ;;  %v779_v0 = vsel %vm767_vm2, %v521_v21, %v678_v33  ;;  %v1667_v21 = vld [vmem:[%s7148_s3 + $0x198] sm:$0xff] }
 0x12b   : > { %3519 = vmatmul.mubr.msk.f32.gmra.mxu0 %vm825_vm4, %v791_v60  ;;  %v1678_v60 = vld [vmem:[%s7148_s3 + $0x1f0] sm:$0xff] }
 0x12c   : > { %980 = vmatprep.mubr.f32.mxu0 %v7157_v18  ;;  %3652 = vmatprep.subr.mxu0 %v1678_v60 }
 0x12d   : > { %v676_v34 = vpop.permute.xlu1 %675  ;;  %v734_v63 = vpop.permute.xlu0 %733  ;;  %3653 = vmatpush3.msra.mxu0 %v1662_v37 }
 0x12e   : > { %v792_v27 = vsel %vm784_vm3, %v775_v61, %v734_v63  ;;  %v778_v62 = vsel %vm767_vm2, %v520_v15, %v676_v34  ;;  %v1661_v61 = vld [vmem:[%s7148_s3 + $0x168] sm:$0xff]  ;;  %v1676_v34 = vld [vmem:[%s7148_s3 + $0x1e0] sm:$0xff]  ;;  %3654 = vmatprep.subr.mxu0 %v1677_v40 }
 0x12f   : > { %3520 = vmatmul.mubr.msk.f32.gmra.mxu0 %vm825_vm4, %v792_v27  ;;  %v1660_v63 = vld [vmem:[%s7148_s3 + $0x160] sm:$0xff]  ;;  %v1675_v27 = vld [vmem:[%s7148_s3 + $0x1d8] sm:$0xff]  ;;  %v1669_v15 = vld [vmem:[%s7148_s3 + $0x1a8] sm:$0xff] }
 0x130   : > { %986 = vmatprep.mubr.f32.mxu0 %v7157_v18  ;;  %3655 = vmatpush3.msra.mxu0 %v1661_v61 }
 0x131   : > { %v736_v6 = vpop.permute.xlu1 %735  ;;  %v738_v3 = vpop.permute.xlu0 %737  ;;  %3656 = vmatprep.subr.mxu0 %v1676_v34 }
 0x132   : > { %v793_v5 = vsel %vm784_vm3, %v776_v55, %v736_v6  ;;  %v794_v13 = vsel %vm784_vm3, %v777_v50, %v738_v3  ;;  %3657 = vmatpush3.msra.mxu0 %v1660_v63  ;;  %v1673_v55 = vld [vmem:[%s7148_s3 + $0x1c8] sm:$0xff]  ;;  %v1672_v3 = vld [vmem:[%s7148_s3 + $0x1c0] sm:$0xff]  ;;  %v817_v50 = vsub.s32 0, %v4284_v7 }
 0x133   : > { %3521 = vmatmul.mubr.msk.f32.gmra.mxu0 %vm825_vm4, %v793_v5  ;;  %3658 = vmatprep.subr.mxu0 %v1675_v27  ;;  %v1657_v6 = vld [vmem:[%s7148_s3 + $0x148] sm:$0xff]  ;;  %v1656_v5 = vld [vmem:[%s7148_s3 + $0x140] sm:$0xff] }
 0x134   : > { %992 = vmatprep.mubr.f32.mxu0 %v7157_v18  ;;  %3659 = vmatpush3.msra.mxu0 %v1659_v31 }
 0x135   : > { %v498_v11 = vpop.permute.xlu1 %497  ;;  %v503_v12 = vpop.permute.xlu0 %502  ;;  %3660 = vmatprep.subr.mxu0 %v1674_v35 }
 0x136   : > { %v523_v28 = vmul.f32 %v498_v11, %v416_v29  ;;  %v524_v19 = vmul.f32 %v503_v12, %v415_v38  ;;  %3661 = vmatpush3.msra.mxu0 %v1658_v23  ;;  %v1654_v11 = vld [vmem:[%s7148_s3 + $0x130] sm:$0xff]  ;;  %v813_v12 = vld [vmem:[%s7147_s2] sm:$0x3]  ;;  %v1665_v29 = vld [vmem:[%s7148_s3 + $0x188] sm:$0xff] }
 0x137   : > { %3522 = vmatmul.mubr.msk.f32.gmra.mxu0 %vm825_vm4, %v794_v13  ;;  %3662 = vmatprep.subr.mxu0 %v1673_v55  ;;  %v821_v13 = vsub.s32 1, %v4284_v7 }
 0x138   : > { %998 = vmatprep.mubr.f32.mxu0 %v7157_v18  ;;  %3663 = vmatpush3.msra.mxu0 %v1657_v6 }
 0x139   : > { %v740_v48 = vpop.permute.xlu1 %739  ;;  %v742_v16 = vpop.permute.xlu0 %741  ;;  %3664 = vmatprep.subr.mxu0 %v1672_v3 }
 0x13a   : > { %v795_v20 = vsel %vm784_vm3, %v778_v62, %v740_v48  ;;  %v796_v56 = vsel %vm784_vm3, %v779_v0, %v742_v16  ;;  %3665 = vmatpush3.msra.mxu0 %v1656_v5  ;;  %v4815_v62 = vrot.slane %v813_v12, %v817_v50  ;;  %v1652_v48 = vld [vmem:[%s7148_s3 + $0x120] sm:$0xff]  ;;  %v4820_v16 = vrot.slane %v813_v12, %v821_v13 }
 0x13b   : > { %3523 = vmatmul.mubr.msk.f32.gmra.mxu0 %vm825_vm4, %v795_v20  ;;  %3666 = vmatprep.subr.mxu0 %v1671_v9 }
 0x13c   : > { %1004 = vmatprep.mubr.f32.mxu0 %v7157_v18  ;;  %3667 = vmatpush3.msra.mxu0 %v1655_v1 }
 0x13d   : > { %v680_v24 = vpop.permute.xlu1 %679  ;;  %v682_v25 = vpop.permute.xlu0 %681  ;;  %3668 = vmatprep.subr.mxu0 %v1670_v8 }
 0x13e   : > { %v780_v17 = vsel %vm767_vm2, %v522_v26, %v680_v24  ;;  %v781_v30 = vsel %vm767_vm2, %v523_v28, %v682_v25  ;;  %3669 = vmatpush3.msra.mxu0 %v1654_v11  ;;  %v1650_v24 = vld [vmem:[%s7148_s3 + $0x110] sm:$0xff]  ;;  %v1664_v28 = vld [vmem:[%s7148_s3 + $0x180] sm:$0xff] }
 0x13f   : > { %3524 = vmatmul.mubr.msk.f32.gmra.mxu0 %vm825_vm4, %v796_v56  ;;  %3670 = vmatprep.subr.mxu0 %v1669_v15 }
 0x140   : > { %1010 = vmatprep.mubr.f32.mxu0 %v7157_v18  ;;  %3671 = vmatpush3.msra.mxu0 %v1653_v14 }
 0x141   : > { %v744_v42 = vpop.permute.xlu1 %743  ;;  %v746_v47 = vpop.permute.xlu0 %745  ;;  %3672 = vmatprep.subr.mxu0 %v1668_v10 }
 0x142   : > { %v797_v36 = vsel %vm784_vm3, %v780_v17, %v744_v42  ;;  %v798_v57 = vsel %vm784_vm3, %v781_v30, %v746_v47  ;;  %3673 = vmatpush3.msra.mxu0 %v1652_v48  ;;  %v1649_v42 = vld [vmem:[%s7148_s3 + $0x108] sm:$0xff] }
 0x143   : > { %3525 = vmatmul.mubr.msk.f32.gmra.mxu0 %vm825_vm4, %v797_v36  ;;  %3674 = vmatprep.subr.mxu0 %v1667_v21 }
 0x144   : > { %1016 = vmatprep.mubr.f32.mxu0 %v7157_v18  ;;  %3675 = vmatpush3.msra.mxu0 %v1651_v51 }
 0x145   : > { %v508_v49 = vpop.permute.xlu1 %507  ;;  %v748_v58 = vpop.permute.xlu0 %747  ;;  %3676 = vmatprep.subr.mxu0 %v1666_v22 }
 0x146   : > { %v525_v59 = vmul.f32 %v508_v49, %v414_v52  ;;  %3677 = vmatpush3.msra.mxu0 %v1650_v24  ;;  %v1648_v49 = vld [vmem:[%s7148_s3 + $0x100] sm:$0xff] }
 0x147   : > { %3526 = vmatmul.mubr.msk.f32.gmra.mxu0 %vm825_vm4, %v798_v57  ;;  %3678 = vmatprep.subr.mxu0 %v1665_v29 }
 0x148   : > { %1022 = vmatprep.mubr.f32.mxu0 %v7157_v18  ;;  %3679 = vmatpush3.msra.mxu0 %v1649_v42 }
 0x149   : > { %v684_v43 = vpop.permute.xlu1 %683  ;;  %v750_v32 = vpop.permute.xlu0 %749  ;;  %3680 = vmatprep.subr.mxu0 %v1664_v28 }
 0x14a   : > { %v782_v46 = vsel %vm767_vm2, %v524_v19, %v684_v43  ;;  %3681 = vmatpush3.msra.mxu0 %v1648_v49 }
 0x14b   : > { %v799_v44 = vsel %vm784_vm3, %v782_v46, %v748_v58 }
 0x14c   : > { %3527 = vmatmul.mubr.msk.f32.gmra.mxu0 %vm825_vm4, %v799_v44 }
 0x14d   : > { %v686_v53 = vpop.permute.xlu1 %685  ;;  %1028 = vmatprep.mubr.f32.mxu0 %v7157_v18 }
 0x14e   : > { %v783_v33 = vsel %vm767_vm2, %v525_v59, %v686_v53 }
 0x14f   : > { %v800_v54 = vsel %vm784_vm3, %v783_v33, %v750_v32 }
 0x150   : > { %3528 = vmatmul.mubr.msk.f32.gmra.mxu0 %vm825_vm4, %v800_v54 }
 0x1ca   : > { %v940_v20 = vpop.f32.mrf.mxu0 }
 0x1cb   : > { %v941_v0 = vadd.f32 %v940_v20, %v4815_v62 }
 0x1cc   : > { %v942_v25 = vpop.f32.mrf.mxu0 }
 0x1cd   : > { %v943_v56 = vadd.f32 %v942_v25, %v4820_v16  ;;  %v1035_v39 = vmax.f32 %v941_v0, 0.0 }
 0x1ce   : > { %v946_v26 = vpop.f32.mrf.mxu0 }
 0x1cf   : > { %v947_v17 = vadd.f32 %v946_v26, %v4815_v62  ;;  %v1036_v36 = vmax.f32 %v943_v56, 0.0  ;;  %v4850_v19 = vrot.slane %v1035_v39, 1 }
 0x1d0   : > { %v948_v47 = vpop.f32.mrf.mxu0 }
 0x1d1   : > { %v1037_v38 = vmax.f32 %v947_v17, 0.0  ;;  %v949_v30 = vadd.f32 %v948_v47, %v4820_v16  ;;  %v4853_v46 = vrot.slane %v1036_v36, 1 }
 0x1d2   : > { %v952_v57 = vpop.f32.mrf.mxu0 }
 0x1d3   : > { %v1069_v58 = vrot.slane %v1037_v38, 1  ;;  %v1038_v52 = vmax.f32 %v949_v30, 0.0  ;;  %v953_v43 = vadd.f32 %v952_v57, %v4815_v62 }
 0x1d4   : > { %v954_v44 = vpop.f32.mrf.mxu0 }
 0x1d5   : > { %v1070_v59 = vrot.slane %v1038_v52, 1  ;;  %v1039_v53 = vmax.f32 %v953_v43, 0.0  ;;  %v955_v32 = vadd.f32 %v954_v44, %v4820_v16  ;;  %v1127_v33 = vsel %vm542_vm0, %v4850_v19, %v1069_v58 }
 0x1d6   : > { %v4859_v54 = vmax.f32 %v1035_v39, %v1127_v33 }
 0x1d7   : > { %v1071_v41 = vrot.slane %v1039_v53, 1  ;;  %v1040_v2 = vmax.f32 %v955_v32, 0.0  ;;  %v1128_v60 = vsel %vm542_vm0, %v4853_v46, %v1070_v59 }
 0x1d8   : > { %1163 = vrot.lane.b32.xlu1 %v4859_v54, %s4144_s28  ;;  %v4868_v61 = vmax.f32 %v1036_v36, %v1128_v60 }
 0x1d9   : > { %v1072_v37 = vrot.slane %v1040_v2, 1  ;;  %v1125_v40 = vsel %vm542_vm0, %v1069_v58, %v1071_v41 }
 0x1da   : > { %v4870_v34 = vmax.f32 %v1037_v38, %v1125_v40 }
 0x1db   : > { %v1126_v63 = vsel %vm542_vm0, %v1070_v59, %v1072_v37 }
 0x1dc   : > { %1195 = vrot.lane.b32.xlu1 %v4868_v61, %s4144_s28  ;;  %1165 = vrot.lane.b32.xlu0 %v4870_v34, %s4144_s28  ;;  %v4878_v27 = vmax.f32 %v1038_v52, %v1126_v63 }
 0x1df   : > { %v958_v31 = vpop.f32.mrf.mxu0 }
 0x1e0   : > { %v959_v35 = vadd.f32 %v958_v31, %v4815_v62  ;;  %1197 = vrot.lane.b32.xlu1 %v4878_v27, %s4144_s28 }
 0x1e1   : > { %v960_v23 = vpop.f32.mrf.mxu0 }
 0x1e2   : > { %v1041_v55 = vmax.f32 %v959_v35, 0.0  ;;  %v961_v6 = vadd.f32 %v960_v23, %v4820_v16 }
 0x1e3   : > { %v964_v3 = vpop.f32.mrf.mxu0 }
 0x1e4   : > { %v1073_v5 = vrot.slane %v1041_v55, 1  ;;  %v1042_v9 = vmax.f32 %v961_v6, 0.0  ;;  %v965_v1 = vadd.f32 %v964_v3, %v4815_v62  ;;  %v1647_v6 = vld [vmem:[%s7148_s3 + $0xf8] sm:$0xff] }
 0x1e5   : > { %v966_v8 = vpop.f32.mrf.mxu0  ;;  %v1631_v3 = vld [vmem:[%s7148_s3 + $0x78] sm:$0xff]  ;;  %3570 = vmatprep.subr.mxu1 %v1647_v6 }
 0x1e6   : > { %v1074_v50 = vrot.slane %v1042_v9, 1  ;;  %v1043_v11 = vmax.f32 %v965_v1, 0.0  ;;  %v967_v12 = vadd.f32 %v966_v8, %v4820_v16  ;;  %v1123_v13 = vsel %vm542_vm0, %v1071_v41, %v1073_v5  ;;  %3571 = vmatpush3.msra.mxu1 %v1631_v3  ;;  %v1626_v3 = vld [vmem:[%s7148_s3 + $0x50] sm:$0xff] }
 0x1e7   : > { %v970_v15 = vpop.f32.mrf.mxu0  ;;  %v4888_v14 = vmax.f32 %v1039_v53, %v1123_v13 }
 0x1e8   : > { %v1075_v10 = vrot.slane %v1043_v11, 1  ;;  %v1044_v48 = vmax.f32 %v967_v12, 0.0  ;;  %v971_v20 = vadd.f32 %v970_v15, %v4815_v62  ;;  %v1124_v21 = vsel %vm542_vm0, %v1072_v37, %v1074_v50  ;;  %v1630_v15 = vld [vmem:[%s7148_s3 + $0x70] sm:$0xff] }
 0x1e9   : > { %v972_v51 = vpop.f32.mrf.mxu0  ;;  %1167 = vrot.lane.b32.xlu1 %v4888_v14, %s4144_s28  ;;  %v4898_v56 = vmax.f32 %v1040_v2, %v1124_v21  ;;  %v4995_v21 = vld [vmem:[%s7154_s9 + $0x28] sm:$0xff] }
 0x1ea   : > { %v1076_v22 = vrot.slane %v1044_v48, 1  ;;  %v1045_v0 = vmax.f32 %v971_v20, 0.0  ;;  %v4896_v24 = vadd.f32 %v972_v51, %v4820_v16  ;;  %v1121_v26 = vsel %vm542_vm0, %v1073_v5, %v1075_v10  ;;  %v1644_v51 = vld [vmem:[%s7148_s3 + $0xe0] sm:$0xff] }
 0x1eb   : > { %v976_v25 = vpop.f32.mrf.mxu0  ;;  %v4921_v57 = vmax.f32 %v1041_v55, %v1121_v26 }
 0x1ec   : > { %v1077_v29 = vrot.slane %v1045_v0, 1  ;;  %v7167_v39 = vmax.f32 %v4896_v24, 0.0  ;;  %v4904_v17 = vadd.f32 %v976_v25, %v4815_v62  ;;  %v1122_v42 = vsel %vm542_vm0, %v1074_v50, %v1076_v22  ;;  %v1646_v50 = vld [vmem:[%s7148_s3 + $0xf0] sm:$0xff] }
 0x1ed   : > { %v978_v36 = vpop.f32.mrf.mxu0  ;;  %1199 = vrot.lane.b32.xlu1 %v4898_v56, %s4144_s28  ;;  %v4910_v47 = vmax.f32 %v1042_v9, %v1122_v42  ;;  %3572 = vmatprep.subr.mxu1 %v1646_v50 }
 0x1ee   : > { %v4914_v28 = vrot.slane %v7167_v39, 1  ;;  %v7166_v38 = vmax.f32 %v4904_v17, 0.0  ;;  %v1119_v30 = vsel %vm542_vm0, %v1075_v10, %v1077_v29  ;;  %v979_v59 = vadd.f32 %v978_v36, %v4820_v16  ;;  %v1645_v10 = vld [vmem:[%s7148_s3 + $0xe8] sm:$0xff]  ;;  %3573 = vmatpush3.msra.mxu1 %v1630_v15 }
 0x1ef   : > { %v982_v49 = vpop.f32.mrf.mxu0  ;;  %1201 = vrot.lane.b32.xlu0 %v4910_v47, %s4144_s28  ;;  %v4932_v44 = vmax.f32 %v1043_v11, %v1119_v30  ;;  %3574 = vmatprep.subr.mxu1 %v1645_v10  ;;  %v1628_v30 = vld [vmem:[%s7148_s3 + $0x60] sm:$0xff] }
 0x1f0   : > { %v4925_v58 = vrot.slane %v7166_v38, 1  ;;  %v1120_v52 = vsel %vm542_vm0, %v1076_v22, %v4914_v28  ;;  %v1048_v40 = vmax.f32 %v979_v59, 0.0  ;;  %v983_v63 = vadd.f32 %v982_v49, %v4815_v62  ;;  %v1643_v49 = vld [vmem:[%s7148_s3 + $0xd8] sm:$0xff]  ;;  %v1642_v59 = vld [vmem:[%s7148_s3 + $0xd0] sm:$0xff] }
 0x1f1   : > { %v984_v43 = vpop.f32.mrf.mxu0  ;;  %1169 = vrot.lane.b32.xlu1 %v4921_v57, %s4144_s28  ;;  %v4940_v33 = vmax.f32 %v1044_v48, %v1120_v52  ;;  %v1629_v48 = vld [vmem:[%s7148_s3 + $0x68] sm:$0xff]  ;;  %v1627_v52 = vld [vmem:[%s7148_s3 + $0x58] sm:$0xff] }
 0x1f2   : > { %v4936_v53 = vadd.f32 %v984_v43, %v4820_v16  ;;  %v1117_v60 = vsel %vm542_vm0, %v1077_v29, %v4925_v58  ;;  %v4967_v9 = vrot.slane %v1048_v40, 1  ;;  %v1049_v1 = vmax.f32 %v983_v63, 0.0  ;;  %3575 = vmatpush3.msra.mxu1 %v1629_v48 }
 0x1f3   : > { %v988_v32 = vpop.f32.mrf.mxu0  ;;  %1171 = vrot.lane.b32.xlu0 %v4932_v44, %s4144_s28  ;;  %v4952_v35 = vmax.f32 %v1045_v0, %v1117_v60  ;;  %3576 = vmatprep.subr.mxu1 %v1644_v51 }
 0x1f4   : > { %v7165_v41 = vmax.f32 %v4936_v53, 0.0  ;;  %v4944_v2 = vadd.f32 %v988_v32, %v4815_v62  ;;  %v5001_v22 = vrot.slane %v1049_v1, 1  ;;  %3577 = vmatpush3.msra.mxu1 %v1628_v30  ;;  %v1623_v30 = vld [vmem:[%s7148_s3 + $0x38] sm:$0xff] }
 0x1f5   : > { %v990_v37 = vpop.f32.mrf.mxu0  ;;  %1203 = vrot.lane.b32.xlu1 %v4940_v33, %s4144_s28  ;;  %3578 = vmatprep.subr.mxu1 %v1643_v49 }
 0x1f6   : > { %v4956_v23 = vrot.slane %v7165_v41, 1  ;;  %v7164_v55 = vmax.f32 %v4944_v2, 0.0  ;;  %v991_v0 = vadd.f32 %v990_v37, %v4820_v16  ;;  %3579 = vmatpush3.msra.mxu1 %v1627_v52  ;;  %v5081_v52 = vld [vmem:[%s7154_s9 + $0x38] sm:$0xff] }
 0x1f7   : > { %v994_v31 = vpop.f32.mrf.mxu0  ;;  %3580 = vmatprep.subr.mxu1 %v1642_v59 }
 0x1f8   : > { %v4974_v11 = vrot.slane %v7164_v55, 1  ;;  %v1116_v13 = vsel %vm542_vm0, %v4967_v9, %v4956_v23  ;;  %v1052_v32 = vmax.f32 %v991_v0, 0.0  ;;  %v995_v60 = vadd.f32 %v994_v31, %v4815_v62  ;;  %v1641_v31 = vld [vmem:[%s7148_s3 + $0xc8] sm:$0xff]  ;;  %3581 = vmatpush3.msra.mxu1 %v1626_v3  ;;  %v1624_v0 = vld [vmem:[%s7148_s3 + $0x40] sm:$0xff] }
 0x1f9   : > { %v996_v5 = vpop.f32.mrf.mxu0  ;;  %1173 = vrot.lane.b32.xlu1 %v4952_v35, %s4144_s28  ;;  %v5006_v26 = vmax.f32 %v1048_v40, %v1116_v13  ;;  %3582 = vmatprep.subr.mxu1 %v1641_v31 }
 0x1fa   : > { %v4977_v12 = vadd.f32 %v996_v5, %v4820_v16  ;;  %v1113_v36 = vsel %vm542_vm0, %v5001_v22, %v4974_v11  ;;  %v1625_v5 = vld [vmem:[%s7148_s3 + $0x48] sm:$0xff]  ;;  %v5054_v50 = vrot.slane %v1052_v32, 1  ;;  %v1053_v13 = vmax.f32 %v995_v60, 0.0 }
 0x1fb   : > { %v1000_v8 = vpop.f32.mrf.mxu0  ;;  %v5031_v40 = vmax.f32 %v1049_v1, %v1113_v36  ;;  %3583 = vmatpush3.msra.mxu1 %v1625_v5  ;;  %v1639_v36 = vld [vmem:[%s7148_s3 + $0xb8] sm:$0xff] }
 0x1fc   : > { %v7162_v29 = vmax.f32 %v4977_v12, 0.0  ;;  %v5010_v42 = vadd.f32 %v1000_v8, %v4815_v62  ;;  %v1640_v8 = vld [vmem:[%s7148_s3 + $0xc0] sm:$0xff]  ;;  %v5087_v59 = vrot.slane %v1053_v13, 1 }
 0x1fd   : > { %v1002_v20 = vpop.f32.mrf.mxu0  ;;  %1380 = vperm.xlu1 %3956, %v4995_v21   ;;  %3584 = vmatprep.subr.mxu1 %v1640_v8 }
 0x1fe   : > { %v5035_v63 = vrot.slane %v7162_v29, 1  ;;  %v7161_v6 = vmax.f32 %v5010_v42, 0.0  ;;  %3585 = vmatpush3.msra.mxu1 %v1624_v0  ;;  %v1003_v60 = vadd.f32 %v1002_v20, %v4820_v16  ;;  %v1622_v20 = vld [vmem:[%s7148_s3 + $0x30] sm:$0xff]  ;;  %v5162_v29 = vld [vmem:[%s7154_s9 + $0x48] sm:$0xff] }
 0x1ff   : > { %v5004_v25 = vpop.f32.mrf.mxu0  ;;  %3586 = vmatprep.subr.mxu1 %v1639_v36 }
 0x200   : > { %v5060_v10 = vrot.slane %v7161_v6, 1  ;;  %v1112_v51 = vsel %vm542_vm0, %v5054_v50, %v5035_v63  ;;  %3587 = vmatpush3.msra.mxu1 %v1623_v30  ;;  %v1056_v36 = vmax.f32 %v1003_v60, 0.0  ;;  %v1007_v30 = vadd.f32 %v5004_v25, %v4815_v62  ;;  %v1620_v60 = vld [vmem:[%s7148_s3 + $0x20] sm:$0xff] }
 0x201   : > { %v1008_v43 = vpop.f32.mrf.mxu0  ;;  %1207 = vrot.lane.b32.xlu1 %v5006_v26, %s4144_s28  ;;  %v5090_v3 = vmax.f32 %v1052_v32, %v1112_v51  ;;  %v1637_v32 = vld [vmem:[%s7148_s3 + $0xa8] sm:$0xff]  ;;  %v1636_v51 = vld [vmem:[%s7148_s3 + $0xa0] sm:$0xff] }
 0x202   : > { %v5063_v48 = vadd.f32 %v1008_v43, %v4820_v16  ;;  %v1638_v43 = vld [vmem:[%s7148_s3 + $0xb0] sm:$0xff]  ;;  %v1109_v0 = vsel %vm542_vm0, %v5087_v59, %v5060_v10 }
 0x203   : > { %v1012_v37 = vpop.f32.mrf.mxu0  ;;  %7182 = vst [vmem:[#allocation6_spill] sm:$0xff] %v5090_v3  ;;  %3588 = vmatprep.subr.mxu1 %v1638_v43  ;;  %v5118_v45 = vmax.f32 %v1053_v13, %v1109_v0  ;;  %v1635_v13 = vld [vmem:[%s7148_s3 + $0x98] sm:$0xff]  ;;  %v5134_v0 = vrot.slane %v1056_v36, 1 }
 0x204   : > { %v7160_v31 = vmax.f32 %v5063_v48, 0.0  ;;  %v5094_v5 = vadd.f32 %v1012_v37, %v4815_v62  ;;  %v1621_v37 = vld [vmem:[%s7148_s3 + $0x28] sm:$0xff]  ;;  %3589 = vmatpush3.msra.mxu1 %v1622_v20 }
 0x205   : > { %v5047_v1 = vpop.f32.mrf.mxu0  ;;  %1177 = vrot.lane.b32.xlu1 %v5031_v40, %s4144_s28  ;;  %3590 = vmatprep.subr.mxu1 %v1637_v32  ;;  %7183 = vst [vmem:[#allocation7_spill] sm:$0xff] %v5118_v45  ;;  %v1057_v32 = vmax.f32 %v1007_v30, 0.0 }
 0x206   : > { %3591 = vmatpush3.msra.mxu1 %v1621_v37  ;;  %v5122_v18 = vrot.slane %v7160_v31, 1  ;;  %v7163_v20 = vmax.f32 %v5094_v5, 0.0  ;;  %v1015_v55 = vadd.f32 %v5047_v1, %v4820_v16 }
 0x207   : > { %v5056_v15 = vpop.f32.mrf.mxu0  ;;  %3592 = vmatprep.subr.mxu1 %v1636_v51  ;;  %v1619_v51 = vld [vmem:[%s7148_s3 + $0x18] sm:$0xff] }
 0x208   : > { %3593 = vmatpush3.msra.mxu1 %v1620_v60  ;;  %v1634_v60 = vld [vmem:[%s7148_s3 + $0x90] sm:$0xff]  ;;  %v1108_v6 = vsel %vm542_vm0, %v5134_v0, %v5122_v18  ;;  %v5149_v30 = vrot.slane %v7163_v20, 1  ;;  %v5174_v20 = vrot.slane %v1057_v32, 1 }
 0x209   : > { %v1020_v49 = vpop.f32.mrf.mxu0  ;;  %1388 = vperm.xlu1 %3956, %v5081_v52   ;;  %3594 = vmatprep.subr.mxu1 %v1635_v13  ;;  %v5182_v38 = vmax.f32 %v1056_v36, %v1108_v6  ;;  %v1060_v36 = vmax.f32 %v1015_v55, 0.0 }
 0x20a   : > { %3595 = vmatpush3.msra.mxu1 %v1619_v51  ;;  %v5152_v13 = vadd.f32 %v1020_v49, %v4820_v16  ;;  %v1633_v49 = vld [vmem:[%s7148_s3 + $0x88] sm:$0xff]  ;;  %v1105_v39 = vsel %vm542_vm0, %v5174_v20, %v5149_v30 }
 0x20b   : > { %3596 = vmatprep.subr.mxu1 %v1634_v60  ;;  %v1617_v60 = vld [vmem:[%s7148_s3 + $0x8] sm:$0xff]  ;;  %v1092_v55 = vrot.slane %v1060_v36, 1 }
 0x20c   : > { %v1024_v8 = vpop.f32.mrf.mxu0 }
 0x20d   : > { %1211 = vrot.lane.b32.xlu1 %v5090_v3, %s4144_s28  ;;  %v5190_v3 = vadd.f32 %v1024_v8, %v4815_v62  ;;  %v1019_v8 = vadd.f32 %v5056_v15, %v4815_v62 }
 0x20e   : > { %v5116_v43 = vpop.f32.mrf.mxu0 }
 0x20f   : > { %v1061_v15 = vmax.f32 %v1019_v8, 0.0 }
 0x210   : > { %v1030_v4 = vpop.f32.mrf.mxu0 }
 0x211   : > { %v1031_v25 = vadd.f32 %v1030_v4, %v4815_v62  ;;  %1181 = vrot.lane.b32.xlu1 %v5118_v45, %s4144_s28  ;;  %v1062_v45 = vmax.f32 %v5152_v13, 0.0  ;;  %v1118_v62 = vsel %vm542_vm0, %v4914_v28, %v4967_v9  ;;  %v5237_v28 = vld [vmem:[%s7154_s9 + $0x58] sm:$0xff]  ;;  %v1115_v9 = vsel %vm542_vm0, %v4925_v58, %v5001_v22 }
 0x212   : > { %v1032_v37 = vpop.f32.mrf.mxu0  ;;  %v7185_v58 = vmax.f32 %v4904_v17, 0.0 }
 0x213   : > { %v1065_v31 = vmax.f32 %v1031_v25, 0.0  ;;  %v1033_v4 = vadd.f32 %v1032_v37, %v4820_v16  ;;  %v1618_v25 = vld [vmem:[%s7148_s3 + $0x10] sm:$0xff] }
 0x214   : > { %3597 = vmatpush3.msra.mxu1 %v1618_v25  ;;  %v5258_v22 = vmax.f32 %v7185_v58, %v1115_v9  ;;  %v5284_v9 = vld [vmem:[%s7154_s9 + $0x68] sm:$0xff]  ;;  %v1107_v58 = vsel %vm542_vm0, %v5060_v10, %v5174_v20  ;;  %v5339_v10 = vpop.permute.xlu1 %1360  ;;  %v5341_v20 = vpop.permute.xlu0 %1364 }
 0x215   : > { %v5157_v37 = vrot.slane %v1065_v31, 1  ;;  %v1066_v51 = vmax.f32 %v1033_v4, 0.0  ;;  %1396 = vperm.xlu1 %3956, %v5162_v29   ;;  %v1632_v4 = vld [vmem:[%s7148_s3 + $0x80] sm:$0xff]  ;;  %3598 = vmatprep.subr.mxu1 %v1633_v49  ;;  %v5210_v49 = vrot.slane %v1062_v45, 1 }
 0x216   : > { %3599 = vmatpush3.msra.mxu1 %v1617_v60  ;;  %v1063_v60 = vmax.f32 %v5190_v3, 0.0 }
 0x217   : > { %v1129_v25 = vsel %vm542_vm0, %v5157_v37, %v4850_v19  ;;  %v1098_v41 = vrot.slane %v1066_v51, 1  ;;  %3600 = vmatprep.subr.mxu1 %v1632_v4  ;;  %v1616_v19 = vld [vmem:[%s7148_s3] sm:$0xff] }
 0x218   : > { %v5192_v1 = vmax.f32 %v1065_v31, %v1129_v25  ;;  %3601 = vmatpush3.msra.mxu1 %v1616_v19  ;;  %v5206_v31 = vmax.f32 %v1057_v32, %v1105_v39  ;;  %v1104_v39 = vsel %vm542_vm0, %v1092_v55, %v5210_v49  ;;  %v5228_v32 = vrot.slane %v1063_v60, 1 }
 0x219   : > { %v1130_v6 = vsel %vm542_vm0, %v1098_v41, %v4853_v46  ;;  %1215 = vrot.lane.b32.xlu1 %v5182_v38, %s4144_s28  ;;  %v1093_v25 = vrot.slane %v1061_v15, 1  ;;  %v1027_v19 = vadd.f32 %v5116_v43, %v4820_v16 }
 0x21a   : > { %1193 = vrot.lane.b32.xlu0 %v5192_v1, %s4144_s28  ;;  %v5213_v46 = vmax.f32 %v1066_v51, %v1130_v6  ;;  %v7184_v51 = vmax.f32 %v4896_v24, 0.0  ;;  %v1711_v24 = vld [vmem:[%s7148_s3 + $0x2f8] sm:$0xff]  ;;  %v5251_v6 = vmax.f32 %v1060_v36, %v1104_v39  ;;  %v1114_v36 = vsel %vm542_vm0, %v4956_v23, %v5054_v50 }
 0x21b   : > { %3730 = vmatprep.subr.mxu1 %v1711_v24  ;;  %v1101_v8 = vsel %vm542_vm0, %v1093_v25, %v5228_v32  ;;  %v1064_v16 = vmax.f32 %v1027_v19, 0.0  ;;  %v1111_v23 = vsel %vm542_vm0, %v4974_v11, %v5087_v59  ;;  %v5306_v19 = vld [vmem:[%s7154_s9 + $0x78] sm:$0xff]  ;;  %v4051_v11 = vld [vmem:[%s7154_s9 + $0x40] sm:$0xff]  ;;  %v7188_v59 = vmax.f32 %v4977_v12, 0.0 }
 0x21c   : > { %v5232_v4 = vmax.f32 %v7184_v51, %v1118_v62  ;;  %v5264_v43 = vmax.f32 %v1061_v15, %v1101_v8  ;;  %v4048_v62 = vld [vmem:[%s7154_s9 + $0x30] sm:$0xff]  ;;  %v7186_v15 = vmax.f32 %v4936_v53, 0.0  ;;  %v7187_v53 = vmax.f32 %v4944_v2, 0.0 }
 0x21d   : > { %1185 = vrot.lane.b32.xlu1 %v5206_v31, %s4144_s28  ;;  %v1096_v17 = vrot.slane %v1064_v16, 1  ;;  %v1110_v2 = vsel %vm542_vm0, %v5035_v63, %v5134_v0  ;;  %v4145_v8 = vmov 3   ;;  %v4052_v63 = vld [vmem:[%s7154_s9 + $0x8] sm:$0xff]  ;;  %v7189_v12 = vmax.f32 %v5010_v42, 0.0  ;;  %v4054_v42 = vld [vmem:[%s7154_s9 + $0x20] sm:$0xff] }
 0x21e   : > { %1225 = vrot.lane.b32.xlu0 %v5213_v46, %s4144_s28  ;;  %v5279_v51 = vmax.f32 %v7186_v15, %v1114_v36  ;;  %v5297_v50 = vmax.f32 %v7187_v53, %v1111_v23  ;;  %v5318_v24 = vmax.f32 %v7188_v59, %v1110_v2  ;;  %v1106_v36 = vsel %vm542_vm0, %v5122_v18, %v1092_v55  ;;  %v5352_v15 = vpop.permute.xlu1 %1372  ;;  %v5361_v55 = vpop.permute.xlu0 %1368 }
 0x21f   : > { %v1100_v39 = vsel %vm542_vm0, %v1096_v17, %v1098_v41  ;;  %v5332_v0 = vmax.f32 %v7189_v12, %v1107_v58  ;;  %v7190_v23 = vmax.f32 %v5063_v48, 0.0  ;;  %v1103_v18 = vsel %vm542_vm0, %v5149_v30, %v1093_v25  ;;  %v4056_v25 = vld [vmem:[%s7154_s9 + $0x60] sm:$0xff] }
 0x220   : > { %v5293_v41 = vmax.f32 %v1064_v16, %v1100_v39  ;;  %v4053_v16 = vld [vmem:[%s7154_s9 + $0x10] sm:$0xff]  ;;  %v7191_v2 = vmax.f32 %v5094_v5, 0.0  ;;  %v7192_v58 = vlaneseq  ;;  %v1102_v30 = vsel %vm542_vm0, %v5210_v49, %v1096_v17 }
 0x221   : > { %1404 = vperm.xlu1 %3956, %v5237_v28   ;;  %v4055_v39 = vld [vmem:[%s7154_s9 + $0x50] sm:$0xff]  ;;  %v5356_v53 = vmax.f32 %v7190_v23, %v1106_v36  ;;  %v5395_v49 = vmax.f32 %v1062_v45, %v1102_v30  ;;  %v1099_v17 = vsel %vm542_vm0, %v5228_v32, %v5157_v37 }
 0x222   : > { %1205 = vrot.lane.b32.xlu0 %v5232_v4, %s4144_s28  ;;  %v5367_v59 = vmax.f32 %v7191_v2, %v1103_v18  ;;  %v5374_v12 = vpop.permute.xlu0 %1376  ;;  %v5412_v45 = vmax.f32 %v1063_v60, %v1099_v17  ;;  %v4058_v17 = vld [vmem:[%s7154_s9] sm:$0xff] }
 0x225   : > { %1219 = vrot.lane.b32.xlu1 %v5251_v6, %s4144_s28 }
 0x226   : > { %1175 = vrot.lane.b32.xlu0 %v5258_v22, %s4144_s28 }
 0x229   : > { %1189 = vrot.lane.b32.xlu1 %v5264_v43, %s4144_s28 }
 0x22a   : > { %1384 = vperm.xlu0 %3957, %v4048_v62  }
 0x22d   : > { %1412 = vperm.xlu1 %3956, %v5284_v9  }
 0x22e   : > { %1209 = vrot.lane.b32.xlu0 %v5279_v51, %s4144_s28 }
 0x231   : > { %1223 = vrot.lane.b32.xlu1 %v5293_v41, %s4144_s28 }
 0x232   : > { %1179 = vrot.lane.b32.xlu0 %v5297_v50, %s4144_s28 }
 0x235   : > { %1420 = vperm.xlu1 %3956, %v5306_v19  }
 0x236   : > { %1392 = vperm.xlu0 %3957, %v4051_v11  }
 0x239   : > { %3959 = vset.pattern.permute.xlu1 %v4145_v8 }
 0x23a   : > { %1525 = vperm.xlu1 %3959, %v4052_v63   ;;  %1213 = vrot.lane.b32.xlu0 %v5318_v24, %s4144_s28  ;;  %v5370_v63 = vand.u32 127, %v7192_v58  ;;  %v4057_v58 = vld [vmem:[%s7154_s9 + $0x70] sm:$0xff] }
 0x23c   : > { %vm1229_vm5 = vcmp.lt.s32.totalorder %v5370_v63, 112 }
 0x23e   : > { %1529 = vperm.xlu1 %3959, %v4053_v16   ;;  %1183 = vrot.lane.b32.xlu0 %v5332_v0, %s4144_s28 }
 0x242   : > { %1537 = vperm.xlu1 %3959, %v4054_v42   ;;  %1400 = vperm.xlu0 %3957, %v4055_v39  }
 0x246   : > { %1545 = vperm.xlu1 %3959, %v4048_v62   ;;  %1217 = vrot.lane.b32.xlu0 %v5356_v53, %s4144_s28 }
 0x24a   : > { %1553 = vperm.xlu1 %3959, %v4051_v11   ;;  %v1164_v48 = vpop.permute.xlu1 %1163  ;;  %1187 = vrot.lane.b32.xlu0 %v5367_v59, %s4144_s28 }
 0x24e   : > { %1561 = vperm.xlu1 %3959, %v4055_v39   ;;  %v1196_v5 = vpop.permute.xlu1 %1195  ;;  %1408 = vperm.xlu0 %3957, %v4056_v25   ;;  %v1166_v42 = vpop.permute.xlu0 %1165 }
 0x24f   : > { %v1230_v62 = vsel %vm1229_vm5, %v1164_v48, %v1196_v5  ;;  %v1246_v11 = vsel %vm1229_vm5, %v1196_v5, %v1164_v48 }
 0x250   : > { %v5388_v16 = vmax.f32 %v4859_v54, %v1230_v62  ;;  %v5391_v36 = vmax.f32 %v4868_v61, %v1246_v11 }
 0x252   : > { %1928 = vmatprep.mubr.f32.mxu0 %v5391_v36  ;;  %v1198_v39 = vpop.permute.xlu1 %1197  ;;  %1221 = vrot.lane.b32.xlu0 %v5395_v49, %s4144_s28  ;;  %v7175_v32 = vrot.slane %v5388_v16, 6  ;;  %v7171_v23 = vrot.slane %v5391_v36, 2  ;;  %v7176_v18 = vrot.slane %v5391_v36, 6  ;;  %v7170_v2 = vrot.slane %v5388_v16, 2 }
 0x253   : > { %v1231_v54 = vsel %vm1229_vm5, %v1166_v42, %v1198_v39  ;;  %v1247_v61 = vsel %vm1229_vm5, %v1198_v39, %v1166_v42  ;;  %1929 = vmatmul.mubr.f32.vlgmr.msra.gmra.mxu0 %v5388_v16  ;;  %1569 = vperm.xlu1 %3959, %v4056_v25  }
 0x254   : > { %v5415_v13 = vmax.f32 %v4878_v27, %v1247_v61  ;;  %v5418_v37 = vmax.f32 %v4870_v34, %v1231_v54 }
 0x256   : > { %1191 = vrot.lane.b32.xlu0 %v5412_v45, %s4144_s28  ;;  %v7174_v3 = vrot.slane %v5415_v13, 6  ;;  %v1458_v27 = vrot.slane %v5415_v13, 2  ;;  %1933 = vmatprep.mubr.f32.mxu0 %v5415_v13  ;;  %v7172_v34 = vrot.slane %v5418_v37, 6  ;;  %v1457_v60 = vrot.slane %v5418_v37, 2 }
 0x257   : > { %1934 = vmatmul.mubr.f32.gmra.mxu0 %v5418_v37  ;;  %1577 = vperm.xlu1 %3959, %v4057_v58  }
 0x258   : > { %v5442_v48 = vsel %vm1326_vm6, %v7176_v18, %v7174_v3  ;;  %v5450_v30 = vsel %vm1326_vm6, %v7175_v32, %v7172_v34  ;;  %v5456_v5 = vsel %vm1487_vm7, %v7170_v2, %v1457_v60  ;;  %v5462_v25 = vsel %vm1487_vm7, %v7171_v23, %v1458_v27  ;;  %v4059_v2 = vld [vmem:[%s7154_s9 + $0x18] sm:$0xff] }
 0x25a   : > { %1416 = vperm.xlu0 %3957, %v4057_v58  }
 0x25b   : > { %v1168_v62 = vpop.permute.xlu1 %1167 }
 0x25e   : > { %3958 = vset.pattern.permute.xlu0 %v4145_v8 }
 0x25f   : > { %v1200_v11 = vpop.permute.xlu1 %1199  ;;  %1521 = vperm.xlu0 %3958, %v4058_v17  }
 0x260   : > { %v1232_v42 = vsel %vm1229_vm5, %v1168_v62, %v1200_v11  ;;  %v1248_v39 = vsel %vm1229_vm5, %v1200_v11, %v1168_v62 }
 0x261   : > { %v1202_v54 = vpop.permute.xlu0 %1201  ;;  %v5473_v61 = vmax.f32 %v4898_v56, %v1248_v39  ;;  %v5476_v58 = vmax.f32 %v4888_v14, %v1232_v42 }
 0x263   : > { %v1170_v8 = vpop.permute.xlu1 %1169  ;;  %1533 = vperm.xlu0 %3958, %v4059_v2   ;;  %v1460_v17 = vrot.slane %v5473_v61, 2  ;;  %1938 = vmatprep.mubr.f32.mxu0 %v5473_v61  ;;  %v1459_v23 = vrot.slane %v5476_v58, 2  ;;  %v1299_v3 = vrot.slane %v5473_v61, 6 }
 0x264   : > { %v1233_v62 = vsel %vm1229_vm5, %v1170_v8, %v1202_v54  ;;  %v1249_v56 = vsel %vm1229_vm5, %v1202_v54, %v1170_v8  ;;  %1939 = vmatmul.mubr.f32.gmra.mxu0 %v5476_v58 }
 0x265   : > { %v5490_v14 = vmax.f32 %v4910_v47, %v1249_v56  ;;  %v5493_v11 = vmax.f32 %v4921_v57, %v1233_v62  ;;  %v5497_v2 = vsel %vm1487_vm7, %v1457_v60, %v1459_v23  ;;  %v5501_v42 = vsel %vm1487_vm7, %v1458_v27, %v1460_v17  ;;  %v1172_v39 = vpop.permute.xlu0 %1171 }
 0x267   : > { %v1204_v34 = vpop.permute.xlu1 %1203  ;;  %1541 = vperm.xlu0 %3958, %v4995_v21   ;;  %v1462_v54 = vrot.slane %v5490_v14, 2  ;;  %1943 = vmatprep.mubr.f32.mxu0 %v5490_v14  ;;  %v1461_v47 = vrot.slane %v5493_v11, 2 }
 0x268   : > { %v1234_v57 = vsel %vm1229_vm5, %v1172_v39, %v1204_v34  ;;  %v1250_v60 = vsel %vm1229_vm5, %v1204_v34, %v1172_v39  ;;  %1944 = vmatmul.mubr.f32.gmra.mxu0 %v5493_v11 }
 0x269   : > { %v5513_v27 = vmax.f32 %v4940_v33, %v1250_v60  ;;  %v5516_v8 = vmax.f32 %v4932_v44, %v1234_v57  ;;  %v5520_v21 = vsel %vm1487_vm7, %v1459_v23, %v1461_v47  ;;  %v5524_v62 = vsel %vm1487_vm7, %v1460_v17, %v1462_v54 }
 0x26b   : > { %1549 = vperm.xlu0 %3958, %v5081_v52   ;;  %v7173_v34 = vrot.slane %v5513_v27, 2  ;;  %1948 = vmatprep.mubr.f32.mxu0 %v5513_v27  ;;  %v1463_v33 = vrot.slane %v5516_v8, 2  ;;  %v1174_v52 = vpop.permute.xlu1 %1173 }
 0x26c   : > { %1949 = vmatmul.mubr.f32.gmra.mxu0 %v5516_v8 }
 0x26d   : > { %v5533_v44 = vsel %vm1487_vm7, %v1461_v47, %v1463_v33  ;;  %v5539_v23 = vsel %vm1487_vm7, %v1462_v54, %v7173_v34 }
 0x26f   : > { %1557 = vperm.xlu0 %3958, %v5162_v29  }
 0x273   : > { %1565 = vperm.xlu0 %3958, %v5237_v28  }
 0x277   : > { %1573 = vperm.xlu0 %3958, %v5284_v9  }
 0x278   : > { %v5545_v17 = vpop.permute.xlu1 %1380 }
 0x27b   : > { %1581 = vperm.xlu0 %3958, %v5306_v19  }
 0x27c   : > { %v1208_v56 = vpop.permute.xlu1 %1207 }
 0x280   : > { %v5547_v47 = vpop.permute.xlu1 %1177 }
 0x284   : > { %v5562_v32 = vpop.permute.xlu1 %1388 }
 0x28c   : > { %v1194_v39 = vpop.permute.xlu0 %1193 }
 0x290   : > { %v1226_v57 = vpop.permute.xlu0 %1225 }
 0x291   : > { %v1245_v54 = vsel %vm1229_vm5, %v1194_v39, %v1226_v57  ;;  %v1261_v29 = vsel %vm1229_vm5, %v1226_v57, %v1194_v39 }
 0x292   : > { %v5554_v28 = vmax.f32 %v5192_v1, %v1245_v54  ;;  %v5557_v9 = vmax.f32 %v5213_v46, %v1261_v29  ;;  %v7193_v46 = vrot.slane %v5391_v36, 6  ;;  %v7194_v54 = vrot.slane %v5388_v16, 6 }
 0x294   : > { %v7177_v19 = vrot.slane %v5554_v28, 6  ;;  %v1206_v60 = vpop.permute.xlu0 %1205  ;;  %v7178_v34 = vrot.slane %v5557_v9, 6 }
 0x295   : > { %v1235_v18 = vsel %vm1229_vm5, %v1174_v52, %v1206_v60  ;;  %v1251_v39 = vsel %vm1229_vm5, %v1206_v60, %v1174_v52 }
 0x296   : > { %v5569_v1 = vmax.f32 %v5232_v4, %v1251_v39  ;;  %v1358_v57 = vsel %vm1326_vm6, %v7178_v34, %v7193_v46  ;;  %v5578_v61 = vmax.f32 %v4952_v35, %v1235_v18  ;;  %v1357_v52 = vsel %vm1326_vm6, %v7177_v19, %v7194_v54  ;;  %v1695_v18 = vld [vmem:[%s7148_s3 + $0x278] sm:$0xff] }
 0x297   : > { %v1424_v4 = vmul.f32 %v5339_v10, %v1358_v57  ;;  %v1423_v29 = vmul.f32 %v5339_v10, %v1357_v52  ;;  %v1426_v35 = vmul.f32 %v5341_v20, %v5442_v48  ;;  %v1298_v46 = vrot.slane %v5476_v58, 6  ;;  %v1710_v48 = vld [vmem:[%s7148_s3 + $0x2f0] sm:$0xff] }
 0x298   : > { %1953 = vmatprep.mubr.f32.mxu0 %v5569_v1  ;;  %v1176_v60 = vpop.permute.xlu0 %1175  ;;  %v1465_v39 = vrot.slane %v5578_v61, 2  ;;  %v1466_v54 = vrot.slane %v5569_v1, 2  ;;  %v1301_v52 = vrot.slane %v5490_v14, 6  ;;  %v7195_v34 = vrot.slane %v5415_v13, 6 }
 0x299   : > { %v1236_v57 = vsel %vm1229_vm5, %v1176_v60, %v1208_v56  ;;  %v1252_v10 = vsel %vm1229_vm5, %v1208_v56, %v1176_v60  ;;  %1783 = vmatprep.mubr.f32.mxu1 %v1424_v4  ;;  %1954 = vmatmul.mubr.f32.gmra.mxu0 %v5578_v61  ;;  %v1694_v4 = vld [vmem:[%s7148_s3 + $0x270] sm:$0xff]  ;;  %v5619_v60 = vpop.permute.xlu1 %1211 }
 0x29a   : > { %1784 = vmatmul.mubr.f32.vlgmr.msra.gmra.mxu1 %v1423_v29  ;;  %v5607_v58 = vmax.f32 %v5006_v26, %v1252_v10  ;;  %v5610_v19 = vmax.f32 %v5258_v22, %v1236_v57  ;;  %v1354_v56 = vsel %vm1326_vm6, %v7195_v34, %v1299_v3  ;;  %v1709_v26 = vld [vmem:[%s7148_s3 + $0x2e8] sm:$0xff]  ;;  %v5626_v22 = vsel %vm1487_vm7, %v1463_v33, %v1465_v39 }
 0x29b   : > { %1788 = vmatprep.mubr.f32.mxu1 %v1426_v35  ;;  %3731 = vmatpush3.msra.mxu1 %v1695_v18  ;;  %v1425_v34 = vmul.f32 %v5341_v20, %v5450_v30  ;;  %v1693_v29 = vld [vmem:[%s7148_s3 + $0x268] sm:$0xff]  ;;  %v1300_v35 = vrot.slane %v5493_v11, 6  ;;  %v1428_v33 = vmul.f32 %v5361_v55, %v1354_v56  ;;  %v7196_v18 = vrot.slane %v5418_v37, 6  ;;  %v1708_v20 = vld [vmem:[%s7148_s3 + $0x2e0] sm:$0xff] }
 0x29c   : > { %v1468_v13 = vrot.slane %v5607_v58, 2  ;;  %1958 = vmatprep.mubr.f32.mxu0 %v5607_v58  ;;  %v1467_v14 = vrot.slane %v5610_v19, 2  ;;  %3732 = vmatprep.subr.mxu1 %v1710_v48  ;;  %v7197_v30 = vrot.slane %v5513_v27, 2  ;;  %v1303_v11 = vrot.slane %v5513_v27, 6  ;;  %v1692_v48 = vld [vmem:[%s7148_s3 + $0x260] sm:$0xff]  ;;  %v1707_v27 = vld [vmem:[%s7148_s3 + $0x2d8] sm:$0xff] }
 0x29d   : > { %1959 = vmatmul.mubr.f32.gmra.mxu0 %v5610_v19  ;;  %v1353_v57 = vsel %vm1326_vm6, %v7196_v18, %v1298_v46  ;;  %3733 = vmatpush3.msra.mxu1 %v1694_v4  ;;  %v1352_v37 = vsel %vm1326_vm6, %v1299_v3, %v1301_v52 }
 0x29e   : > { %v5650_v10 = vsel %vm1487_vm7, %v7197_v30, %v1466_v54  ;;  %1789 = vmatmul.mubr.f32.gmra.mxu1 %v1425_v34  ;;  %3734 = vmatprep.subr.mxu1 %v1709_v26  ;;  %v5662_v56 = vsel %vm1487_vm7, %v1465_v39, %v1467_v14  ;;  %v5671_v3 = vsel %vm1487_vm7, %v1466_v54, %v1468_v13  ;;  %v1691_v39 = vld [vmem:[%s7148_s3 + $0x258] sm:$0xff]  ;;  %v1302_v26 = vrot.slane %v5516_v8, 6  ;;  %v5678_v34 = vpop.permute.xlu1 %1181  ;;  %v1706_v54 = vld [vmem:[%s7148_s3 + $0x2d0] sm:$0xff] }
 0x29f   : > { %1793 = vmatprep.mubr.f32.mxu1 %v1428_v33  ;;  %3735 = vmatpush3.msra.mxu1 %v1693_v29  ;;  %v1427_v4 = vmul.f32 %v5361_v55, %v1353_v57  ;;  %v1430_v29 = vmul.f32 %v5352_v15, %v1352_v37  ;;  %v1351_v33 = vsel %vm1326_vm6, %v1298_v46, %v1300_v35  ;;  %v1305_v55 = vrot.slane %v5569_v1, 6  ;;  %v1690_v8 = vld [vmem:[%s7148_s3 + $0x250] sm:$0xff]  ;;  %v1705_v46 = vld [vmem:[%s7148_s3 + $0x2c8] sm:$0xff] }
 0x2a0   : > { %3736 = vmatprep.subr.mxu1 %v1708_v20  ;;  %v1350_v18 = vsel %vm1326_vm6, %v1301_v52, %v1303_v11  ;;  %v1429_v57 = vmul.f32 %v5352_v15, %v1351_v33  ;;  %v1689_v1 = vld [vmem:[%s7148_s3 + $0x248] sm:$0xff]  ;;  %v1304_v52 = vrot.slane %v5578_v61, 6  ;;  %v1349_v37 = vsel %vm1326_vm6, %v1300_v35, %v1302_v26  ;;  %v1688_v61 = vld [vmem:[%s7148_s3 + $0x240] sm:$0xff]  ;;  %v1703_v35 = vld [vmem:[%s7148_s3 + $0x2b8] sm:$0xff] }
 0x2a1   : > { %3737 = vmatpush3.msra.mxu1 %v1692_v48  ;;  %v1432_v30 = vmul.f32 %v5374_v12, %v1350_v18  ;;  %v1704_v48 = vld [vmem:[%s7148_s3 + $0x2c0] sm:$0xff]  ;;  %v1348_v15 = vsel %vm1326_vm6, %v1303_v11, %v1305_v55  ;;  %v1687_v11 = vld [vmem:[%s7148_s3 + $0x238] sm:$0xff]  ;;  %v1702_v18 = vld [vmem:[%s7148_s3 + $0x2b0] sm:$0xff] }
 0x2a2   : > { %1794 = vmatmul.mubr.f32.gmra.mxu1 %v1427_v4  ;;  %3738 = vmatprep.subr.mxu1 %v1707_v27  ;;  %v5711_v27 = vpop.permute.xlu1 %1396  ;;  %v1307_v4 = vrot.slane %v5607_v58, 6  ;;  %v1434_v33 = vmul.f32 %v5545_v17, %v1348_v15 }
 0x2a3   : > { %1798 = vmatprep.mubr.f32.mxu1 %v1430_v29  ;;  %3739 = vmatpush3.msra.mxu1 %v1691_v39  ;;  %v1431_v39 = vmul.f32 %v5374_v12, %v1349_v37 }
 0x2a4   : > { %3740 = vmatprep.subr.mxu1 %v1706_v54  ;;  %v1347_v54 = vsel %vm1326_vm6, %v1302_v26, %v1304_v52  ;;  %v1686_v26 = vld [vmem:[%s7148_s3 + $0x230] sm:$0xff] }
 0x2a5   : > { %v1385_v20 = vpop.permute.xlu0 %1384  ;;  %3741 = vmatpush3.msra.mxu1 %v1690_v8  ;;  %v1306_v8 = vrot.slane %v5610_v19, 6 }
 0x2a6   : > { %1799 = vmatmul.mubr.f32.gmra.mxu1 %v1429_v57  ;;  %3742 = vmatprep.subr.mxu1 %v1705_v46  ;;  %v1346_v57 = vsel %vm1326_vm6, %v1305_v55, %v1307_v4 }
 0x2a7   : > { %1803 = vmatprep.mubr.f32.mxu1 %v1432_v30  ;;  %3743 = vmatpush3.msra.mxu1 %v1689_v1  ;;  %v1436_v37 = vmul.f32 %v1385_v20, %v1346_v57  ;;  %v1699_v57 = vld [vmem:[%s7148_s3 + $0x298] sm:$0xff] }
 0x2a8   : > { %3744 = vmatprep.subr.mxu1 %v1704_v48  ;;  %v1433_v48 = vmul.f32 %v5545_v17, %v1347_v54 }
 0x2a9   : > { %v1210_v29 = vpop.permute.xlu0 %1209  ;;  %3745 = vmatpush3.msra.mxu1 %v1688_v61 }
 0x2aa   : > { %v1237_v12 = vsel %vm1229_vm5, %v5547_v47, %v1210_v29  ;;  %v1253_v46 = vsel %vm1229_vm5, %v1210_v29, %v5547_v47  ;;  %1804 = vmatmul.mubr.f32.gmra.mxu1 %v1431_v39  ;;  %3746 = vmatprep.subr.mxu1 %v1703_v35  ;;  %v5742_v47 = vpop.permute.xlu1 %1215 }
 0x2ab   : > { %1808 = vmatprep.mubr.f32.mxu1 %v1434_v33  ;;  %v1277_v1 = vmax.f32 %v5279_v51, %v1253_v46  ;;  %v1276_v30 = vmax.f32 %v5031_v40, %v1237_v12  ;;  %3747 = vmatpush3.msra.mxu1 %v1687_v11  ;;  %v1701_v51 = vld [vmem:[%s7148_s3 + $0x2a8] sm:$0xff]  ;;  %v1345_v40 = vsel %vm1326_vm6, %v1304_v52, %v1306_v8 }
 0x2ac   : > { %3748 = vmatprep.subr.mxu1 %v1702_v18  ;;  %v1685_v11 = vld [vmem:[%s7148_s3 + $0x228] sm:$0xff]  ;;  %v1435_v33 = vmul.f32 %v1385_v20, %v1345_v40 }
 0x2ad   : > { %v1309_v15 = vrot.slane %v1277_v1, 6  ;;  %v1470_v61 = vrot.slane %v1277_v1, 2  ;;  %1963 = vmatprep.mubr.f32.mxu0 %v1277_v1  ;;  %v1180_v35 = vpop.permute.xlu0 %1179  ;;  %v1308_v39 = vrot.slane %v1276_v30, 6  ;;  %v1469_v29 = vrot.slane %v1276_v30, 2  ;;  %3749 = vmatpush3.msra.mxu1 %v1686_v26  ;;  %v7198_v52 = vld [vmem:[#allocation6_spill] sm:$0xff] }
 0x2ae   : > { %v1238_v17 = vsel %vm1229_vm5, %v1180_v35, %v5619_v60  ;;  %v1254_v55 = vsel %vm1229_vm5, %v5619_v60, %v1180_v35  ;;  %1809 = vmatmul.mubr.f32.gmra.mxu1 %v1433_v48  ;;  %1964 = vmatmul.mubr.f32.gmra.mxu0 %v1276_v30  ;;  %v5796_v1 = vpop.permute.xlu1 %1185 }
 0x2af   : > { %v5759_v54 = vmax.f32 %v5297_v50, %v1238_v17  ;;  %1813 = vmatprep.mubr.f32.mxu1 %v1436_v37  ;;  %v5762_v18 = vmax.f32 %v7198_v52, %v1254_v55  ;;  %v1344_v12 = vsel %vm1326_vm6, %v1307_v4, %v1309_v15  ;;  %v1343_v60 = vsel %vm1326_vm6, %v1306_v8, %v1308_v39  ;;  %v1700_v4 = vld [vmem:[%s7148_s3 + $0x2a0] sm:$0xff] }
 0x2b0   : > { %v1438_v46 = vmul.f32 %v5562_v32, %v1344_v12  ;;  %v5773_v20 = vsel %vm1487_vm7, %v1467_v14, %v1469_v29  ;;  %v5779_v50 = vsel %vm1487_vm7, %v1468_v13, %v1470_v61  ;;  %3750 = vmatprep.subr.mxu1 %v1701_v51  ;;  %v1684_v13 = vld [vmem:[%s7148_s3 + $0x220] sm:$0xff]  ;;  %v1437_v35 = vmul.f32 %v5562_v32, %v1343_v60  ;;  %v1683_v51 = vld [vmem:[%s7148_s3 + $0x218] sm:$0xff] }
 0x2b1   : > { %v1311_v26 = vrot.slane %v5762_v18, 6  ;;  %v1472_v8 = vrot.slane %v5762_v18, 2  ;;  %1968 = vmatprep.mubr.f32.mxu0 %v5762_v18  ;;  %v1310_v19 = vrot.slane %v5759_v54, 6  ;;  %v1393_v14 = vpop.permute.xlu0 %1392  ;;  %v1471_v58 = vrot.slane %v5759_v54, 2  ;;  %3751 = vmatpush3.msra.mxu1 %v1685_v11  ;;  %v7199_v11 = vld [vmem:[#allocation7_spill] sm:$0xff] }
 0x2b2   : > { %1814 = vmatmul.mubr.f32.gmra.mxu1 %v1435_v33  ;;  %1969 = vmatmul.mubr.f32.gmra.mxu0 %v5759_v54  ;;  %v5828_v52 = vpop.permute.xlu1 %1404 }
 0x2b3   : > { %v1342_v30 = vsel %vm1326_vm6, %v1309_v15, %v1311_v26  ;;  %1818 = vmatprep.mubr.f32.mxu1 %v1438_v46  ;;  %3752 = vmatprep.subr.mxu1 %v1700_v4  ;;  %v5802_v37 = vsel %vm1487_vm7, %v1469_v29, %v1471_v58  ;;  %v5810_v40 = vsel %vm1487_vm7, %v1470_v61, %v1472_v8  ;;  %v1698_v29 = vld [vmem:[%s7148_s3 + $0x290] sm:$0xff]  ;;  %v1697_v4 = vld [vmem:[%s7148_s3 + $0x288] sm:$0xff] }
 0x2b4   : > { %v1440_v48 = vmul.f32 %v1393_v14, %v1342_v30  ;;  %3753 = vmatpush3.msra.mxu1 %v1684_v13  ;;  %v1341_v15 = vsel %vm1326_vm6, %v1308_v39, %v1310_v19  ;;  %v1682_v61 = vld [vmem:[%s7148_s3 + $0x210] sm:$0xff]  ;;  %v1681_v13 = vld [vmem:[%s7148_s3 + $0x208] sm:$0xff] }
 0x2b5   : > { %v1214_v17 = vpop.permute.xlu0 %1213  ;;  %3754 = vmatprep.subr.mxu1 %v1699_v57  ;;  %v1439_v54 = vmul.f32 %v1393_v14, %v1341_v15 }
 0x2b6   : > { %v1239_v32 = vsel %vm1229_vm5, %v5678_v34, %v1214_v17  ;;  %v1255_v55 = vsel %vm1229_vm5, %v1214_v17, %v5678_v34  ;;  %1819 = vmatmul.mubr.f32.gmra.mxu1 %v1437_v35 }
 0x2b7   : > { %1823 = vmatprep.mubr.f32.mxu1 %v1440_v48  ;;  %v1281_v39 = vmax.f32 %v5318_v24, %v1255_v55  ;;  %v1280_v33 = vmax.f32 %v7199_v11, %v1239_v32  ;;  %3755 = vmatpush3.msra.mxu1 %v1683_v51 }
 0x2b8   : > { %3756 = vmatprep.subr.mxu1 %v1698_v29 }
 0x2b9   : > { %v1313_v18 = vrot.slane %v1281_v39, 6  ;;  %v1474_v12 = vrot.slane %v1281_v39, 2  ;;  %1973 = vmatprep.mubr.f32.mxu0 %v1281_v39  ;;  %v1184_v46 = vpop.permute.xlu0 %1183  ;;  %v1312_v34 = vrot.slane %v1280_v33, 6  ;;  %v1473_v60 = vrot.slane %v1280_v33, 2  ;;  %3757 = vmatpush3.msra.mxu1 %v1682_v61 }
 0x2ba   : > { %v1240_v24 = vsel %vm1229_vm5, %v1184_v46, %v5742_v47  ;;  %v1256_v14 = vsel %vm1229_vm5, %v5742_v47, %v1184_v46  ;;  %1824 = vmatmul.mubr.f32.gmra.mxu1 %v1439_v54  ;;  %1974 = vmatmul.mubr.f32.gmra.mxu0 %v1280_v33  ;;  %v1696_v47 = vld [vmem:[%s7148_s3 + $0x280] sm:$0xff] }
 0x2bb   : > { %v1282_v57 = vmax.f32 %v5332_v0, %v1240_v24  ;;  %v1283_v30 = vmax.f32 %v5182_v38, %v1256_v14  ;;  %v1340_v48 = vsel %vm1326_vm6, %v1311_v26, %v1313_v18  ;;  %v1339_v35 = vsel %vm1326_vm6, %v1310_v19, %v1312_v34  ;;  %3758 = vmatprep.subr.mxu1 %v1697_v4 }
 0x2bc   : > { %v1442_v51 = vmul.f32 %v5711_v27, %v1340_v48  ;;  %v1441_v15 = vmul.f32 %v5711_v27, %v1339_v35  ;;  %v5855_v0 = vsel %vm1487_vm7, %v1471_v58, %v1473_v60  ;;  %v5859_v38 = vsel %vm1487_vm7, %v1472_v8, %v1474_v12  ;;  %3759 = vmatpush3.msra.mxu1 %v1681_v13  ;;  %v1680_v27 = vld [vmem:[%s7148_s3 + $0x200] sm:$0xff]  ;;  %v1220_v58 = vpop.permute.xlu1 %1219 }
 0x2bd   : > { %v1315_v26 = vrot.slane %v1283_v30, 6  ;;  %v1476_v17 = vrot.slane %v1283_v30, 2  ;;  %1978 = vmatprep.mubr.f32.mxu0 %v1283_v30  ;;  %v1314_v19 = vrot.slane %v1282_v57, 6  ;;  %v1401_v29 = vpop.permute.xlu0 %1400  ;;  %v1475_v32 = vrot.slane %v1282_v57, 2  ;;  %3760 = vmatprep.subr.mxu1 %v1696_v47 }
 0x2be   : > { %1828 = vmatprep.mubr.f32.mxu1 %v1442_v51  ;;  %1979 = vmatmul.mubr.f32.gmra.mxu0 %v1282_v57 }
 0x2bf   : > { %v1337_v55 = vsel %vm1326_vm6, %v1312_v34, %v1314_v19  ;;  %v1338_v8 = vsel %vm1326_vm6, %v1313_v18, %v1315_v26  ;;  %1829 = vmatmul.mubr.f32.gmra.mxu1 %v1441_v15  ;;  %v5870_v61 = vsel %vm1487_vm7, %v1473_v60, %v1475_v32  ;;  %v5874_v33 = vsel %vm1487_vm7, %v1474_v12, %v1476_v17 }
 0x2c0   : > { %v1443_v39 = vmul.f32 %v1401_v29, %v1337_v55  ;;  %v1444_v11 = vmul.f32 %v1401_v29, %v1338_v8  ;;  %3761 = vmatpush3.msra.mxu1 %v1680_v27  ;;  %v1190_v4 = vpop.permute.xlu1 %1189 }
 0x2c1   : > { %v1218_v54 = vpop.permute.xlu0 %1217 }
 0x2c2   : > { %v1241_v46 = vsel %vm1229_vm5, %v5796_v1, %v1218_v54  ;;  %v1257_v18 = vsel %vm1229_vm5, %v1218_v54, %v5796_v1  ;;  %1833 = vmatprep.mubr.f32.mxu1 %v1444_v11 }
 0x2c3   : > { %1834 = vmatmul.mubr.f32.gmra.mxu1 %v1443_v39  ;;  %v1285_v34 = vmax.f32 %v5356_v53, %v1257_v18  ;;  %v1284_v60 = vmax.f32 %v5206_v31, %v1241_v46 }
 0x2c4   : > { %v1413_v27 = vpop.permute.xlu1 %1412 }
 0x2c5   : > { %v1317_v24 = vrot.slane %v1285_v34, 6  ;;  %v1478_v14 = vrot.slane %v1285_v34, 2  ;;  %1983 = vmatprep.mubr.f32.mxu0 %v1285_v34  ;;  %v1188_v12 = vpop.permute.xlu0 %1187  ;;  %v1316_v13 = vrot.slane %v1284_v60, 6  ;;  %v1477_v57 = vrot.slane %v1284_v60, 2 }
 0x2c6   : > { %v1242_v30 = vsel %vm1229_vm5, %v1188_v12, %v1220_v58  ;;  %v1258_v48 = vsel %vm1229_vm5, %v1220_v58, %v1188_v12  ;;  %1984 = vmatmul.mubr.f32.gmra.mxu0 %v1284_v60 }
 0x2c7   : > { %v5889_v1 = vmax.f32 %v5367_v59, %v1242_v30  ;;  %v5893_v31 = vsel %vm1487_vm7, %v1475_v32, %v1477_v57  ;;  %v5897_v53 = vsel %vm1487_vm7, %v1476_v17, %v1478_v14  ;;  %v5900_v35 = vmax.f32 %v5251_v6, %v1258_v48 }
 0x2c8   : > { %v1336_v47 = vsel %vm1326_vm6, %v1315_v26, %v1317_v24  ;;  %v1335_v51 = vsel %vm1326_vm6, %v1314_v19, %v1316_v13  ;;  %v1224_v60 = vpop.permute.xlu1 %1223 }
 0x2c9   : > { %v1319_v59 = vrot.slane %v5900_v35, 6  ;;  %v1480_v15 = vrot.slane %v5900_v35, 2  ;;  %1988 = vmatprep.mubr.f32.mxu0 %v5900_v35  ;;  %v1318_v29 = vrot.slane %v5889_v1, 6  ;;  %v1409_v32 = vpop.permute.xlu0 %1408  ;;  %v1446_v17 = vmul.f32 %v5828_v52, %v1336_v47 }
 0x2ca   : > { %1989 = vmatmul.mubr.f32.gmra.mxu0 %v5889_v1  ;;  %v1445_v6 = vmul.f32 %v5828_v52, %v1335_v51  ;;  %v1479_v26 = vrot.slane %v5889_v1, 2 }
 0x2cb   : > { %v1333_v19 = vsel %vm1326_vm6, %v1316_v13, %v1318_v29  ;;  %v1334_v58 = vsel %vm1326_vm6, %v1317_v24, %v1319_v59  ;;  %1838 = vmatprep.mubr.f32.mxu1 %v1446_v17  ;;  %v5922_v55 = vsel %vm1487_vm7, %v1478_v14, %v1480_v15 }
 0x2cc   : > { %v1447_v8 = vmul.f32 %v1409_v32, %v1333_v19  ;;  %v1448_v39 = vmul.f32 %v1409_v32, %v1334_v58  ;;  %1839 = vmatmul.mubr.f32.gmra.mxu1 %v1445_v6  ;;  %v5928_v52 = vsel %vm1487_vm7, %v1477_v57, %v1479_v26  ;;  %v7200_v6 = vrot.slane %v5557_v9, 6 }
 0x2cd   : > { %v1222_v11 = vpop.permute.xlu0 %1221  ;;  %v7201_v58 = vrot.slane %v5554_v28, 6 }
 0x2ce   : > { %v1243_v54 = vsel %vm1229_vm5, %v1190_v4, %v1222_v11  ;;  %v1259_v46 = vsel %vm1229_vm5, %v1222_v11, %v1190_v4  ;;  %1843 = vmatprep.mubr.f32.mxu1 %v1448_v39  ;;  %v7202_v39 = vmov 0.0  }
 0x2cf   : > { %v5935_v18 = vmax.f32 %v5395_v49, %v1259_v46  ;;  %v5938_v34 = vmax.f32 %v5264_v43, %v1243_v54 }
 0x2d0   : > { %1844 = vmatmul.mubr.f32.gmra.mxu1 %v1447_v8 }
 0x2d1   : > { %v1321_v24 = vrot.slane %v5935_v18, 6  ;;  %1993 = vmatprep.mubr.f32.mxu0 %v5935_v18  ;;  %v1192_v14 = vpop.permute.xlu0 %1191  ;;  %v1320_v12 = vrot.slane %v5938_v34, 6 }
 0x2d2   : > { %v1244_v13 = vsel %vm1229_vm5, %v1192_v14, %v1224_v60  ;;  %v1260_v4 = vsel %vm1229_vm5, %v1224_v60, %v1192_v14  ;;  %1994 = vmatmul.mubr.f32.gmra.mxu0 %v5938_v34 }
 0x2d3   : > { %v5949_v43 = vmax.f32 %v5412_v45, %v1244_v13  ;;  %v5952_v49 = vmax.f32 %v5293_v41, %v1260_v4  ;;  %v1332_v57 = vsel %vm1326_vm6, %v1319_v59, %v1321_v24  ;;  %v1331_v30 = vsel %vm1326_vm6, %v1318_v29, %v1320_v12  ;;  %v1421_v29 = vpop.permute.xlu1 %1420 }
 0x2d4   : > { %v1450_v47 = vmul.f32 %v1413_v27, %v1332_v57  ;;  %v1449_v45 = vmul.f32 %v1413_v27, %v1331_v30 }
 0x2d5   : > { %v1323_v48 = vrot.slane %v5952_v49, 6  ;;  %1998 = vmatprep.mubr.f32.mxu0 %v5952_v49  ;;  %v1322_v63 = vrot.slane %v5949_v43, 6  ;;  %v1417_v51 = vpop.permute.xlu0 %1416 }
 0x2d6   : > { %1999 = vmatmul.mubr.f32.gmra.mxu0 %v5949_v43  ;;  %1848 = vmatprep.mubr.f32.mxu1 %v1450_v47 }
 0x2d7   : > { %v1329_v41 = vsel %vm1326_vm6, %v1320_v12, %v1322_v63  ;;  %v1330_v59 = vsel %vm1326_vm6, %v1321_v24, %v1323_v48  ;;  %2003 = vmatprep.mubr.f32.mxu0 %v5557_v9  ;;  %1849 = vmatmul.mubr.f32.gmra.mxu1 %v1449_v45  ;;  %v1328_v19 = vsel %vm1326_vm6, %v1323_v48, %v7200_v6  ;;  %v1526_v54 = vpop.permute.xlu1 %1525 }
 0x2d8   : > { %v1451_v32 = vmul.f32 %v1417_v51, %v1329_v41  ;;  %v1452_v17 = vmul.f32 %v1417_v51, %v1330_v59  ;;  %v1454_v27 = vmul.f32 %v1421_v29, %v1328_v19  ;;  %v1327_v8 = vsel %vm1326_vm6, %v1322_v63, %v7201_v58 }
 0x2d9   : > { %v1453_v46 = vmul.f32 %v1421_v29, %v1327_v8  ;;  %v1587_v14 = vmul.f32 %v1526_v54, %v5501_v42  ;;  %v1586_v13 = vmul.f32 %v1526_v54, %v5497_v2  ;;  %v1482_v29 = vrot.slane %v5935_v18, 2 }
 0x2da   : > { %1853 = vmatprep.mubr.f32.mxu1 %v1452_v17  ;;  %2004 = vmatmul.mubr.f32.gmra.mxu0 %v5554_v28  ;;  %v1522_v11 = vpop.permute.xlu0 %1521 }
 0x2db   : > { %2515 = vmatprep.mubr.f32.mxu0 %v7202_v39  ;;  %1854 = vmatmul.mubr.f32.gmra.mxu1 %v1451_v32  ;;  %v1585_v60 = vmul.f32 %v1522_v11, %v5462_v25  ;;  %v1584_v24 = vmul.f32 %v1522_v11, %v5456_v5  ;;  %v1530_v12 = vpop.permute.xlu1 %1529  ;;  %v7203_v11 = vrot.slane %v5391_v36, 2 }
 0x2dc   : > { %1858 = vmatprep.mubr.f32.mxu1 %v1454_v27  ;;  %v1589_v4 = vmul.f32 %v1530_v12, %v5524_v62  ;;  %v1588_v30 = vmul.f32 %v1530_v12, %v5520_v21 }
 0x2de   : > { %v1534_v57 = vpop.permute.xlu0 %1533 }
 0x2df   : > { %1859 = vmatmul.mubr.f32.gmra.mxu1 %v1453_v46  ;;  %v1591_v25 = vmul.f32 %v1534_v57, %v5539_v23  ;;  %v1538_v48 = vpop.permute.xlu1 %1537  ;;  %v1590_v5 = vmul.f32 %v1534_v57, %v5533_v44 }
 0x2e0   : > { %2073 = vmatprep.mubr.f32.mxu1 %v1585_v60  ;;  %v1593_v42 = vmul.f32 %v1538_v48, %v5650_v10  ;;  %v1592_v2 = vmul.f32 %v1538_v48, %v5626_v22 }
 0x2e2   : > { %v1542_v63 = vpop.permute.xlu0 %1541 }
 0x2e3   : > { %2074 = vmatmul.mubr.f32.vlgmr.msra.gmra.mxu1 %v1584_v24  ;;  %v1595_v62 = vmul.f32 %v1542_v63, %v5671_v3  ;;  %v1546_v47 = vpop.permute.xlu1 %1545  ;;  %v1594_v21 = vmul.f32 %v1542_v63, %v5662_v56 }
 0x2e4   : > { %2078 = vmatprep.mubr.f32.mxu1 %v1587_v14  ;;  %v1597_v23 = vmul.f32 %v1546_v47, %v5779_v50  ;;  %v1596_v44 = vmul.f32 %v1546_v47, %v5773_v20 }
 0x2e6   : > { %v1550_v51 = vpop.permute.xlu0 %1549 }
 0x2e7   : > { %2079 = vmatmul.mubr.f32.gmra.mxu1 %v1586_v13  ;;  %v1599_v10 = vmul.f32 %v1550_v51, %v5810_v40  ;;  %v1554_v45 = vpop.permute.xlu1 %1553  ;;  %v1598_v22 = vmul.f32 %v1550_v51, %v5802_v37 }
 0x2e8   : > { %2083 = vmatprep.mubr.f32.mxu1 %v1589_v4  ;;  %v1601_v3 = vmul.f32 %v1554_v45, %v5859_v38  ;;  %v1600_v56 = vmul.f32 %v1554_v45, %v5855_v0  ;;  %v1481_v38 = vrot.slane %v5938_v34, 2 }
 0x2ea   : > { %v1558_v41 = vpop.permute.xlu0 %1557 }
 0x2eb   : > { %2084 = vmatmul.mubr.f32.gmra.mxu1 %v1588_v30  ;;  %v1603_v50 = vmul.f32 %v1558_v41, %v5874_v33  ;;  %v1562_v59 = vpop.permute.xlu1 %1561  ;;  %v1602_v20 = vmul.f32 %v1558_v41, %v5870_v61  ;;  %v1493_v33 = vsel %vm1487_vm7, %v1480_v15, %v1482_v29  ;;  %v1484_v61 = vrot.slane %v5952_v49, 2 }
 0x2ec   : > { %2088 = vmatprep.mubr.f32.mxu1 %v1591_v25  ;;  %v1605_v40 = vmul.f32 %v1562_v59, %v5897_v53  ;;  %v1604_v37 = vmul.f32 %v1562_v59, %v5893_v31  ;;  %v1492_v31 = vsel %vm1487_vm7, %v1479_v26, %v1481_v38  ;;  %v1486_v15 = vrot.slane %v5557_v9, 2 }
 0x2ed   : > { %v1491_v6 = vsel %vm1487_vm7, %v1482_v29, %v1484_v61  ;;  %v1485_v26 = vrot.slane %v5554_v28, 2  ;;  %v7204_v28 = vrot.slane %v5388_v16, 2 }
 0x2ee   : > { %v1566_v32 = vpop.permute.xlu0 %1565  ;;  %v1489_v1 = vsel %vm1487_vm7, %v1484_v61, %v1486_v15  ;;  %v1519_v54 = vsel %vm1487_vm7, %v1486_v15, %v7203_v11 }
 0x2ef   : > { %2089 = vmatmul.mubr.f32.gmra.mxu1 %v1590_v5  ;;  %v1607_v0 = vmul.f32 %v1566_v32, %v5922_v55  ;;  %v1570_v17 = vpop.permute.xlu1 %1569  ;;  %v1606_v53 = vmul.f32 %v1566_v32, %v5928_v52  ;;  %v1483_v55 = vrot.slane %v5949_v43, 2  ;;  %v1518_v60 = vsel %vm1487_vm7, %v1485_v26, %v7204_v28 }
 0x2f0   : > { %2093 = vmatprep.mubr.f32.mxu1 %v1593_v42  ;;  %v1609_v18 = vmul.f32 %v1570_v17, %v1493_v33  ;;  %v1608_v35 = vmul.f32 %v1570_v17, %v1492_v31 }
 0x2f1   : > { %v1490_v52 = vsel %vm1487_vm7, %v1481_v38, %v1483_v55  ;;  %v1488_v27 = vsel %vm1487_vm7, %v1483_v55, %v1485_v26 }
 0x2f2   : > { %v1574_v34 = vpop.permute.xlu0 %1573 }
 0x2f3   : > { %2094 = vmatmul.mubr.f32.gmra.mxu1 %v1592_v2  ;;  %v1611_v49 = vmul.f32 %v1574_v34, %v1491_v6  ;;  %v1578_v19 = vpop.permute.xlu1 %1577  ;;  %v1610_v43 = vmul.f32 %v1574_v34, %v1490_v52  ;;  %v6088_v6 = vld [vmem:[%s7149_s4] ss:$0 sm:$0xff] }
 0x2f4   : > { %2098 = vmatprep.mubr.f32.mxu1 %v1595_v62  ;;  %v1613_v9 = vmul.f32 %v1578_v19, %v1489_v1  ;;  %v1612_v8 = vmul.f32 %v1578_v19, %v1488_v27 }
 0x2f6   : > { %v1582_v58 = vpop.permute.xlu0 %1581 }
 0x2f7   : > { %2099 = vmatmul.mubr.f32.gmra.mxu1 %v1594_v21  ;;  %v1615_v46 = vmul.f32 %v1582_v58, %v1519_v54  ;;  %v1614_v24 = vmul.f32 %v1582_v58, %v1518_v60 }
 0x2f8   : > { %2103 = vmatprep.mubr.f32.mxu1 %v1597_v23 }
 0x2fb   : > { %2104 = vmatmul.mubr.f32.gmra.mxu1 %v1596_v44 }
 0x2fc   : > { %2108 = vmatprep.mubr.f32.mxu1 %v1599_v10 }
 0x2ff   : > { %2109 = vmatmul.mubr.f32.gmra.mxu1 %v1598_v22 }
 0x300   : > { %2113 = vmatprep.mubr.f32.mxu1 %v1601_v3 }
 0x303   : > { %2114 = vmatmul.mubr.f32.gmra.mxu1 %v1600_v56 }
 0x304   : > { %2118 = vmatprep.mubr.f32.mxu1 %v1603_v50 }
 0x307   : > { %2119 = vmatmul.mubr.f32.gmra.mxu1 %v1602_v20 }
 0x308   : > { %2123 = vmatprep.mubr.f32.mxu1 %v1605_v40 }
 0x30b   : > { %2124 = vmatmul.mubr.f32.gmra.mxu1 %v1604_v37 }
 0x30c   : > { %2128 = vmatprep.mubr.f32.mxu1 %v1607_v0 }
 0x30f   : > { %2129 = vmatmul.mubr.f32.gmra.mxu1 %v1606_v53 }
 0x310   : > { %2133 = vmatprep.mubr.f32.mxu1 %v1609_v18 }
 0x313   : > { %2134 = vmatmul.mubr.f32.gmra.mxu1 %v1608_v35  ;;  %v3682_v16 = vpop.f32.mrf.mxu0 }
 0x314   : > { %2138 = vmatprep.mubr.f32.mxu1 %v1611_v49 }
 0x315   : > { %v3683_v62 = vpop.f32.mrf.mxu0 }
 0x317   : > { %2139 = vmatmul.mubr.f32.gmra.mxu1 %v1610_v43  ;;  %v3685_v23 = vpop.f32.mrf.mxu0 }
 0x318   : > { %2143 = vmatprep.mubr.f32.mxu1 %v1613_v9  ;;  %v3684_v9 = vadd.f32 %v3683_v62, %v3682_v16 }
 0x319   : > { %v3686_v10 = vpop.f32.mrf.mxu0 }
 0x31b   : > { %2144 = vmatmul.mubr.f32.gmra.mxu1 %v1612_v8 }
 0x31c   : > { %2148 = vmatprep.mubr.f32.mxu1 %v1615_v46 }
 0x31f   : > { %2149 = vmatmul.mubr.f32.gmra.mxu1 %v1614_v24  ;;  %v3687_v24 = vadd.f32 %v3686_v10, %v3685_v23 }
 0x324   : > { %v3688_v22 = vpop.f32.mrf.mxu0 }
 0x326   : > { %v3689_v56 = vpop.f32.mrf.mxu0 }
 0x327   : > { %v3690_v62 = vadd.f32 %v3689_v56, %v3688_v22 }
 0x328   : > { %v3691_v59 = vpop.f32.mrf.mxu0 }
 0x32a   : > { %v3692_v40 = vpop.f32.mrf.mxu0 }
 0x32c   : > { %v6059_v32 = vpop.f32.mrf.mxu0 }
 0x32e   : > { %v3695_v0 = vpop.f32.mrf.mxu0 }
 0x359   : > { %v6065_v17 = vpop.f32.mrf.mxu0 }
 0x35a   : > { %v3602_v14 = vpop.f32.mrf.mxu1 }
 0x35b   : > { %v6069_v61 = vpop.f32.mrf.mxu0 }
 0x35c   : > { %v3603_v12 = vpop.f32.mrf.mxu1 }
 0x35d   : > { %v3604_v13 = vadd.f32 %v3603_v12, %v3602_v14  ;;  %v6075_v18 = vpop.f32.mrf.mxu0 }
 0x35e   : > { %v3605_v4 = vpop.f32.mrf.mxu1 }
 0x35f   : > { %v6081_v35 = vpop.f32.mrf.mxu0  ;;  %v1786_v26 = vadd.f32 %v3604_v13, %v6088_v6 }
 0x360   : > { %v3606_v57 = vpop.f32.mrf.mxu1 }
 0x361   : > { %v3607_v52 = vadd.f32 %v3606_v57, %v3605_v4  ;;  %v1931_v54 = vadd.f32 %v3684_v9, %v1786_v26 }
 0x362   : > { %v3608_v30 = vpop.f32.mrf.mxu1 }
 0x363   : > { %v1791_v8 = vadd.f32 %v3607_v52, %v6088_v6 }
 0x364   : > { %v3609_v36 = vpop.f32.mrf.mxu1 }
 0x365   : > { %v3610_v11 = vadd.f32 %v3609_v36, %v3608_v30  ;;  %v1936_v4 = vadd.f32 %v3687_v24, %v1791_v8 }
 0x366   : > { %v3611_v25 = vpop.f32.mrf.mxu1 }
 0x367   : > { %v1796_v39 = vadd.f32 %v3610_v11, %v6088_v6 }
 0x368   : > { %v3612_v48 = vpop.f32.mrf.mxu1 }
 0x369   : > { %v3613_v13 = vadd.f32 %v3612_v48, %v3611_v25  ;;  %v3693_v48 = vadd.f32 %v3692_v40, %v3691_v59  ;;  %v3696_v59 = vadd.f32 %v3695_v0, %v6059_v32  ;;  %v3699_v0 = vadd.f32 %v6069_v61, %v6065_v17 }
 0x36a   : > { %v6031_v5 = vpop.f32.mrf.mxu1 }
 0x36b   : > { %v1801_v23 = vadd.f32 %v3613_v13, %v6088_v6 }
 0x36c   : > { %v6033_v42 = vpop.f32.mrf.mxu1 }
 0x36d   : > { %v3616_v30 = vadd.f32 %v6033_v42, %v6031_v5 }
 0x36e   : > { %v6035_v63 = vpop.f32.mrf.mxu1  ;;  %v6090_v49 = vpop.f32.mrf.mxu0 }
 0x36f   : > { %v1806_v22 = vadd.f32 %v3616_v30, %v6088_v6 }
 0x370   : > { %v6037_v2 = vpop.f32.mrf.mxu1  ;;  %v6097_v43 = vpop.f32.mrf.mxu0 }
 0x371   : > { %v3619_v56 = vadd.f32 %v6037_v2, %v6035_v63  ;;  %v1951_v2 = vadd.f32 %v3696_v59, %v1806_v22 }
 0x372   : > { %v6039_v47 = vpop.f32.mrf.mxu1  ;;  %v6100_v28 = vpop.f32.mrf.mxu0 }
 0x373   : > { %v1811_v13 = vadd.f32 %v3619_v56, %v6088_v6 }
 0x374   : > { %v6041_v21 = vpop.f32.mrf.mxu1 }
 0x376   : > { %v6043_v51 = vpop.f32.mrf.mxu1 }
 0x378   : > { %v6045_v44 = vpop.f32.mrf.mxu1 }
 0x37a   : > { %v6047_v45 = vpop.f32.mrf.mxu1 }
 0x37c   : > { %v6049_v3 = vpop.f32.mrf.mxu1 }
 0x37d   : > { %v3628_v56 = vadd.f32 %v6049_v3, %v6047_v45 }
 0x37f   : > { %v6051_v41 = vpop.f32.mrf.mxu1  ;;  %v1826_v45 = vadd.f32 %v3628_v56, %v6088_v6 }
 0x381   : > { %v6053_v50 = vpop.f32.mrf.mxu1 }
 0x383   : > { %v6055_v20 = vpop.f32.mrf.mxu1 }
 0x385   : > { %v6057_v29 = vpop.f32.mrf.mxu1 }
 0x38c   : > { %v6061_v37 = vpop.f32.mrf.mxu1 }
 0x38e   : > { %v6063_v38 = vpop.f32.mrf.mxu1 }
 0x390   : > { %v6067_v33 = vpop.f32.mrf.mxu1 }
 0x392   : > { %v6071_v53 = vpop.f32.mrf.mxu1 }
 0x397   : > { %v6073_v31 = vpop.f32.mrf.mxu1 }
 0x399   : > { %v6077_v34 = vpop.f32.mrf.mxu1 }
 0x39b   : > { %v6079_v55 = vpop.f32.mrf.mxu1 }
 0x39d   : > { %v6083_v15 = vpop.f32.mrf.mxu1 }
 0x39f   : > { %v6092_v19 = vpop.f32.mrf.mxu1 }
 0x3a0   : > { %7205 = vst [vmem:[#allocation6_spill] sm:$0xff] %v6092_v19 }
 0x3a1   : > { %v6094_v1 = vpop.f32.mrf.mxu1 }
 0x3a2   : > { %7206 = vst [vmem:[#allocation7_spill] sm:$0xff] %v6094_v1  ;;  %v6103_v1 = vpop.f32.mrf.mxu0 }
 0x3a3   : > { %v3762_v27 = vpop.f32.mrf.mxu1 }
 0x3a4   : > { %v6107_v36 = vpop.f32.mrf.mxu0 }
 0x3a5   : > { %v3763_v58 = vpop.f32.mrf.mxu1 }
 0x3a6   : > { %v3764_v46 = vadd.f32 %v3763_v58, %v3762_v27  ;;  %v1941_v27 = vadd.f32 %v3690_v62, %v1796_v39  ;;  %v6115_v5 = vpop.f32.mrf.mxu0 }
 0x3a7   : > { %v3765_v60 = vpop.f32.mrf.mxu1 }
 0x3a8   : > { %v2076_v14 = vadd.f32 %v3764_v46, %v1931_v54  ;;  %v1946_v46 = vadd.f32 %v3693_v48, %v1801_v23  ;;  %v6124_v63 = vpop.f32.mrf.mxu0  ;;  %v3625_v23 = vadd.f32 %v6045_v44, %v6043_v51  ;;  %v3702_v51 = vadd.f32 %v6081_v35, %v6075_v18 }
 0x3a9   : > { %v3766_v12 = vpop.f32.mrf.mxu1  ;;  %v3705_v18 = vadd.f32 %v6097_v43, %v6090_v49  ;;  %v3708_v43 = vadd.f32 %v6103_v1, %v6100_v28 }
 0x3aa   : > { %v3767_v57 = vadd.f32 %v3766_v12, %v3765_v60  ;;  %v2154_v19 = vmax.f32 %v2076_v14, 0.0  ;;  %v1821_v22 = vadd.f32 %v3625_v23, %v6088_v6 }
 0x3ab   : > { %v3768_v16 = vpop.f32.mrf.mxu1 }
 0x3ac   : > { %v2081_v52 = vadd.f32 %v3767_v57, %v1936_v4  ;;  %v6110_v58 = vrot.slane %v2154_v19, 2  ;;  %v3622_v57 = vadd.f32 %v6041_v21, %v6039_v47  ;;  %v1956_v47 = vadd.f32 %v3699_v0, %v1811_v13 }
 0x3ad   : > { %v3769_v26 = vpop.f32.mrf.mxu1  ;;  %v1966_v3 = vadd.f32 %v3705_v18, %v1821_v22  ;;  %v3640_v18 = vadd.f32 %v6071_v53, %v6067_v33 }
 0x3ae   : > { %v2155_v10 = vmax.f32 %v2081_v52, 0.0  ;;  %v3770_v9 = vadd.f32 %v3769_v26, %v3768_v16 }
 0x3af   : > { %v3771_v25 = vpop.f32.mrf.mxu1 }
 0x3b0   : > { %v2171_v8 = vrot.slane %v2155_v10, 2  ;;  %v2086_v11 = vadd.f32 %v3770_v9, %v1941_v27  ;;  %v6138_v27 = vpop.f32.mrf.mxu0  ;;  %v1816_v9 = vadd.f32 %v3622_v57, %v6088_v6 }
 0x3b1   : > { %v3772_v42 = vpop.f32.mrf.mxu1 }
 0x3b2   : > { %v2156_v54 = vmax.f32 %v2086_v11, 0.0  ;;  %v3773_v60 = vadd.f32 %v3772_v42, %v3771_v25  ;;  %v2200_v39 = vsel %vm1487_vm7, %v6110_v58, %v2171_v8  ;;  %v6145_v61 = vpop.f32.mrf.mxu0 }
 0x3b3   : > { %v3774_v40 = vpop.f32.mrf.mxu1  ;;  %v6121_v24 = vmax.f32 %v2154_v19, %v2200_v39 }
 0x3b4   : > { %v2172_v14 = vrot.slane %v2156_v54, 2  ;;  %v2091_v12 = vadd.f32 %v3773_v60, %v1946_v46  ;;  %v1961_v60 = vadd.f32 %v3702_v51, %v1816_v9  ;;  %v3716_v35 = vpop.f32.mrf.mxu0 }
 0x3b5   : > { %2219 = vrot.lane.b32.xlu1 %v6121_v24, %s4142_s14  ;;  %v3775_v4 = vpop.f32.mrf.mxu1 }
 0x3b6   : > { %v2157_v16 = vmax.f32 %v2091_v12, 0.0  ;;  %v3776_v62 = vadd.f32 %v3775_v4, %v3774_v40  ;;  %v2199_v32 = vsel %vm1487_vm7, %v2171_v8, %v2172_v14 }
 0x3b7   : > { %v3777_v19 = vpop.f32.mrf.mxu1  ;;  %v6134_v52 = vmax.f32 %v2155_v10, %v2199_v32 }
 0x3b8   : > { %v2173_v30 = vrot.slane %v2157_v16, 2  ;;  %v2096_v26 = vadd.f32 %v3776_v62, %v1951_v2  ;;  %v3631_v2 = vadd.f32 %v6053_v50, %v6051_v41  ;;  %v1971_v41 = vadd.f32 %v3708_v43, %v1826_v45 }
 0x3b9   : > { %2222 = vrot.lane.b32.xlu0 %v6134_v52, %s4142_s14  ;;  %v3778_v21 = vpop.f32.mrf.mxu1 }
 0x3ba   : > { %v2158_v25 = vmax.f32 %v2096_v26, 0.0  ;;  %v3779_v48 = vadd.f32 %v3778_v21, %v3777_v19  ;;  %v2198_v17 = vsel %vm1487_vm7, %v2172_v14, %v2173_v30  ;;  %v1831_v26 = vadd.f32 %v3631_v2, %v6088_v6 }
 0x3bb   : > { %v3780_v10 = vpop.f32.mrf.mxu1  ;;  %v6147_v8 = vmax.f32 %v2156_v54, %v2198_v17  ;;  %v3637_v17 = vadd.f32 %v6063_v38, %v6061_v37 }
 0x3bc   : > { %v2174_v44 = vrot.slane %v2158_v25, 2  ;;  %v2101_v11 = vadd.f32 %v3779_v48, %v1956_v47 }
 0x3bd   : > { %2225 = vrot.lane.b32.xlu1 %v6147_v8, %s4142_s14  ;;  %v3781_v42 = vpop.f32.mrf.mxu1  ;;  %v1841_v37 = vadd.f32 %v3637_v17, %v6088_v6  ;;  %v7207_v17 = vld [vmem:[#allocation6_spill] sm:$0xff] }
 0x3be   : > { %v2159_v46 = vmax.f32 %v2101_v11, 0.0  ;;  %v3782_v39 = vadd.f32 %v3781_v42, %v3780_v10  ;;  %v2197_v54 = vsel %vm1487_vm7, %v2173_v30, %v2174_v44  ;;  %v3634_v30 = vadd.f32 %v6057_v29, %v6055_v20 }
 0x3bf   : > { %v3783_v59 = vpop.f32.mrf.mxu1  ;;  %v6160_v40 = vmax.f32 %v2157_v16, %v2197_v54  ;;  %v3718_v16 = vpop.f32.mrf.mxu0 }
 0x3c0   : > { %v2175_v14 = vrot.slane %v2159_v46, 2  ;;  %v2106_v12 = vadd.f32 %v3782_v39, %v1961_v60  ;;  %v1836_v48 = vadd.f32 %v3634_v30, %v6088_v6 }
 0x3c1   : > { %2228 = vrot.lane.b32.xlu0 %v6160_v40, %s4142_s14  ;;  %v3784_v13 = vpop.f32.mrf.mxu1  ;;  %v3719_v28 = vpop.f32.mrf.mxu0 }
 0x3c2   : > { %v2160_v4 = vmax.f32 %v2106_v12, 0.0  ;;  %v3785_v57 = vadd.f32 %v3784_v13, %v3783_v59  ;;  %v2196_v49 = vsel %vm1487_vm7, %v2174_v44, %v2175_v14 }
 0x3c3   : > { %v3786_v62 = vpop.f32.mrf.mxu1  ;;  %v6171_v32 = vmax.f32 %v2158_v25, %v2196_v49  ;;  %v3711_v25 = vadd.f32 %v6115_v5, %v6107_v36  ;;  %v3721_v10 = vpop.f32.mrf.mxu0  ;;  %v3714_v36 = vadd.f32 %v6138_v27, %v6124_v63  ;;  %v3717_v27 = vadd.f32 %v3716_v35, %v6145_v61 }
 0x3c4   : > { %v2176_v0 = vrot.slane %v2160_v4, 2  ;;  %v2111_v19 = vadd.f32 %v3785_v57, %v1966_v3  ;;  %v1846_v57 = vadd.f32 %v3640_v18, %v6088_v6 }
 0x3c5   : > { %2231 = vrot.lane.b32.xlu1 %v6171_v32, %s4142_s14  ;;  %v3787_v50 = vpop.f32.mrf.mxu1  ;;  %v1976_v11 = vadd.f32 %v3711_v25, %v1831_v26  ;;  %v3722_v38 = vpop.f32.mrf.mxu0  ;;  %v1981_v39 = vadd.f32 %v3714_v36, %v1836_v48  ;;  %v1986_v33 = vadd.f32 %v3717_v27, %v1841_v37 }
 0x3c6   : > { %v2161_v23 = vmax.f32 %v2111_v19, 0.0  ;;  %v3788_v47 = vadd.f32 %v3787_v50, %v3786_v62  ;;  %v2195_v1 = vsel %vm1487_vm7, %v2175_v14, %v2176_v0 }
 0x3c7   : > { %v3789_v21 = vpop.f32.mrf.mxu1  ;;  %v6180_v9 = vmax.f32 %v2159_v46, %v2195_v1  ;;  %v3724_v2 = vpop.f32.mrf.mxu0 }
 0x3c8   : > { %v2177_v20 = vrot.slane %v2161_v23, 2  ;;  %v2116_v29 = vadd.f32 %v3788_v47, %v1971_v41 }
 0x3c9   : > { %2234 = vrot.lane.b32.xlu0 %v6180_v9, %s4142_s14  ;;  %v3790_v51 = vpop.f32.mrf.mxu1  ;;  %v3725_v41 = vpop.f32.mrf.mxu0 }
 0x3ca   : > { %v2162_v44 = vmax.f32 %v2116_v29, 0.0  ;;  %v3791_v22 = vadd.f32 %v3790_v51, %v3789_v21  ;;  %v2194_v56 = vsel %vm1487_vm7, %v2176_v0, %v2177_v20  ;;  %v3720_v0 = vadd.f32 %v3719_v28, %v3718_v16  ;;  %v7208_v51 = vld [vmem:[#allocation7_spill] sm:$0xff] }
 0x3cb   : > { %v3792_v5 = vpop.f32.mrf.mxu1  ;;  %v6193_v42 = vmax.f32 %v2160_v4, %v2194_v56  ;;  %v3643_v4 = vadd.f32 %v6077_v34, %v6073_v31  ;;  %v3646_v34 = vadd.f32 %v6083_v15, %v6079_v55  ;;  %v3723_v21 = vadd.f32 %v3722_v38, %v3721_v10  ;;  %v3727_v29 = vpop.f32.mrf.mxu0 }
 0x3cc   : > { %v2178_v46 = vrot.slane %v2162_v44, 2  ;;  %v2121_v60 = vadd.f32 %v3791_v22, %v1976_v11  ;;  %v3726_v56 = vadd.f32 %v3725_v41, %v3724_v2 }
 0x3cd   : > { %2237 = vrot.lane.b32.xlu1 %v6193_v42, %s4142_s14  ;;  %v3793_v54 = vpop.f32.mrf.mxu1  ;;  %v1851_v31 = vadd.f32 %v3643_v4, %v6088_v6  ;;  %v1856_v48 = vadd.f32 %v3646_v34, %v6088_v6  ;;  %v3728_v37 = vpop.f32.mrf.mxu0 }
 0x3ce   : > { %v2163_v59 = vmax.f32 %v2121_v60, 0.0  ;;  %v3794_v14 = vadd.f32 %v3793_v54, %v3792_v5  ;;  %v2193_v63 = vsel %vm1487_vm7, %v2177_v20, %v2178_v46 }
 0x3cf   : > { %v3795_v12 = vpop.f32.mrf.mxu1  ;;  %v6203_v45 = vmax.f32 %v2161_v23, %v2193_v63  ;;  %v1991_v23 = vadd.f32 %v3720_v0, %v1846_v57  ;;  %v1996_v55 = vadd.f32 %v3723_v21, %v1851_v31  ;;  %v2001_v38 = vadd.f32 %v3726_v56, %v1856_v48 }
 0x3d0   : > { %v2179_v3 = vrot.slane %v2163_v59, 2  ;;  %v2126_v13 = vadd.f32 %v3794_v14, %v1981_v39 }
 0x3d1   : > { %2240 = vrot.lane.b32.xlu0 %v6203_v45, %s4142_s14  ;;  %v3796_v53 = vpop.f32.mrf.mxu1 }
 0x3d2   : > { %v2164_v49 = vmax.f32 %v2126_v13, 0.0  ;;  %v3797_v43 = vadd.f32 %v3796_v53, %v3795_v12  ;;  %v2192_v61 = vsel %vm1487_vm7, %v2178_v46, %v2179_v3  ;;  %v3729_v12 = vadd.f32 %v3728_v37, %v3727_v29 }
 0x3d3   : > { %v3798_v35 = vpop.f32.mrf.mxu1  ;;  %v6212_v62 = vmax.f32 %v2162_v44, %v2192_v61  ;;  %v3649_v44 = vadd.f32 %v7208_v51, %v7207_v17 }
 0x3d4   : > { %v2180_v19 = vrot.slane %v2164_v49, 2  ;;  %v2131_v30 = vadd.f32 %v3797_v43, %v1986_v33 }
 0x3d5   : > { %2243 = vrot.lane.b32.xlu1 %v6212_v62, %s4142_s14  ;;  %v3799_v50 = vpop.f32.mrf.mxu1  ;;  %v1861_v54 = vadd.f32 %v3649_v44, %v6088_v6 }
 0x3d6   : > { %v2165_v26 = vmax.f32 %v2131_v30, 0.0  ;;  %v3800_v47 = vadd.f32 %v3799_v50, %v3798_v35  ;;  %v2191_v1 = vsel %vm1487_vm7, %v2179_v3, %v2180_v19 }
 0x3d7   : > { %v3801_v16 = vpop.f32.mrf.mxu1  ;;  %v6221_v28 = vmax.f32 %v2163_v59, %v2191_v1  ;;  %v2006_v33 = vadd.f32 %v3729_v12, %v1861_v54 }
 0x3d8   : > { %v2181_v25 = vrot.slane %v2165_v26, 2  ;;  %v2136_v20 = vadd.f32 %v3800_v47, %v1991_v23 }
 0x3d9   : > { %2246 = vrot.lane.b32.xlu0 %v6221_v28, %s4142_s14  ;;  %v3802_v15 = vpop.f32.mrf.mxu1 }
 0x3da   : > { %v2166_v11 = vmax.f32 %v2136_v20, 0.0  ;;  %v3803_v22 = vadd.f32 %v3802_v15, %v3801_v16  ;;  %v2190_v10 = vsel %vm1487_vm7, %v2180_v19, %v2181_v25 }
 0x3db   : > { %v3804_v36 = vpop.f32.mrf.mxu1  ;;  %v6230_v5 = vmax.f32 %v2164_v49, %v2190_v10 }
 0x3dc   : > { %v2182_v46 = vrot.slane %v2166_v11, 2  ;;  %v2141_v60 = vadd.f32 %v3803_v22, %v1996_v55 }
 0x3dd   : > { %2249 = vrot.lane.b32.xlu1 %v6230_v5, %s4142_s14  ;;  %v3805_v39 = vpop.f32.mrf.mxu1 }
 0x3de   : > { %v2167_v18 = vmax.f32 %v2141_v60, 0.0  ;;  %v3806_v59 = vadd.f32 %v3805_v39, %v3804_v36  ;;  %v2189_v14 = vsel %vm1487_vm7, %v2181_v25, %v2182_v46  ;;  %v2401_v60 = vld [vmem:[%s7150_s5 + $0x30] sm:$0xff] }
 0x3df   : > { %v3807_v63 = vpop.f32.mrf.mxu1  ;;  %v6237_v27 = vmax.f32 %v2165_v26, %v2189_v14  ;;  %v2398_v14 = vld [vmem:[%s7150_s5 + $0x18] sm:$0xff] }
 0x3e0   : > { %v2183_v3 = vrot.slane %v2167_v18, 2  ;;  %v2146_v13 = vadd.f32 %v3806_v59, %v2001_v38  ;;  %v2399_v59 = vld [vmem:[%s7150_s5 + $0x20] sm:$0xff] }
 0x3e1   : > { %2252 = vrot.lane.b32.xlu0 %v6237_v27, %s4142_s14  ;;  %v3808_v2 = vpop.f32.mrf.mxu1 }
 0x3e2   : > { %v2168_v4 = vmax.f32 %v2146_v13, 0.0  ;;  %v3809_v53 = vadd.f32 %v3808_v2, %v3807_v63  ;;  %v2188_v6 = vsel %vm1487_vm7, %v2182_v46, %v2183_v3  ;;  %v2402_v46 = vld [vmem:[%s7150_s5 + $0x38] sm:$0xff]  ;;  %v2397_v63 = vld [vmem:[%s7150_s5 + $0x10] sm:$0xff]  ;;  %v2395_v2 = vld [vmem:[%s7150_s5] sm:$0xff] }
 0x3e3   : > { %v6243_v57 = vmax.f32 %v2166_v11, %v2188_v6  ;;  %2475 = vmatprep.subr.mxu0 %v2402_v46 }
 0x3e4   : > { %v2184_v49 = vrot.slane %v2168_v4, 2  ;;  %v2151_v43 = vadd.f32 %v3809_v53, %v2006_v33  ;;  %2476 = vmatpush1.msra.mxu0 %v2401_v60 }
 0x3e5   : > { %2255 = vrot.lane.b32.xlu1 %v6243_v57, %s4142_s14 }
 0x3e6   : > { %v2169_v61 = vmax.f32 %v2151_v43, 0.0  ;;  %v2187_v35 = vsel %vm1487_vm7, %v2183_v3, %v2184_v49  ;;  %v2396_v3 = vld [vmem:[%s7150_s5 + $0x8] sm:$0xff] }
 0x3e7   : > { %v6249_v0 = vmax.f32 %v2167_v18, %v2187_v35  ;;  %v2400_v18 = vld [vmem:[%s7150_s5 + $0x28] sm:$0xff] }
 0x3e8   : > { %v2185_v19 = vrot.slane %v2169_v61, 2  ;;  %2477 = vmatprep.subr.mxu0 %v2400_v18  ;;  %v6403_v18 = vld [vmem:[%s7154_s9 + $0x10] sm:$0xff] }
 0x3e9   : > { %2258 = vrot.lane.b32.xlu0 %v6249_v0, %s4142_s14  ;;  %2478 = vmatpush1.msra.mxu0 %v2399_v59  ;;  %v4148_v59 = vmov 5  }
 0x3ea   : > { %v2186_v30 = vsel %vm1487_vm7, %v2184_v49, %v2185_v19  ;;  %v2201_v31 = vsel %vm1487_vm7, %v2185_v19, %v6110_v58  ;;  %2479 = vmatprep.subr.mxu0 %v2398_v14  ;;  %v6414_v14 = vld [vmem:[%s7154_s9 + $0x18] sm:$0xff] }
 0x3eb   : > { %v6255_v41 = vmax.f32 %v2168_v4, %v2186_v30  ;;  %v6262_v34 = vmax.f32 %v2169_v61, %v2201_v31  ;;  %2480 = vmatpush1.msra.mxu0 %v2397_v63  ;;  %v6421_v63 = vld [vmem:[%s7154_s9 + $0x30] sm:$0xff] }
 0x3ec   : > { %2481 = vmatprep.subr.mxu0 %v2396_v3  ;;  %v6434_v3 = vld [vmem:[%s7154_s9 + $0x20] sm:$0xff] }
 0x3ed   : > { %2261 = vrot.lane.b32.xlu1 %v6255_v41, %s4142_s14  ;;  %2482 = vmatpush1.msra.mxu0 %v2395_v2  ;;  %v6449_v2 = vld [vmem:[%s7154_s9 + $0x28] sm:$0xff] }
 0x3f1   : > { %2264 = vrot.lane.b32.xlu1 %v6262_v34, %s4142_s14 }
 0x427   : > { %v2220_v50 = vpop.permute.xlu1 %2219 }
 0x428   : > { %v2221_v26 = vsel %vm2218_vm8, %v2220_v50, %v6121_v24 }
 0x429   : > { %2267 = vrot.lane.b32.xlu0 %v2221_v26, %s4142_s14 }
 0x42b   : > { %v2223_v23 = vpop.permute.xlu0 %2222 }
 0x42c   : > { %v2224_v47 = vsel %vm2218_vm8, %v2223_v23, %v6134_v52 }
 0x42d   : > { %2269 = vrot.lane.b32.xlu0 %v2224_v47, %s4142_s14 }
 0x42f   : > { %v2226_v58 = vpop.permute.xlu1 %2225 }
 0x430   : > { %v2227_v1 = vsel %vm2218_vm8, %v2226_v58, %v6147_v8 }
 0x431   : > { %2271 = vrot.lane.b32.xlu1 %v2227_v1, %s4142_s14 }
 0x433   : > { %v2229_v21 = vpop.permute.xlu0 %2228 }
 0x434   : > { %v2230_v16 = vsel %vm2218_vm8, %v2229_v21, %v6160_v40 }
 0x435   : > { %2273 = vrot.lane.b32.xlu0 %v2230_v16, %s4142_s14 }
 0x437   : > { %v2232_v25 = vpop.permute.xlu1 %2231 }
 0x438   : > { %v2233_v20 = vsel %vm2218_vm8, %v2232_v25, %v6171_v32 }
 0x439   : > { %2275 = vrot.lane.b32.xlu1 %v2233_v20, %s4142_s14  ;;  %v4147_v20 = vmov 4  }
 0x43a   : > { %3960 = vset.pattern.permute.xlu1 %v4147_v20  ;;  %3962 = vset.pattern.permute.xlu0 %v4147_v20 }
 0x43b   : > { %v2235_v29 = vpop.permute.xlu0 %2234 }
 0x43c   : > { %v2236_v48 = vsel %vm2218_vm8, %v2235_v29, %v6180_v9 }
 0x43d   : > { %2277 = vrot.lane.b32.xlu0 %v2236_v48, %s4142_s14 }
 0x43f   : > { %v2238_v55 = vpop.permute.xlu1 %2237 }
 0x440   : > { %v2239_v15 = vsel %vm2218_vm8, %v2238_v55, %v6193_v42 }
 0x441   : > { %2279 = vrot.lane.b32.xlu1 %v2239_v15, %s4142_s14 }
 0x443   : > { %v2241_v17 = vpop.permute.xlu0 %2240 }
 0x444   : > { %v2242_v51 = vsel %vm2218_vm8, %v2241_v17, %v6203_v45 }
 0x445   : > { %2281 = vrot.lane.b32.xlu0 %v2242_v51, %s4142_s14 }
 0x447   : > { %v2244_v44 = vpop.permute.xlu1 %2243 }
 0x448   : > { %v2245_v11 = vsel %vm2218_vm8, %v2244_v44, %v6212_v62 }
 0x449   : > { %2283 = vrot.lane.b32.xlu1 %v2245_v11, %s4142_s14 }
 0x44b   : > { %v2247_v22 = vpop.permute.xlu0 %2246 }
 0x44c   : > { %v2248_v10 = vsel %vm2218_vm8, %v2247_v22, %v6221_v28 }
 0x44d   : > { %2285 = vrot.lane.b32.xlu0 %v2248_v10, %s4142_s14 }
 0x44f   : > { %v2250_v56 = vpop.permute.xlu1 %2249 }
 0x450   : > { %v2251_v36 = vsel %vm2218_vm8, %v2250_v56, %v6230_v5 }
 0x451   : > { %2287 = vrot.lane.b32.xlu1 %v2251_v36, %s4142_s14 }
 0x453   : > { %v2253_v37 = vpop.permute.xlu0 %2252 }
 0x454   : > { %v2254_v38 = vsel %vm2218_vm8, %v2253_v37, %v6237_v27 }
 0x455   : > { %2289 = vrot.lane.b32.xlu0 %v2254_v38, %s4142_s14 }
 0x457   : > { %v2256_v39 = vpop.permute.xlu1 %2255 }
 0x458   : > { %v2257_v54 = vsel %vm2218_vm8, %v2256_v39, %v6243_v57  ;;  %v6391_v39 = vld [vmem:[%s7154_s9] sm:$0xff] }
 0x459   : > { %2291 = vrot.lane.b32.xlu1 %v2257_v54, %s4142_s14  ;;  %v6397_v54 = vld [vmem:[%s7154_s9 + $0x8] sm:$0xff] }
 0x45b   : > { %v2259_v12 = vpop.permute.xlu0 %2258 }
 0x45c   : > { %v2260_v13 = vsel %vm2218_vm8, %v2259_v12, %v6249_v0  ;;  %v6428_v12 = vld [vmem:[%s7154_s9 + $0x48] sm:$0xff] }
 0x45d   : > { %2293 = vrot.lane.b32.xlu0 %v2260_v13, %s4142_s14  ;;  %v6440_v13 = vld [vmem:[%s7154_s9 + $0x60] sm:$0xff] }
 0x45f   : > { %v2262_v4 = vpop.permute.xlu1 %2261 }
 0x460   : > { %v2263_v33 = vsel %vm2218_vm8, %v2262_v4, %v6255_v41  ;;  %v6456_v4 = vld [vmem:[%s7154_s9 + $0x40] sm:$0xff] }
 0x461   : > { %2295 = vrot.lane.b32.xlu1 %v2263_v33, %s4142_s14  ;;  %v6464_v33 = vld [vmem:[%s7154_s9 + $0x58] sm:$0xff] }
 0x463   : > { %v2265_v53 = vpop.permute.xlu1 %2264 }
 0x464   : > { %v2266_v6 = vsel %vm2218_vm8, %v2265_v53, %v6262_v34  ;;  %v6470_v53 = vld [vmem:[%s7154_s9 + $0x38] sm:$0xff] }
 0x465   : > { %2297 = vrot.lane.b32.xlu1 %v2266_v6, %s4142_s14  ;;  %v6476_v6 = vld [vmem:[%s7154_s9 + $0x70] sm:$0xff] }
 0x49b   : > { %v2268_v49 = vpop.permute.xlu0 %2267 }
 0x49c   : > { %v2299_v43 = vsel %vm2218_vm8, %v2268_v49, %v6121_v24  ;;  %v6485_v49 = vld [vmem:[%s7154_s9 + $0x78] sm:$0xff] }
 0x49d   : > { %2331 = vrot.lane.b32.xlu0 %v2299_v43, %s4146_s12 }
 0x49f   : > { %v2270_v61 = vpop.permute.xlu0 %2269 }
 0x4a0   : > { %v2300_v35 = vsel %vm2218_vm8, %v2270_v61, %v6134_v52 }
 0x4a1   : > { %2333 = vrot.lane.b32.xlu0 %v2300_v35, %s4146_s12 }
 0x4a3   : > { %v2272_v19 = vpop.permute.xlu1 %2271 }
 0x4a4   : > { %v2301_v30 = vsel %vm2218_vm8, %v2272_v19, %v6147_v8  ;;  %v7209_v19 = vmov 0.0  }
 0x4a5   : > { %2335 = vrot.lane.b32.xlu1 %v2301_v30, %s4146_s12  ;;  %v6497_v30 = vld [vmem:[%s7154_s9 + $0x50] sm:$0xff] }
 0x4a7   : > { %v2274_v31 = vpop.permute.xlu0 %2273 }
 0x4a8   : > { %v2302_v50 = vsel %vm2218_vm8, %v2274_v31, %v6160_v40 }
 0x4a9   : > { %2337 = vrot.lane.b32.xlu0 %v2302_v50, %s4146_s12 }
 0x4ab   : > { %v2276_v26 = vpop.permute.xlu1 %2275 }
 0x4ac   : > { %v2303_v23 = vsel %vm2218_vm8, %v2276_v26, %v6171_v32 }
 0x4ad   : > { %2339 = vrot.lane.b32.xlu1 %v2303_v23, %s4146_s12 }
 0x4af   : > { %v2278_v47 = vpop.permute.xlu0 %2277 }
 0x4b0   : > { %v2304_v58 = vsel %vm2218_vm8, %v2278_v47, %v6180_v9 }
 0x4b1   : > { %2341 = vrot.lane.b32.xlu0 %v2304_v58, %s4146_s12  ;;  %v6521_v58 = vld [vmem:[%s7154_s9 + $0x68] sm:$0xff] }
 0x4b3   : > { %v2280_v1 = vpop.permute.xlu1 %2279 }
 0x4b4   : > { %v2305_v21 = vsel %vm2218_vm8, %v2280_v1, %v6193_v42 }
 0x4b5   : > { %2343 = vrot.lane.b32.xlu1 %v2305_v21, %s4146_s12 }
 0x4b7   : > { %v2282_v16 = vpop.permute.xlu0 %2281 }
 0x4b8   : > { %v2306_v25 = vsel %vm2218_vm8, %v2282_v16, %v6203_v45 }
 0x4b9   : > { %2345 = vrot.lane.b32.xlu0 %v2306_v25, %s4146_s12 }
 0x4bb   : > { %v2284_v29 = vpop.permute.xlu1 %2283 }
 0x4bc   : > { %v2307_v48 = vsel %vm2218_vm8, %v2284_v29, %v6212_v62 }
 0x4bd   : > { %2347 = vrot.lane.b32.xlu1 %v2307_v48, %s4146_s12 }
 0x4bf   : > { %v2286_v55 = vpop.permute.xlu0 %2285 }
 0x4c0   : > { %v2308_v15 = vsel %vm2218_vm8, %v2286_v55, %v6221_v28 }
 0x4c1   : > { %2349 = vrot.lane.b32.xlu0 %v2308_v15, %s4146_s12 }
 0x4c3   : > { %v2288_v17 = vpop.permute.xlu1 %2287 }
 0x4c4   : > { %v2309_v51 = vsel %vm2218_vm8, %v2288_v17, %v6230_v5 }
 0x4c5   : > { %2351 = vrot.lane.b32.xlu1 %v2309_v51, %s4146_s12 }
 0x4c7   : > { %v2290_v44 = vpop.permute.xlu0 %2289 }
 0x4c8   : > { %v2310_v11 = vsel %vm2218_vm8, %v2290_v44, %v6237_v27  ;;  %v2873_v44 = vld [vmem:[%s7152_s7 + $0x70] sm:$0xff] }
 0x4c9   : > { %2353 = vrot.lane.b32.xlu0 %v2310_v11, %s4146_s12  ;;  %v2870_v11 = vld [vmem:[%s7152_s7 + $0x58] sm:$0xff] }
 0x4cb   : > { %v2292_v22 = vpop.permute.xlu1 %2291 }
 0x4cc   : > { %v2311_v10 = vsel %vm2218_vm8, %v2292_v22, %v6243_v57  ;;  %v2869_v22 = vld [vmem:[%s7152_s7 + $0x50] sm:$0xff] }
 0x4cd   : > { %2355 = vrot.lane.b32.xlu1 %v2311_v10, %s4146_s12  ;;  %v2868_v10 = vld [vmem:[%s7152_s7 + $0x48] sm:$0xff] }
 0x4cf   : > { %v2294_v56 = vpop.permute.xlu0 %2293 }
 0x4d0   : > { %v2312_v36 = vsel %vm2218_vm8, %v2294_v56, %v6249_v0  ;;  %v2867_v56 = vld [vmem:[%s7152_s7 + $0x40] sm:$0xff] }
 0x4d1   : > { %2357 = vrot.lane.b32.xlu0 %v2312_v36, %s4146_s12  ;;  %v2866_v36 = vld [vmem:[%s7152_s7 + $0x38] sm:$0xff] }
 0x4d3   : > { %v2296_v46 = vpop.permute.xlu1 %2295 }
 0x4d4   : > { %v2313_v60 = vsel %vm2218_vm8, %v2296_v46, %v6255_v41  ;;  %v2865_v46 = vld [vmem:[%s7152_s7 + $0x30] sm:$0xff] }
 0x4d5   : > { %2359 = vrot.lane.b32.xlu1 %v2313_v60, %s4146_s12  ;;  %v2864_v60 = vld [vmem:[%s7152_s7 + $0x28] sm:$0xff] }
 0x4d7   : > { %v2298_v37 = vpop.permute.xlu1 %2297 }
 0x4d8   : > { %v2314_v38 = vsel %vm2218_vm8, %v2298_v37, %v6262_v34  ;;  %v2863_v37 = vld [vmem:[%s7152_s7 + $0x20] sm:$0xff] }
 0x4d9   : > { %2361 = vrot.lane.b32.xlu0 %v2314_v38, %s4146_s12  ;;  %2613 = vperm.xlu1 %3960, %v6391_v39   ;;  %v2862_v38 = vld [vmem:[%s7152_s7 + $0x18] sm:$0xff]  ;;  %s4082_s12 = scalar_lea.vmem %s4081_s30, 4096 }
 0x4dd   : > { %2617 = vperm.xlu1 %3960, %v6397_v54   ;;  %2621 = vperm.xlu0 %3962, %v6403_v18  }
 0x4e1   : > { %3961 = vset.pattern.permute.xlu1 %v4148_v59  ;;  %3963 = vset.pattern.permute.xlu0 %v4148_v59 }
 0x4e2   : > { %2729 = vperm.xlu1 %3961, %v6397_v54   ;;  %2725 = vperm.xlu0 %3963, %v6391_v39  }
 0x4e6   : > { %2733 = vperm.xlu1 %3961, %v6403_v18   ;;  %2737 = vperm.xlu0 %3963, %v6414_v14  }
 0x4ea   : > { %3964 = vset.pattern.permute.xlu1 %v4147_v20  ;;  %2749 = vperm.xlu0 %3963, %v6421_v63  }
 0x4eb   : > { %2625 = vperm.xlu1 %3964, %v6414_v14  }
 0x4ee   : > { %2761 = vperm.xlu0 %3963, %v6428_v12  }
 0x4ef   : > { %2629 = vperm.xlu1 %3964, %v6434_v3  }
 0x4f2   : > { %2773 = vperm.xlu0 %3963, %v6440_v13  }
 0x4f3   : > { %3965 = vset.pattern.permute.xlu1 %v4148_v59 }
 0x4f4   : > { %2741 = vperm.xlu1 %3965, %v6434_v3  }
 0x4f6   : > { %3971 = vset.pattern.permute.xlu0 %v4147_v20 }
 0x4f7   : > { %2633 = vperm.xlu0 %3971, %v6449_v2  }
 0x4f8   : > { %2745 = vperm.xlu1 %3965, %v6449_v2  }
 0x4fb   : > { %2645 = vperm.xlu0 %3971, %v6456_v4  }
 0x4fc   : > { %3966 = vset.pattern.permute.xlu1 %v4147_v20 }
 0x4fd   : > { %2637 = vperm.xlu1 %3966, %v6421_v63  }
 0x4ff   : > { %2657 = vperm.xlu0 %3971, %v6464_v33  }
 0x501   : > { %2641 = vperm.xlu1 %3966, %v6470_v53  }
 0x503   : > { %2669 = vperm.xlu0 %3971, %v6476_v6  }
 0x505   : > { %3967 = vset.pattern.permute.xlu1 %v4148_v59 }
 0x506   : > { %2753 = vperm.xlu1 %3967, %v6470_v53  }
 0x507   : > { %3974 = vset.pattern.permute.xlu0 %v4148_v59 }
 0x508   : > { %2785 = vperm.xlu0 %3974, %v6485_v49  }
 0x50a   : > { %2757 = vperm.xlu1 %3967, %v6456_v4  }
 0x50e   : > { %3968 = vset.pattern.permute.xlu1 %v4147_v20 }
 0x50f   : > { %v2332_v43 = vpop.permute.xlu0 %2331  ;;  %2649 = vperm.xlu1 %3968, %v6428_v12  }
 0x510   : > { %v2379_v61 = vmax.f32 %v6121_v24, %v2332_v43  ;;  %v2860_v43 = vld [vmem:[%s7152_s7 + $0x8] sm:$0xff] }
 0x512   : > { %3530 = vmatmul.mubr.msk.f32.vlgmr.msra.gmra.mxu0 %vm784_vm3, %v2379_v61  ;;  %v2859_v61 = vld [vmem:[%s7152_s7] sm:$0xff] }
 0x513   : > { %v2334_v35 = vpop.permute.xlu0 %2333  ;;  %2521 = vmatprep.mubr.f32.mxu0 %v7209_v19  ;;  %2653 = vperm.xlu1 %3968, %v6497_v30  }
 0x514   : > { %v2380_v31 = vmax.f32 %v6134_v52, %v2334_v35 }
 0x516   : > { %3531 = vmatmul.mubr.msk.f32.gmra.mxu0 %vm784_vm3, %v2380_v31  ;;  %v4149_v31 = vmov 6  }
 0x517   : > { %v2336_v50 = vpop.permute.xlu1 %2335  ;;  %2527 = vmatprep.mubr.f32.mxu0 %v7209_v19  ;;  %3969 = vset.pattern.permute.xlu1 %v4148_v59 }
 0x518   : > { %v2381_v24 = vmax.f32 %v6147_v8, %v2336_v50  ;;  %2765 = vperm.xlu1 %3969, %v6497_v30   ;;  %3976 = vset.pattern.permute.xlu0 %v4149_v31 }
 0x519   : > { %3029 = vperm.xlu0 %3976, %v6403_v18  }
 0x51a   : > { %3532 = vmatmul.mubr.msk.f32.gmra.mxu0 %vm784_vm3, %v2381_v24 }
 0x51b   : > { %v2338_v26 = vpop.permute.xlu0 %2337  ;;  %2533 = vmatprep.mubr.f32.mxu0 %v7209_v19 }
 0x51c   : > { %v2382_v23 = vmax.f32 %v6160_v40, %v2338_v26  ;;  %2769 = vperm.xlu1 %3969, %v6464_v33  }
 0x51d   : > { %3041 = vperm.xlu0 %3976, %v6449_v2  }
 0x51e   : > { %3533 = vmatmul.mubr.msk.f32.gmra.mxu0 %vm784_vm3, %v2382_v23 }
 0x51f   : > { %v2340_v52 = vpop.permute.xlu1 %2339  ;;  %2539 = vmatprep.mubr.f32.mxu0 %v7209_v19 }
 0x520   : > { %v2383_v47 = vmax.f32 %v6171_v32, %v2340_v52  ;;  %3970 = vset.pattern.permute.xlu1 %v4147_v20 }
 0x521   : > { %2661 = vperm.xlu1 %3970, %v6440_v13   ;;  %3049 = vperm.xlu0 %3976, %v6470_v53  }
 0x522   : > { %3534 = vmatmul.mubr.msk.f32.gmra.mxu0 %vm784_vm3, %v2383_v47 }
 0x523   : > { %v2342_v8 = vpop.permute.xlu0 %2341  ;;  %2545 = vmatprep.mubr.f32.mxu0 %v7209_v19 }
 0x524   : > { %v2384_v40 = vmax.f32 %v6180_v9, %v2342_v8 }
 0x525   : > { %2665 = vperm.xlu1 %3970, %v6521_v58   ;;  %3057 = vperm.xlu0 %3976, %v6428_v12  }
 0x526   : > { %3535 = vmatmul.mubr.msk.f32.gmra.mxu0 %vm784_vm3, %v2384_v40 }
 0x527   : > { %v2344_v32 = vpop.permute.xlu1 %2343  ;;  %2551 = vmatprep.mubr.f32.mxu0 %v7209_v19 }
 0x528   : > { %v2385_v1 = vmax.f32 %v6193_v42, %v2344_v32  ;;  %v4150_v32 = vmov 7  }
 0x529   : > { %3972 = vset.pattern.permute.xlu1 %v4148_v59  ;;  %v2861_v59 = vld [vmem:[%s7152_s7 + $0x10] sm:$0xff]  ;;  %3065 = vperm.xlu0 %3976, %v6464_v33  }
 0x52a   : > { %3536 = vmatmul.mubr.msk.f32.gmra.mxu0 %vm784_vm3, %v2385_v1  ;;  %2777 = vperm.xlu1 %3972, %v6521_v58  }
 0x52b   : > { %v2346_v9 = vpop.permute.xlu0 %2345  ;;  %2557 = vmatprep.mubr.f32.mxu0 %v7209_v19 }
 0x52c   : > { %v2386_v21 = vmax.f32 %v6203_v45, %v2346_v9 }
 0x52d   : > { %3073 = vperm.xlu0 %3976, %v6521_v58  }
 0x52e   : > { %3537 = vmatmul.mubr.msk.f32.gmra.mxu0 %vm784_vm3, %v2386_v21  ;;  %2781 = vperm.xlu1 %3972, %v6476_v6  }
 0x52f   : > { %v2348_v16 = vpop.permute.xlu1 %2347  ;;  %2563 = vmatprep.mubr.f32.mxu0 %v7209_v19 }
 0x530   : > { %v2387_v42 = vmax.f32 %v6212_v62, %v2348_v16 }
 0x531   : > { %3081 = vperm.xlu0 %3976, %v6485_v49  }
 0x532   : > { %3538 = vmatmul.mubr.msk.f32.gmra.mxu0 %vm784_vm3, %v2387_v42  ;;  %3973 = vset.pattern.permute.xlu1 %v4147_v20 }
 0x533   : > { %v2350_v25 = vpop.permute.xlu0 %2349  ;;  %2569 = vmatprep.mubr.f32.mxu0 %v7209_v19  ;;  %2673 = vperm.xlu1 %3973, %v6485_v49  }
 0x534   : > { %v2388_v45 = vmax.f32 %v6221_v28, %v2350_v25 }
 0x535   : > { %3978 = vset.pattern.permute.xlu0 %v4150_v32 }
 0x536   : > { %3539 = vmatmul.mubr.msk.f32.gmra.mxu0 %vm784_vm3, %v2388_v45  ;;  %3201 = vperm.xlu0 %3978, %v6397_v54  }
 0x537   : > { %v2352_v29 = vpop.permute.xlu1 %2351  ;;  %2575 = vmatprep.mubr.f32.mxu0 %v7209_v19  ;;  %3975 = vset.pattern.permute.xlu1 %v4149_v31 }
 0x538   : > { %v2389_v48 = vmax.f32 %v6230_v5, %v2352_v29  ;;  %3021 = vperm.xlu1 %3975, %v6391_v39  }
 0x53a   : > { %3540 = vmatmul.mubr.msk.f32.gmra.mxu0 %vm784_vm3, %v2389_v48  ;;  %3213 = vperm.xlu0 %3978, %v6434_v3  }
 0x53b   : > { %v2354_v62 = vpop.permute.xlu0 %2353  ;;  %2581 = vmatprep.mubr.f32.mxu0 %v7209_v19 }
 0x53c   : > { %v2390_v20 = vmax.f32 %v6237_v27, %v2354_v62  ;;  %3025 = vperm.xlu1 %3975, %v6397_v54  }
 0x53e   : > { %3541 = vmatmul.mubr.msk.f32.gmra.mxu0 %vm784_vm3, %v2390_v20  ;;  %3221 = vperm.xlu0 %3978, %v6421_v63  }
 0x53f   : > { %v2356_v55 = vpop.permute.xlu1 %2355  ;;  %2587 = vmatprep.mubr.f32.mxu0 %v7209_v19 }
 0x540   : > { %v2391_v28 = vmax.f32 %v6243_v57, %v2356_v55  ;;  %3033 = vperm.xlu1 %3975, %v6414_v14  }
 0x542   : > { %3542 = vmatmul.mubr.msk.f32.gmra.mxu0 %vm784_vm3, %v2391_v28  ;;  %3229 = vperm.xlu0 %3978, %v6456_v4  }
 0x543   : > { %v2358_v15 = vpop.permute.xlu0 %2357  ;;  %2593 = vmatprep.mubr.f32.mxu0 %v7209_v19 }
 0x544   : > { %v2392_v5 = vmax.f32 %v6249_v0, %v2358_v15  ;;  %v2874_v0 = vld [vmem:[%s7152_s7 + $0x78] sm:$0xff]  ;;  %3037 = vperm.xlu1 %3975, %v6434_v3  }
 0x545   : > { %3842 = vmatprep.subr.mxu1 %v2874_v0 }
 0x546   : > { %3543 = vmatmul.mubr.msk.f32.gmra.mxu0 %vm784_vm3, %v2392_v5  ;;  %3843 = vmatpush3.msra.mxu1 %v2874_v0 }
 0x547   : > { %v2360_v17 = vpop.permute.xlu1 %2359  ;;  %2599 = vmatprep.mubr.f32.mxu0 %v7209_v19  ;;  %3844 = vmatprep.subr.mxu1 %v2873_v44 }
 0x548   : > { %v2393_v27 = vmax.f32 %v6255_v41, %v2360_v17  ;;  %3845 = vmatpush3.msra.mxu1 %v2873_v44  ;;  %v2872_v41 = vld [vmem:[%s7152_s7 + $0x68] sm:$0xff]  ;;  %3045 = vperm.xlu1 %3975, %v6421_v63  }
 0x549   : > { %3846 = vmatprep.subr.mxu1 %v2872_v41  ;;  %3237 = vperm.xlu0 %3978, %v6497_v30  }
 0x54a   : > { %3544 = vmatmul.mubr.msk.f32.gmra.mxu0 %vm784_vm3, %v2393_v27  ;;  %3847 = vmatpush3.msra.mxu1 %v2872_v41 }
 0x54b   : > { %v2362_v51 = vpop.permute.xlu0 %2361  ;;  %2605 = vmatprep.mubr.f32.mxu0 %v7209_v19 }
 0x54c   : > { %v2394_v57 = vmax.f32 %v6262_v34, %v2362_v51  ;;  %v2871_v34 = vld [vmem:[%s7152_s7 + $0x60] sm:$0xff]  ;;  %3053 = vperm.xlu1 %3975, %v6456_v4  }
 0x54d   : > { %3848 = vmatprep.subr.mxu1 %v2871_v34  ;;  %3245 = vperm.xlu0 %3978, %v6440_v13  }
 0x54e   : > { %3545 = vmatmul.mubr.msk.f32.gmra.mxu0 %vm784_vm3, %v2394_v57  ;;  %3849 = vmatpush3.msra.mxu1 %v2871_v34 }
 0x54f   : > { %3850 = vmatprep.subr.mxu1 %v2870_v11 }
 0x550   : > { %3851 = vmatpush3.msra.mxu1 %v2870_v11  ;;  %3061 = vperm.xlu1 %3975, %v6497_v30  }
 0x551   : > { %3852 = vmatprep.subr.mxu1 %v2869_v22  ;;  %3253 = vperm.xlu0 %3978, %v6476_v6  }
 0x552   : > { %3853 = vmatpush3.msra.mxu1 %v2869_v22 }
 0x553   : > { %3854 = vmatprep.subr.mxu1 %v2868_v10 }
 0x554   : > { %3855 = vmatpush3.msra.mxu1 %v2868_v10  ;;  %v6608_v35 = vpop.permute.xlu1 %2613  ;;  %3069 = vperm.xlu1 %3975, %v6440_v13   ;;  %v7210_v13 = vmov 0  }
 0x555   : > { %3856 = vmatprep.subr.mxu1 %v2867_v56  ;;  %3979 = vset.pattern.permute.xlu0 %v7210_v13 }
 0x556   : > { %3857 = vmatpush3.msra.mxu1 %v2867_v56 }
 0x557   : > { %3858 = vmatprep.subr.mxu1 %v2866_v36 }
 0x558   : > { %3859 = vmatpush3.msra.mxu1 %v2866_v36  ;;  %v6610_v19 = vpop.permute.xlu1 %2617  ;;  %3077 = vperm.xlu1 %3975, %v6476_v6  }
 0x559   : > { %3860 = vmatprep.subr.mxu1 %v2865_v46 }
 0x55a   : > { %3861 = vmatpush3.msra.mxu1 %v2865_v46 }
 0x55b   : > { %3862 = vmatprep.subr.mxu1 %v2864_v60 }
 0x55c   : > { %3863 = vmatpush3.msra.mxu1 %v2864_v60  ;;  %3977 = vset.pattern.permute.xlu1 %v4150_v32 }
 0x55d   : > { %3864 = vmatprep.subr.mxu1 %v2863_v37  ;;  %v6614_v50 = vpop.permute.xlu1 %2729  ;;  %3197 = vperm.xlu1 %3977, %v6391_v39  }
 0x55e   : > { %3865 = vmatpush3.msra.mxu1 %v2863_v37 }
 0x55f   : > { %3866 = vmatprep.subr.mxu1 %v2862_v38 }
 0x560   : > { %3867 = vmatpush3.msra.mxu1 %v2862_v38 }
 0x561   : > { %3868 = vmatprep.subr.mxu1 %v2861_v59  ;;  %v6620_v24 = vpop.permute.xlu1 %2733  ;;  %3205 = vperm.xlu1 %3977, %v6403_v18  }
 0x562   : > { %3869 = vmatpush3.msra.mxu1 %v2861_v59 }
 0x563   : > { %3870 = vmatprep.subr.mxu1 %v2860_v43 }
 0x564   : > { %3871 = vmatpush3.msra.mxu1 %v2860_v43 }
 0x565   : > { %3872 = vmatprep.subr.mxu1 %v2859_v61  ;;  %3209 = vperm.xlu1 %3977, %v6414_v14   ;;  %v2622_v14 = vpop.permute.xlu0 %2621 }
 0x566   : > { %3873 = vmatpush3.msra.mxu1 %v2859_v61  ;;  %v6624_v26 = vpop.permute.xlu1 %2625 }
 0x569   : > { %3217 = vperm.xlu1 %3977, %v6449_v2   ;;  %v2726_v15 = vpop.permute.xlu0 %2725 }
 0x56a   : > { %v6630_v23 = vpop.permute.xlu1 %2629 }
 0x56d   : > { %3225 = vperm.xlu1 %3977, %v6470_v53   ;;  %v2738_v27 = vpop.permute.xlu0 %2737 }
 0x56f   : > { %v6638_v8 = vpop.permute.xlu1 %2741 }
 0x571   : > { %3233 = vperm.xlu1 %3977, %v6428_v12  }
 0x573   : > { %v6649_v21 = vpop.permute.xlu1 %2745 }
 0x575   : > { %3241 = vperm.xlu1 %3977, %v6464_v33   ;;  %v2750_v33 = vpop.permute.xlu0 %2749 }
 0x578   : > { %v6660_v54 = vpop.permute.xlu1 %2637 }
 0x579   : > { %3249 = vperm.xlu1 %3977, %v6521_v58   ;;  %v6732_v56 = vpop.permute.xlu0 %2761 }
 0x57c   : > { %v6670_v48 = vpop.permute.xlu1 %2641 }
 0x57d   : > { %3257 = vperm.xlu1 %3977, %v6485_v49  }
 0x581   : > { %v6682_v18 = vpop.permute.xlu1 %2753 }
 0x585   : > { %v6692_v55 = vpop.permute.xlu1 %2757 }
 0x58a   : > { %v6703_v53 = vpop.permute.xlu1 %2649 }
 0x58e   : > { %v6712_v12 = vpop.permute.xlu1 %2653 }
 0x593   : > { %v6722_v34 = vpop.permute.xlu1 %2765 }
 0x597   : > { %v6740_v38 = vpop.permute.xlu1 %2769 }
 0x5d2   : > { %v6632_v52 = vpop.f32.mrf.mxu0 }
 0x5d4   : > { %v6636_v47 = vpop.f32.mrf.mxu0 }
 0x5d5   : > { %v2692_v58 = vrot.slane %v6636_v47, 6 }
 0x5d6   : > { %v6640_v40 = vpop.f32.mrf.mxu0 }
 0x5d7   : > { %v2677_v31 = vmul.f32 %v6610_v19, %v6640_v40  ;;  %v6767_v40 = vld [vmem:[%s7151_s6] ss:$0 sm:$0xff] }
 0x5d8   : > { %v6643_v1 = vpop.f32.mrf.mxu0 }
 0x5d9   : > { %v2693_v41 = vrot.slane %v6643_v1, 6  ;;  %v6752_v1 = vpop.permute.xlu0 %2773 }
 0x5da   : > { %v6646_v9 = vpop.f32.mrf.mxu0 }
 0x5db   : > { %v2722_v49 = vsel %vm1326_vm6, %v2692_v58, %v2693_v41  ;;  %v2678_v13 = vmul.f32 %v2622_v14, %v6646_v9 }
 0x5dc   : > { %v6651_v16 = vpop.f32.mrf.mxu0  ;;  %v2789_v43 = vmul.f32 %v6614_v50, %v2722_v49  ;;  %v6769_v49 = vpop.permute.xlu1 %2661 }
 0x5dd   : > { %v2694_v22 = vrot.slane %v6651_v16, 6 }
 0x5de   : > { %v6654_v42 = vpop.f32.mrf.mxu0  ;;  %v2805_v50 = vadd.f32 %v2789_v43, %v2677_v31  ;;  %v2634_v43 = vpop.permute.xlu0 %2633 }
 0x5df   : > { %v2721_v60 = vsel %vm1326_vm6, %v2693_v41, %v2694_v22 }
 0x5e0   : > { %v6656_v25 = vpop.f32.mrf.mxu0  ;;  %v2790_v47 = vmul.f32 %v6620_v24, %v2721_v60  ;;  %v2676_v24 = vmul.f32 %v6608_v35, %v6632_v52  ;;  %v2679_v35 = vmul.f32 %v6624_v26, %v6654_v42  ;;  %v2828_v60 = vadd.f32 %v6767_v40, %v2805_v50 }
 0x5e1   : > { %v2695_v46 = vrot.slane %v6656_v25, 6 }
 0x5e2   : > { %v6662_v45 = vpop.f32.mrf.mxu0 }
 0x5e3   : > { %v2720_v32 = vsel %vm1326_vm6, %v2694_v22, %v2695_v46 }
 0x5e4   : > { %v6664_v29 = vpop.f32.mrf.mxu0  ;;  %v2791_v22 = vmul.f32 %v2738_v27, %v2720_v32 }
 0x5e5   : > { %v2696_v37 = vrot.slane %v6664_v29, 6 }
 0x5e6   : > { %v6668_v3 = vpop.f32.mrf.mxu0  ;;  %v2807_v31 = vadd.f32 %v2791_v22, %v2679_v35 }
 0x5e7   : > { %v2719_v16 = vsel %vm1326_vm6, %v2695_v46, %v2696_v37 }
 0x5e8   : > { %v6672_v62 = vpop.f32.mrf.mxu0 }
 0x5e9   : > { %v2697_v25 = vrot.slane %v6672_v62, 6  ;;  %v2792_v62 = vmul.f32 %v6638_v8, %v2719_v16  ;;  %v2680_v8 = vmul.f32 %v6630_v23, %v6662_v45  ;;  %v6794_v45 = vpop.permute.xlu1 %2665  ;;  %v2844_v16 = vmax.f32 %v2828_v60, 0.0 }
 0x5ea   : > { %v6676_v39 = vpop.f32.mrf.mxu0 }
 0x5eb   : > { %v2718_v52 = vsel %vm1326_vm6, %v2696_v37, %v2697_v25  ;;  %v2682_v50 = vmul.f32 %v6660_v54, %v6676_v39 }
 0x5ec   : > { %v6678_v63 = vpop.f32.mrf.mxu0 }
 0x5ed   : > { %v2698_v41 = vrot.slane %v6678_v63, 6  ;;  %v2806_v63 = vadd.f32 %v2790_v47, %v2678_v13  ;;  %v2793_v47 = vmul.f32 %v6649_v21, %v2718_v52 }
 0x5ee   : > { %v6684_v4 = vpop.f32.mrf.mxu0 }
 0x5ef   : > { %v2829_v42 = vadd.f32 %v6767_v40, %v2806_v63  ;;  %v2778_v63 = vpop.permute.xlu1 %2777 }
 0x5f0   : > { %v6686_v20 = vpop.f32.mrf.mxu0 }
 0x5f1   : > { %v2699_v46 = vrot.slane %v6686_v20, 6  ;;  %v2717_v20 = vsel %vm1326_vm6, %v2697_v25, %v2698_v41  ;;  %v2681_v25 = vmul.f32 %v2634_v43, %v6668_v3  ;;  %v2845_v22 = vmax.f32 %v2829_v42, 0.0 }
 0x5f2   : > { %v6690_v30 = vpop.f32.mrf.mxu0  ;;  %v2683_v3 = vmul.f32 %v6670_v48, %v6684_v4 }
 0x5f3   : > { %v2716_v26 = vsel %vm1326_vm6, %v2698_v41, %v2699_v46  ;;  %v2782_v42 = vpop.permute.xlu1 %2781 }
 0x5f4   : > { %v6694_v28 = vpop.f32.mrf.mxu0  ;;  %v2795_v13 = vmul.f32 %v6682_v18, %v2716_v26 }
 0x5f5   : > { %v2700_v14 = vrot.slane %v6694_v28, 6  ;;  %v2808_v28 = vadd.f32 %v2792_v62, %v2680_v8 }
 0x5f6   : > { %v6698_v2 = vpop.f32.mrf.mxu0  ;;  %v2811_v52 = vadd.f32 %v2795_v13, %v2683_v3 }
 0x5f7   : > { %v2715_v37 = vsel %vm1326_vm6, %v2699_v46, %v2700_v14  ;;  %v2831_v62 = vadd.f32 %v6767_v40, %v2808_v28  ;;  %v2809_v46 = vadd.f32 %v2793_v47, %v2681_v25 }
 0x5f8   : > { %v6700_v5 = vpop.f32.mrf.mxu0 }
 0x5f9   : > { %v2701_v23 = vrot.slane %v6700_v5, 6  ;;  %v2796_v5 = vmul.f32 %v6692_v55, %v2715_v37  ;;  %v2847_v4 = vmax.f32 %v2831_v62, 0.0 }
 0x5fa   : > { %v6705_v6 = vpop.f32.mrf.mxu0 }
 0x5fc   : > { %v6707_v17 = vpop.f32.mrf.mxu0 }
 0x5fd   : > { %v2702_v21 = vrot.slane %v6707_v17, 6  ;;  %v2714_v17 = vsel %vm1326_vm6, %v2700_v14, %v2701_v23  ;;  %v2832_v14 = vadd.f32 %v6767_v40, %v2809_v46 }
 0x5fe   : > { %v6710_v51 = vpop.f32.mrf.mxu0  ;;  %v2797_v48 = vmul.f32 %v6732_v56, %v2714_v17 }
 0x600   : > { %v6714_v57 = vpop.f32.mrf.mxu0 }
 0x601   : > { %v2703_v54 = vrot.slane %v6714_v57, 6 }
 0x602   : > { %v6717_v0 = vpop.f32.mrf.mxu0 }
 0x604   : > { %v6719_v44 = vpop.f32.mrf.mxu0 }
 0x605   : > { %v2704_v55 = vrot.slane %v6719_v44, 6 }
 0x606   : > { %v6724_v11 = vpop.f32.mrf.mxu0 }
 0x607   : > { %v2711_v56 = vsel %vm1326_vm6, %v2703_v54, %v2704_v55 }
 0x608   : > { %v6728_v10 = vpop.f32.mrf.mxu0 }
 0x609   : > { %v2705_v8 = vrot.slane %v6728_v10, 6  ;;  %v2848_v10 = vmax.f32 %v2832_v14, 0.0 }
 0x60a   : > { %v6734_v36 = vpop.f32.mrf.mxu0 }
 0x60c   : > { %v6742_v59 = vpop.f32.mrf.mxu0 }
 0x60d   : > { %v2706_v43 = vrot.slane %v6742_v59, 6 }
 0x60e   : > { %v6745_v61 = vpop.f32.mrf.mxu0 }
 0x610   : > { %v6757_v29 = vpop.f32.mrf.mxu0 }
 0x611   : > { %v2707_v19 = vrot.slane %v6757_v29, 6 }
 0x613   : > { %v2723_v9 = vsel %vm1326_vm6, %v2707_v19, %v2692_v58 }
 0x614   : > { %v2788_v27 = vmul.f32 %v2726_v15, %v2723_v9  ;;  %v2794_v15 = vmul.f32 %v2750_v33, %v2717_v20  ;;  %v2646_v33 = vpop.permute.xlu0 %2645  ;;  %v2713_v9 = vsel %vm1326_vm6, %v2701_v23, %v2702_v21  ;;  %v2685_v20 = vmul.f32 %v6703_v53, %v6698_v2 }
 0x615   : > { %v2684_v18 = vmul.f32 %v2646_v33, %v6690_v30  ;;  %v2712_v30 = vsel %vm1326_vm6, %v2702_v21, %v2703_v54  ;;  %v2800_v2 = vmul.f32 %v6752_v1, %v2711_v56  ;;  %v2710_v53 = vsel %vm1326_vm6, %v2704_v55, %v2705_v8  ;;  %v2674_v33 = vpop.permute.xlu1 %2673 }
 0x616   : > { %v2804_v58 = vadd.f32 %v2788_v27, %v2676_v24  ;;  %v2830_v24 = vadd.f32 %v6767_v40, %v2807_v31  ;;  %v2810_v39 = vadd.f32 %v2794_v15, %v2682_v50  ;;  %v2798_v27 = vmul.f32 %v6722_v34, %v2713_v9 }
 0x617   : > { %v2812_v57 = vadd.f32 %v2796_v5, %v2684_v18  ;;  %v2686_v34 = vmul.f32 %v6712_v12, %v6705_v6  ;;  %v2799_v31 = vmul.f32 %v6740_v38, %v2712_v30  ;;  %v2813_v26 = vadd.f32 %v2797_v48, %v2685_v20 }
 0x618   : > { %v2827_v32 = vadd.f32 %v6767_v40, %v2804_v58  ;;  %v2846_v35 = vmax.f32 %v2830_v24, 0.0  ;;  %v2658_v60 = vpop.permute.xlu0 %2657  ;;  %v2833_v44 = vadd.f32 %v6767_v40, %v2810_v39  ;;  %v2834_v58 = vadd.f32 %v6767_v40, %v2811_v52 }
 0x619   : > { %v2835_v47 = vadd.f32 %v6767_v40, %v2812_v57  ;;  %v2814_v15 = vadd.f32 %v2798_v27, %v2686_v34  ;;  %v2687_v6 = vmul.f32 %v2658_v60, %v6710_v51  ;;  %v2709_v12 = vsel %vm1326_vm6, %v2705_v8, %v2706_v43 }
 0x61a   : > { %v2843_v41 = vmax.f32 %v2827_v32, 0.0  ;;  %v2849_v28 = vmax.f32 %v2833_v44, 0.0  ;;  %v2688_v38 = vmul.f32 %v6769_v49, %v6717_v0  ;;  %v2850_v37 = vmax.f32 %v2834_v58, 0.0 }
 0x61b   : > { %v2801_v23 = vmul.f32 %v2778_v63, %v2710_v53  ;;  %v2851_v1 = vmax.f32 %v2835_v47, 0.0  ;;  %v2836_v32 = vadd.f32 %v6767_v40, %v2813_v26  ;;  %v2802_v25 = vmul.f32 %v2782_v42, %v2709_v12 }
 0x61c   : > { %3874 = vmatprep.mubr.f32.mxu1 %v2843_v41  ;;  %v2670_v59 = vpop.permute.xlu0 %2669  ;;  %v2708_v51 = vsel %vm1326_vm6, %v2706_v43, %v2707_v19  ;;  %v2837_v50 = vadd.f32 %v6767_v40, %v2814_v15  ;;  %v2816_v13 = vadd.f32 %v2800_v2, %v2688_v38  ;;  %v2689_v0 = vmul.f32 %v6794_v45, %v6724_v11 }
 0x61d   : > { %3875 = vmatmul.mubr.f32.vlgmr.msra.gmra.mxu1 %v2844_v16  ;;  %v2815_v16 = vadd.f32 %v2799_v31, %v2687_v6  ;;  %v2690_v49 = vmul.f32 %v2670_v59, %v6734_v36  ;;  %v2852_v24 = vmax.f32 %v2836_v32, 0.0  ;;  %v2691_v46 = vmul.f32 %v2674_v33, %v6745_v61  ;;  %v3547_v31 = vld [vmem:[#allocation2] ss:$0 sm:$0xff] }
 0x61e   : > { %3877 = vmatprep.mubr.f32.mxu1 %v2845_v22  ;;  %v2817_v29 = vadd.f32 %v2801_v23, %v2689_v0  ;;  %v2853_v22 = vmax.f32 %v2837_v50, 0.0  ;;  %v2839_v19 = vadd.f32 %v6767_v40, %v2816_v13 }
 0x61f   : > { %v2838_v5 = vadd.f32 %v6767_v40, %v2815_v16  ;;  %v2818_v62 = vadd.f32 %v2802_v25, %v2690_v49 }
 0x620   : > { %v2786_v21 = vpop.permute.xlu0 %2785  ;;  %v2840_v45 = vadd.f32 %v6767_v40, %v2817_v29  ;;  %v2855_v36 = vmax.f32 %v2839_v19, 0.0 }
 0x621   : > { %3878 = vmatmul.mubr.f32.gmra.mxu1 %v2846_v35  ;;  %v2803_v41 = vmul.f32 %v2786_v21, %v2708_v51  ;;  %v2854_v11 = vmax.f32 %v2838_v5, 0.0  ;;  %v2841_v17 = vadd.f32 %v6767_v40, %v2818_v62 }
 0x622   : > { %3880 = vmatprep.mubr.f32.mxu1 %v2847_v4  ;;  %v2856_v54 = vmax.f32 %v2840_v45, 0.0  ;;  %v6880_v4 = vpop.permute.xlu1 %3021 }
 0x623   : > { %v2819_v3 = vadd.f32 %v2803_v41, %v2691_v46  ;;  %v2857_v18 = vmax.f32 %v2841_v17, 0.0 }
 0x624   : > { %v3030_v47 = vpop.permute.xlu0 %3029 }
 0x625   : > { %3881 = vmatmul.mubr.f32.gmra.mxu1 %v2848_v10  ;;  %v2842_v39 = vadd.f32 %v6767_v40, %v2819_v3 }
 0x626   : > { %3883 = vmatprep.mubr.f32.mxu1 %v2849_v28  ;;  %v6894_v60 = vpop.permute.xlu1 %3025 }
 0x627   : > { %v2858_v9 = vmax.f32 %v2842_v39, 0.0 }
 0x628   : > { %v3042_v2 = vpop.permute.xlu0 %3041 }
 0x629   : > { %3884 = vmatmul.mubr.f32.gmra.mxu1 %v2850_v37 }
 0x62a   : > { %3886 = vmatprep.mubr.f32.mxu1 %v2851_v1  ;;  %v6908_v20 = vpop.permute.xlu1 %3033 }
 0x62c   : > { %v3050_v42 = vpop.permute.xlu0 %3049 }
 0x62d   : > { %3887 = vmatmul.mubr.f32.gmra.mxu1 %v2852_v24 }
 0x62e   : > { %3889 = vmatprep.mubr.f32.mxu1 %v2853_v22  ;;  %v6918_v34 = vpop.permute.xlu1 %3037 }
 0x630   : > { %v3058_v28 = vpop.permute.xlu0 %3057 }
 0x631   : > { %3890 = vmatmul.mubr.f32.gmra.mxu1 %v2854_v11 }
 0x632   : > { %3892 = vmatprep.mubr.f32.mxu1 %v2855_v36  ;;  %v3046_v10 = vpop.permute.xlu1 %3045 }
 0x634   : > { %v3066_v6 = vpop.permute.xlu0 %3065 }
 0x635   : > { %3893 = vmatmul.mubr.f32.gmra.mxu1 %v2856_v54 }
 0x636   : > { %3895 = vmatprep.mubr.f32.mxu1 %v2857_v18  ;;  %v6926_v26 = vpop.permute.xlu1 %3053 }
 0x638   : > { %v6934_v38 = vpop.permute.xlu0 %3073 }
 0x639   : > { %3896 = vmatmul.mubr.f32.gmra.mxu1 %v2858_v9 }
 0x63a   : > { %v6928_v53 = vpop.permute.xlu1 %3061 }
 0x63c   : > { %v6936_v23 = vpop.permute.xlu0 %3081 }
 0x63e   : > { %v6930_v59 = vpop.permute.xlu1 %3069 }
 0x640   : > { %v6940_v32 = vpop.permute.xlu0 %3201 }
 0x642   : > { %v6932_v15 = vpop.permute.xlu1 %3077 }
 0x644   : > { %v6944_v25 = vpop.permute.xlu0 %3213 }
 0x646   : > { %v3198_v12 = vpop.permute.xlu1 %3197 }
 0x648   : > { %v6948_v21 = vpop.permute.xlu0 %3221 }
 0x64a   : > { %v3206_v37 = vpop.permute.xlu1 %3205 }
 0x64c   : > { %v6952_v13 = vpop.permute.xlu0 %3229 }
 0x64e   : > { %v6938_v1 = vpop.permute.xlu1 %3209 }
 0x650   : > { %v6956_v49 = vpop.permute.xlu0 %3237 }
 0x652   : > { %v6942_v16 = vpop.permute.xlu1 %3217 }
 0x654   : > { %v6960_v41 = vpop.permute.xlu0 %3245 }
 0x655   : > { %7213 = vst [vmem:[#allocation8_spill] sm:$0xff] %v6960_v41 }
 0x656   : > { %v6946_v51 = vpop.permute.xlu1 %3225 }
 0x658   : > { %v6964_v5 = vpop.permute.xlu0 %3253 }
 0x659   : > { %7215 = vst [vmem:[#allocation10_spill] sm:$0xff] %v6964_v5 }
 0x65a   : > { %v6950_v50 = vpop.permute.xlu1 %3233 }
 0x65e   : > { %v6954_v0 = vpop.permute.xlu1 %3241 }
 0x65f   : > { %7211 = vst [vmem:[#allocation6_spill] sm:$0xff] %v6954_v0 }
 0x662   : > { %v6958_v33 = vpop.permute.xlu1 %3249 }
 0x663   : > { %7212 = vst [vmem:[#allocation7_spill] sm:$0xff] %v6958_v33 }
 0x666   : > { %v6962_v24 = vpop.permute.xlu1 %3257 }
 0x667   : > { %7214 = vst [vmem:[#allocation9_spill] sm:$0xff] %v6962_v24 }
 0x6dd   : > { %v6854_v61 = vpop.f32.mrf.mxu1 }
 0x6de   : > { %3118 = vrot.lane.b32.xlu1 %v6854_v61, %s4144_s28 }
 0x6df   : > { %v6858_v55 = vpop.f32.mrf.mxu1 }
 0x6e0   : > { %3116 = vrot.lane.b32.xlu0 %v6858_v55, %s4144_s28 }
 0x6e1   : > { %v6862_v63 = vpop.f32.mrf.mxu1 }
 0x6e2   : > { %3122 = vrot.lane.b32.xlu1 %v6862_v63, %s4144_s28 }
 0x6e3   : > { %v6866_v40 = vpop.f32.mrf.mxu1 }
 0x6e4   : > { %3120 = vrot.lane.b32.xlu0 %v6866_v40, %s4144_s28  ;;  %v3086_v36 = vmul.f32 %v3030_v47, %v6866_v40  ;;  %v3085_v40 = vmul.f32 %v6854_v61, %v6894_v60  ;;  %v3084_v47 = vmul.f32 %v6880_v4, %v6858_v55 }
 0x6e5   : > { %v6870_v35 = vpop.f32.mrf.mxu1 }
 0x6e6   : > { %3126 = vrot.lane.b32.xlu1 %v6870_v35, %s4144_s28 }
 0x6e7   : > { %v6874_v52 = vpop.f32.mrf.mxu1 }
 0x6e8   : > { %3124 = vrot.lane.b32.xlu0 %v6874_v52, %s4144_s28 }
 0x6e9   : > { %v6878_v48 = vpop.f32.mrf.mxu1 }
 0x6ea   : > { %3130 = vrot.lane.b32.xlu1 %v6878_v48, %s4144_s28  ;;  %v3091_v60 = vmul.f32 %v6878_v48, %v3050_v42 }
 0x6eb   : > { %v6884_v14 = vpop.f32.mrf.mxu1 }
 0x6ec   : > { %3128 = vrot.lane.b32.xlu0 %v6884_v14, %s4144_s28  ;;  %v3090_v55 = vmul.f32 %v3046_v10, %v6884_v14 }
 0x6ed   : > { %v6888_v57 = vpop.f32.mrf.mxu1 }
 0x6ee   : > { %3134 = vrot.lane.b32.xlu1 %v6888_v57, %s4144_s28 }
 0x6ef   : > { %v6892_v27 = vpop.f32.mrf.mxu1 }
 0x6f0   : > { %3132 = vrot.lane.b32.xlu0 %v6892_v27, %s4144_s28 }
 0x6f1   : > { %v6898_v30 = vpop.f32.mrf.mxu1 }
 0x6f2   : > { %3138 = vrot.lane.b32.xlu1 %v6898_v30, %s4144_s28 }
 0x6f3   : > { %v6902_v8 = vpop.f32.mrf.mxu1 }
 0x6f4   : > { %3136 = vrot.lane.b32.xlu0 %v6902_v8, %s4144_s28 }
 0x6f5   : > { %v6906_v44 = vpop.f32.mrf.mxu1 }
 0x6f6   : > { %3142 = vrot.lane.b32.xlu1 %v6906_v44, %s4144_s28 }
 0x6f7   : > { %v6912_v56 = vpop.f32.mrf.mxu1 }
 0x6f8   : > { %3140 = vrot.lane.b32.xlu0 %v6912_v56, %s4144_s28 }
 0x6f9   : > { %v6916_v43 = vpop.f32.mrf.mxu1 }
 0x6fa   : > { %3146 = vrot.lane.b32.xlu1 %v6916_v43, %s4144_s28 }
 0x6fb   : > { %v6922_v58 = vpop.f32.mrf.mxu1 }
 0x6fc   : > { %3144 = vrot.lane.b32.xlu0 %v6922_v58, %s4144_s28  ;;  %s353_s28 = sand.u32 1, %s4128_s16  }
 0x6fd   : > { %s3510_s14 = sshll.u32 %s353_s28, 7  ;;  %s7105_s8 = scalar_lea.sflag [#allocation4], %s353_s28 }
 0x6fe   : > { %s7060_s13 = scalar_lea.vmem [#allocation3], %s3510_s14 }
 0x6ff   : > { %s3444_s19 = sshll.u32 %s7060_s13, 4  ;;  %s7095_s19 = int_to_ptr.vmem [resolvable:$true] %s3444_s19 }
 0x700   : > { %3299 = vperm.xlu0 %3979, %v3547_v31   ;;  %s4076_s27 = scalar_lea.vmem %s7095_s19, 2048  ;;  %p4083_p0 = scmp.lt.s32.totalorder %s7095_s19, %s4081_s30 }
 0x701   : > { %p4077_p11 = scmp.ne.s32.totalorder %s7095_s19, %s4076_s27  ;;  %p4084_p1 = scmp.lt.s32.totalorder %s4082_s12, %s4076_s27 }
 0x703   : > { %p4078_p12 = pnand %p4077_p11, %p4250_p5  ;;  %p4085_p2 = por %p4084_p1, %p4083_p0 }
 0x705   : > { %p4079_p13 = pneg %p4078_p12 }
 0x707   : > { %p4086_p3 = pnand %p4085_p2, %p4079_p13 }
 0x750   : > { %v3119_v29 = vpop.permute.xlu1 %3118 }
 0x751   : > { %v3165_v46 = vrot.slane %v3119_v29, 7 }
 0x752   : > { %v3117_v22 = vpop.permute.xlu0 %3116 }
 0x753   : > { %v3164_v41 = vrot.slane %v3117_v22, 7  ;;  %v3088_v22 = vmul.f32 %v6918_v34, %v6874_v52  ;;  %v3092_v52 = vmul.f32 %v6926_v26, %v6892_v27  ;;  %v3095_v34 = vmul.f32 %v6898_v30, %v3066_v6 }
 0x754   : > { %v3123_v19 = vpop.permute.xlu1 %3122  ;;  %v3096_v6 = vmul.f32 %v6930_v59, %v6912_v56  ;;  %v3099_v56 = vmul.f32 %v6916_v43, %v6936_v23  ;;  %v3098_v59 = vmul.f32 %v6932_v15, %v6922_v58 }
 0x756   : > { %v3121_v62 = vpop.permute.xlu0 %3120 }
 0x757   : > { %v3166_v3 = vrot.slane %v3121_v62, 7 }
 0x758   : > { %v3127_v11 = vpop.permute.xlu1 %3126 }
 0x759   : > { %v3193_v45 = vsel %vm413_vm1, %v3165_v46, %v3166_v3 }
 0x75a   : > { %v3262_v17 = vmul.f32 %v3206_v37, %v3193_v45  ;;  %v3125_v54 = vpop.permute.xlu0 %3124  ;;  %v3087_v37 = vmul.f32 %v6862_v63, %v6908_v20  ;;  %v3089_v45 = vmul.f32 %v6870_v35, %v3042_v2  ;;  %v3093_v63 = vmul.f32 %v6888_v57, %v3058_v28 }
 0x75b   : > { %v3194_v35 = vsel %vm413_vm1, %v3164_v41, %v3165_v46  ;;  %v3169_v2 = vrot.slane %v3127_v11, 7  ;;  %v3094_v57 = vmul.f32 %v6928_v53, %v6902_v8 }
 0x75c   : > { %v6969_v39 = vadd.f32 %v3262_v17, %v3086_v36  ;;  %v3131_v18 = vpop.permute.xlu1 %3130  ;;  %v3168_v36 = vrot.slane %v3125_v54, 7  ;;  %v3261_v27 = vmul.f32 %v6940_v32, %v3194_v35 }
 0x75d   : > { %v3171_v42 = vrot.slane %v3131_v18, 7 }
 0x75e   : > { %7216 = vst [vmem:[#allocation11_spill] sm:$0xff] %v6969_v39  ;;  %v3129_v9 = vpop.permute.xlu0 %3128  ;;  %v3167_v39 = vrot.slane %v3123_v19, 7  ;;  %v3190_v10 = vsel %vm413_vm1, %v3168_v36, %v3169_v2  ;;  %v3277_v19 = vadd.f32 %v3261_v27, %v3085_v40 }
 0x760   : > { %v3135_v31 = vpop.permute.xlu1 %3134  ;;  %v3192_v20 = vsel %vm413_vm1, %v3166_v3, %v3167_v39  ;;  %v3191_v48 = vsel %vm413_vm1, %v3167_v39, %v3168_v36 }
 0x761   : > { %v3263_v30 = vmul.f32 %v6938_v1, %v3192_v20  ;;  %v3173_v26 = vrot.slane %v3135_v31, 7  ;;  %v3264_v8 = vmul.f32 %v6944_v25, %v3191_v48 }
 0x762   : > { %v3133_v5 = vpop.permute.xlu0 %3132 }
 0x763   : > { %v3172_v54 = vrot.slane %v3133_v5, 7  ;;  %v3265_v5 = vmul.f32 %v6942_v16, %v3190_v10  ;;  %v3279_v16 = vadd.f32 %v3263_v30, %v3087_v37  ;;  %v3280_v3 = vadd.f32 %v3264_v8, %v3088_v22  ;;  %v7220_v37 = vld [vmem:[#allocation6_spill] sm:$0xff] }
 0x764   : > { %v6971_v24 = vpop.permute.xlu1 %3138 }
 0x765   : > { %v3175_v25 = vrot.slane %v6971_v24, 7  ;;  %v3281_v23 = vadd.f32 %v3265_v5, %v3089_v45 }
 0x766   : > { %v3137_v29 = vpop.permute.xlu0 %3136 }
 0x767   : > { %v3174_v14 = vrot.slane %v3137_v29, 7 }
 0x768   : > { %v6973_v33 = vpop.permute.xlu1 %3142 }
 0x769   : > { %7217 = vst [vmem:[#allocation12_spill] sm:$0xff] %v6973_v33  ;;  %v3170_v33 = vrot.slane %v3129_v9, 7  ;;  %v3185_v1 = vsel %vm413_vm1, %v3173_v26, %v3174_v14  ;;  %v3184_v39 = vsel %vm413_vm1, %v3174_v14, %v3175_v25  ;;  %v7223_v14 = vld [vmem:[#allocation7_spill] sm:$0xff] }
 0x76a   : > { %v3141_v4 = vpop.permute.xlu0 %3140  ;;  %v3270_v43 = vmul.f32 %v6956_v49, %v3185_v1  ;;  %v3271_v36 = vmul.f32 %v7220_v37, %v3184_v39 }
 0x76b   : > { %v3189_v28 = vsel %vm413_vm1, %v3169_v2, %v3170_v33  ;;  %v3188_v53 = vsel %vm413_vm1, %v3170_v33, %v3171_v42  ;;  %v3176_v33 = vrot.slane %v3141_v4, 7 }
 0x76c   : > { %v6975_v62 = vpop.permute.xlu1 %3146  ;;  %v3286_v49 = vadd.f32 %v3270_v43, %v3094_v57  ;;  %v3287_v48 = vadd.f32 %v3271_v36, %v3095_v34 }
 0x76d   : > { %v7179_v0 = vrot.slane %v6975_v62, 7  ;;  %v3183_v31 = vsel %vm413_vm1, %v3175_v25, %v3176_v33  ;;  %v7222_v4 = vrot.slane %v6975_v62, 7 }
 0x76e   : > { %v3145_v32 = vpop.permute.xlu0 %3144 }
 0x76f   : > { %v3195_v17 = vsel %vm413_vm1, %v7179_v0, %v3164_v41  ;;  %v3187_v41 = vsel %vm413_vm1, %v3171_v42, %v3172_v54  ;;  %v3178_v24 = vrot.slane %v3145_v32, 7 }
 0x770   : > { %v3260_v61 = vmul.f32 %v3198_v12, %v3195_v17  ;;  %v7011_v12 = vmul.f32 %v6906_v44, %v6934_v38  ;;  %v3266_v44 = vmul.f32 %v6948_v21, %v3189_v28  ;;  %v3186_v38 = vsel %vm413_vm1, %v3172_v54, %v3173_v26  ;;  %v7218_v58 = vld [vmem:[#allocation12_spill] sm:$0xff]  ;;  %v7224_v28 = vld [vmem:[#allocation10_spill] sm:$0xff]  ;;  %v7225_v26 = vld [vmem:[#allocation9_spill] sm:$0xff] }
 0x771   : > { %v3267_v21 = vmul.f32 %v6946_v51, %v3188_v53  ;;  %v3268_v46 = vmul.f32 %v6952_v13, %v3187_v41  ;;  %v3269_v11 = vmul.f32 %v6950_v50, %v3186_v38  ;;  %v3177_v15 = vrot.slane %v7218_v58, 7  ;;  %v7219_v13 = vld [vmem:[#allocation11_spill] sm:$0xff] }
 0x772   : > { %v3276_v0 = vadd.f32 %v3260_v61, %v3084_v47  ;;  %v3282_v18 = vadd.f32 %v3266_v44, %v3090_v55  ;;  %v7221_v55 = vld [vmem:[#allocation8_spill] sm:$0xff] }
 0x773   : > { %v3283_v47 = vadd.f32 %v3267_v21, %v3091_v60  ;;  %v3284_v50 = vadd.f32 %v3268_v46, %v3092_v52  ;;  %v3285_v22 = vadd.f32 %v3269_v11, %v3093_v63  ;;  %v3182_v45 = vsel %vm413_vm1, %v3176_v33, %v3177_v15 }
 0x774   : > { %v3272_v35 = vmul.f32 %v7221_v55, %v3183_v31  ;;  %v3181_v60 = vsel %vm413_vm1, %v3177_v15, %v3178_v24  ;;  %v3273_v57 = vmul.f32 %v7223_v14, %v3182_v45 }
 0x775   : > { %v3274_v27 = vmul.f32 %v7224_v28, %v3181_v60 }
 0x776   : > { %v3288_v41 = vadd.f32 %v3272_v35, %v3096_v6  ;;  %v3289_v34 = vadd.f32 %v3273_v57, %v7011_v12 }
 0x777   : > { %v3290_v32 = vadd.f32 %v3274_v27, %v3098_v59 }
 0x77b   : > { %v3300_v9 = vpop.permute.xlu0 %3299 }
 0x77c   : > { %v3302_v51 = vadd.f32 %v3300_v9, %v3276_v0  ;;  %v3303_v29 = vadd.f32 %v3300_v9, %v3277_v19  ;;  %v3304_v40 = vadd.f32 %v3300_v9, %v7219_v13  ;;  %v3305_v17 = vadd.f32 %v3300_v9, %v3279_v16 }
 0x77d   : > { %v3306_v61 = vadd.f32 %v3300_v9, %v3280_v3  ;;  %v3180_v0 = vsel %vm413_vm1, %v3178_v24, %v7222_v4  ;;  %v3307_v20 = vadd.f32 %v3300_v9, %v3281_v23  ;;  %v3308_v2 = vadd.f32 %v3300_v9, %v3282_v18 }
 0x77e   : > { %v3548_v54 = vmul.f32 -1.442695, %v3302_v51  ;;  %v3549_v52 = vmul.f32 -1.442695, %v3303_v29  ;;  %v3550_v63 = vmul.f32 -1.442695, %v3304_v40  ;;  %v3309_v10 = vadd.f32 %v3300_v9, %v3283_v47 }
 0x77f   : > { %v3551_v42 = vmul.f32 -1.442695, %v3305_v17  ;;  %v3310_v30 = vadd.f32 %v3300_v9, %v3284_v50  ;;  %v3552_v62 = vmul.f32 -1.442695, %v3306_v61  ;;  %v3275_v8 = vmul.f32 %v7225_v26, %v3180_v0 }
 0x780   : > { %3980 = vpow2.f32 %v3548_v54  ;;  %v3311_v53 = vadd.f32 %v3300_v9, %v3285_v22  ;;  %v3553_v7 = vmul.f32 -1.442695, %v3307_v20  ;;  %v3312_v5 = vadd.f32 %v3300_v9, %v3286_v49 }
 0x781   : > { %3982 = vpow2.f32 %v3549_v52  ;;  %v3554_v44 = vmul.f32 -1.442695, %v3308_v2  ;;  %v3313_v38 = vadd.f32 %v3300_v9, %v3287_v48  ;;  %v3555_v1 = vmul.f32 -1.442695, %v3309_v10 }
 0x782   : > { %3984 = vpow2.f32 %v3550_v63  ;;  %v3314_v25 = vadd.f32 %v3300_v9, %v3288_v41  ;;  %v3556_v33 = vmul.f32 -1.442695, %v3310_v30  ;;  %v3291_v19 = vadd.f32 %v3275_v8, %v3099_v56 }
 0x783   : > { %3986 = vpow2.f32 %v3551_v42  ;;  %v3315_v16 = vadd.f32 %v3300_v9, %v3289_v34  ;;  %v3557_v21 = vmul.f32 -1.442695, %v3311_v53  ;;  %v3316_v46 = vadd.f32 %v3300_v9, %v3290_v32 }
 0x784   : > { %3988 = vpow2.f32 %v3552_v62  ;;  %v3558_v3 = vmul.f32 -1.442695, %v3312_v5  ;;  %v3317_v6 = vadd.f32 %v3300_v9, %v3291_v19  ;;  %v3559_v11 = vmul.f32 -1.442695, %v3313_v38 }
 0x785   : > { %3990 = vpow2.f32 %v3553_v7  ;;  %v3560_v39 = vmul.f32 -1.442695, %v3314_v25  ;;  %v3561_v12 = vmul.f32 -1.442695, %v3315_v16  ;;  %v3562_v43 = vmul.f32 -1.442695, %v3316_v46 }
 0x786   : > { %3992 = vpow2.f32 %v3554_v44  ;;  %v3563_v59 = vmul.f32 -1.442695, %v3317_v6 }
 0x787   : > { %3994 = vpow2.f32 %v3555_v1 }
 0x788   : > { %3996 = vpow2.f32 %v3556_v33 }
 0x789   : > { %3998 = vpow2.f32 %v3557_v21 }
 0x78a   : > { %4000 = vpow2.f32 %v3558_v3 }
 0x78b   : > { %4002 = vpow2.f32 %v3559_v11 }
 0x78c   : > { %4004 = vpow2.f32 %v3560_v39 }
 0x78d   : > { %v3981_v23 = vpop.eup %3980  ;;  %4006 = vpow2.f32 %v3561_v12 }
 0x78e   : > { %v3983_v56 = vpop.eup %3982  ;;  %4008 = vpow2.f32 %v3562_v43  ;;  %v3366_v18 = vadd.f32 1.0, %v3981_v23 }
 0x78f   : > { %v3985_v58 = vpop.eup %3984  ;;  %4010 = vpow2.f32 %v3563_v59  ;;  %v3367_v15 = vadd.f32 1.0, %v3983_v56 }
 0x790   : > { %v3987_v24 = vpop.eup %3986  ;;  %v3368_v9 = vadd.f32 1.0, %v3985_v58  ;;  %4012 = vrcp.f32 %v3366_v18 }
 0x791   : > { %v3989_v31 = vpop.eup %3988  ;;  %v3369_v51 = vadd.f32 1.0, %v3987_v24  ;;  %4014 = vrcp.f32 %v3367_v15 }
 0x792   : > { %v3991_v29 = vpop.eup %3990  ;;  %v3370_v13 = vadd.f32 1.0, %v3989_v31  ;;  %4016 = vrcp.f32 %v3368_v9 }
 0x793   : > { %v3993_v40 = vpop.eup %3992  ;;  %v3371_v47 = vadd.f32 1.0, %v3991_v29  ;;  %4018 = vrcp.f32 %v3369_v51 }
 0x794   : > { %v3995_v50 = vpop.eup %3994  ;;  %v3372_v37 = vadd.f32 1.0, %v3993_v40  ;;  %4020 = vrcp.f32 %v3370_v13 }
 0x795   : > { %v3997_v36 = vpop.eup %3996  ;;  %v3373_v17 = vadd.f32 1.0, %v3995_v50  ;;  %4022 = vrcp.f32 %v3371_v47 }
 0x796   : > { %v3999_v22 = vpop.eup %3998  ;;  %v3374_v49 = vadd.f32 1.0, %v3997_v36  ;;  %4024 = vrcp.f32 %v3372_v37 }
 0x797   : > { %v4001_v45 = vpop.eup %4000  ;;  %v3375_v61 = vadd.f32 1.0, %v3999_v22  ;;  %4026 = vrcp.f32 %v3373_v17 }
 0x798   : > { %v4003_v55 = vpop.eup %4002  ;;  %v3376_v35 = vadd.f32 1.0, %v4001_v45  ;;  %4028 = vrcp.f32 %v3374_v49 }
 0x799   : > { %v4005_v4 = vpop.eup %4004  ;;  %v3377_v0 = vadd.f32 1.0, %v4003_v55  ;;  %4030 = vrcp.f32 %v3375_v61 }
 0x79a   : > { %v4007_v60 = vpop.eup %4006  ;;  %v3378_v20 = vadd.f32 1.0, %v4005_v4  ;;  %4032 = vrcp.f32 %v3376_v35 }
 0x79b   : > { %v4009_v2 = vpop.eup %4008  ;;  %v3379_v54 = vadd.f32 1.0, %v4007_v60  ;;  %4034 = vrcp.f32 %v3377_v0 }
 0x79c   : > { %v4011_v52 = vpop.eup %4010  ;;  %v3380_v63 = vadd.f32 1.0, %v4009_v2  ;;  %4036 = vrcp.f32 %v3378_v20 }
 0x79d   : > { %v4013_v48 = vpop.eup %4012  ;;  %v3381_v14 = vadd.f32 1.0, %v4011_v52  ;;  %4038 = vrcp.f32 %v3379_v54 }
 0x79e   : > { %v4015_v57 = vpop.eup %4014  ;;  %4040 = vrcp.f32 %v3380_v63  ;;  %3414 = vst.msk [vmem:[%s7060_s13] sm:$0xff] %vm767_vm2, %v4013_v48 }
 0x79f   : > { %v4017_v10 = vpop.eup %4016  ;;  %4042 = vrcp.f32 %v3381_v14  ;;  %3415 = vst.msk [vmem:[%s7060_s13 + $0x8] sm:$0xff] %vm767_vm2, %v4015_v57 }
 0x7a0   : > { %v4019_v42 = vpop.eup %4018  ;;  %3416 = vst.msk [vmem:[%s7060_s13 + $0x10] sm:$0xff] %vm767_vm2, %v4017_v10 }
 0x7a1   : > { %v4021_v28 = vpop.eup %4020  ;;  %3417 = vst.msk [vmem:[%s7060_s13 + $0x18] sm:$0xff] %vm767_vm2, %v4019_v42 }
 0x7a2   : > { %v4023_v27 = vpop.eup %4022  ;;  %3418 = vst.msk [vmem:[%s7060_s13 + $0x20] sm:$0xff] %vm767_vm2, %v4021_v28 }
 0x7a3   : > { %v4025_v30 = vpop.eup %4024  ;;  %3419 = vst.msk [vmem:[%s7060_s13 + $0x28] sm:$0xff] %vm767_vm2, %v4023_v27 }
 0x7a4   : > { %v4027_v62 = vpop.eup %4026  ;;  %3420 = vst.msk [vmem:[%s7060_s13 + $0x30] sm:$0xff] %vm767_vm2, %v4025_v30 }
 0x7a5   : > { %v4029_v26 = vpop.eup %4028  ;;  %3421 = vst.msk [vmem:[%s7060_s13 + $0x38] sm:$0xff] %vm767_vm2, %v4027_v62 }
 0x7a6   : > { %v4031_v8 = vpop.eup %4030  ;;  %3422 = vst.msk [vmem:[%s7060_s13 + $0x40] sm:$0xff] %vm767_vm2, %v4029_v26 }
 0x7a7   : > { %v4033_v53 = vpop.eup %4032  ;;  %3423 = vst.msk [vmem:[%s7060_s13 + $0x48] sm:$0xff] %vm767_vm2, %v4031_v8 }
 0x7a8   : > { %v4035_v7 = vpop.eup %4034  ;;  %3424 = vst.msk [vmem:[%s7060_s13 + $0x50] sm:$0xff] %vm767_vm2, %v4033_v53 }
 0x7a9   : > { %v4037_v41 = vpop.eup %4036  ;;  %3425 = vst.msk [vmem:[%s7060_s13 + $0x58] sm:$0xff] %vm767_vm2, %v4035_v7 }
 0x7aa   : > { %v4039_v5 = vpop.eup %4038  ;;  %3426 = vst.msk [vmem:[%s7060_s13 + $0x60] sm:$0xff] %vm767_vm2, %v4037_v41 }
 0x7ab   : > { %v4041_v44 = vpop.eup %4040  ;;  %3427 = vst.msk [vmem:[%s7060_s13 + $0x68] sm:$0xff] %vm767_vm2, %v4039_v5 }
 0x7ac   : > { %v4043_v34 = vpop.eup %4042  ;;  %3428 = vst.msk [vmem:[%s7060_s13 + $0x70] sm:$0xff] %vm767_vm2, %v4041_v44 }
 0x7ad   : > { %3429 = vst.msk [vmem:[%s7060_s13 + $0x78] sm:$0xff] %vm767_vm2, %v4043_v34 }
 0x7ae   : > { %4089 = shalt.err (!%p4086_p3)
}
 0x7af   : > { %s4090_s28 = scalar_lea.hbm %s7093_s26, 2048  ;;  %s4094_s29 = scalar_lea.hbm %s7155_s10, 4096 }
 0x7b0   : > { %p4091_p4 = scmp.ne.s32.totalorder %s7093_s26, %s4090_s28  ;;  %p4095_p9 = scmp.lt.s32.totalorder %s7093_s26, %s7155_s10 }
 0x7b1   : > { %p4096_p10 = scmp.lt.s32.totalorder %s4094_s29, %s4090_s28 }
 0x7b2   : > { %p4092_p7 = pnand %p4091_p4, %p4250_p5 }
 0x7b3   : > { %p4097_p11 = por %p4096_p10, %p4095_p9 }
 0x7b4   : > { %p4093_p8 = pneg %p4092_p7 }
 0x7b6   : > { %p4098_p12 = pnand %p4097_p11, %p4093_p8 }
 0x7b8   : > { %4101 = shalt.err (!%p4098_p12)
}
 0x7b9   : > { %s4152_s27 = smov 128   ;;  %s4153_s11 = smov 8  }
 0x7ba   : > { %3898 = dma.vmem_to_hbm [thread:$0]  (%p4250_p5), %s7095_s19, 2048, %s7093_s26, %s7105_s8, %s4152_s27, %s4152_s27, %s4153_s11  }
 0x7bb PF: > { %p3904_p13 = scmp.ge.s32.totalorder %s4136_s18, 2  ;;  %s3459_s30 = sand.u32 1, %s4124_s15  }
 0x7bc   : > { %s3460_s12 = scalar_lea.sflag [#allocation4], %s3459_s30 }
 0x7bd   : > { %p3901_p0 = pnand %p3904_p13, %p4254_p6 }
 0x7bf   : > { %p3902_p1 = pneg %p3901_p0 }
 0x7c1   : > { %4119 = dma.done.wait (%p3902_p1), %s3460_s12, 2048  }
 0x7c2   : > { %4121 = vsyncadd (%p3902_p1), %s3460_s12, 4294965248  ;;  %p22_p2 = scmp.ge.s32.totalorder %s4237_s20, 4   ;;  %s7226_s15 = smov %s4128_s16 }
 0x7c3   : > { %s7227_s16 = smov %s4132_s17  ;;  %s7228_s17 = smov %s4248_s23 }
 0x7c4   : > { %s7229_s18 = smov %s4237_s20  ;;  %24 = sbr.rel (!%p22_p2) target bundleno = 6 (0x6), region = 95 }
 0x7c9   :  { %3465 = vsyncpa [#allocation4], 1 }
 0x7ca   :  { %3467 = vsyncpa [#allocation4 + $0x1], 1 }

</bundles_post_ra>
